<compile_context>
chip_gen: v5e
topology: v5e:2x2
jax: 0.10.0
libtpu: 0.0.40
codegen_flags: <defaults>
</compile_context>

<pallas_src>
import jax
import jax.numpy as jnp
from jax.experimental import pallas as pl
from jax.experimental.pallas import tpu as pltpu

LANE = 128
_COL0 = 16   # bf16 sublane tile is (16,128): 16-align the interior store / center tap


def _round_up(x, m):
    return (x + m - 1) // m * m


def _vmem_capacity_bytes():
    """Generation-aware VMEM capacity (128 MiB v5e/v6e, 64 MiB v7x)."""
    try:
        info = pltpu.get_tpu_info()
        cap = getattr(info, "vmem_capacity_bytes", None)
        if cap:
            return int(cap)
    except Exception:
        pass
    return 64 << 20          # conservative fallback (safe on every generation)


def _tile_footprint_bytes(th, W, K1, Cpm, Cpo):
    """Rough per-grid-step VMEM footprint for a row tile of TH output rows."""
    m1 = (th + 2) * W                      # conv1 rows (includes 2-row halo)
    m2 = th * W                            # conv2 / output rows
    win_blk = m1 * K1 * 2 * 2              # bf16 input window, double-buffered
    out_blk = m2 * Cpo * 2 * 2             # bf16 output block, double-buffered
    consts = (K1 * Cpm + 9 * Cpm * Cpo) * 2 * 2 + (Cpm + Cpo) * 4 * 2
    mid = (th + 2) * (W + 2 * _COL0) * Cpm * 2          # bf16 scratch
    temps = (m1 * Cpm * 4                  # y1 f32
             + m1 * Cpm * 2                # y1 bf16 relayout
             + m2 * 2 * Cpm * 2            # one 2-tap lhs slab (bf16)
             + m2 * Cpo * 4 * 2)           # f32 accumulator + epilogue
    return win_blk + out_blk + consts + mid + temps


def _pick_tile_rows(H, W, K1, Cpm, Cpo, budget_bytes):
    """Largest divisor of H whose per-step footprint fits the budget."""
    for th in range(H, 0, -1):
        if H % th:
            continue
        fp = _tile_footprint_bytes(th, W, K1, Cpm, Cpo)
        if fp <= budget_bytes:
            return th, fp
    return 1, _tile_footprint_bytes(1, W, K1, Cpm, Cpo)


def _double_conv_kernel(win_ref, w1_ref, b1_ref, w2_ref, b2_ref, o_ref, mid_ref):
    """Fused (conv3x3 + folded BN + ReLU) x 2 for one (image, row-tile) step.

    win_ref: (1, 1, (TH+2)*W, K1)  bf16  wrapper-built im2col window (1-row halo)
    w1_ref : (K1, Cpm)             bf16  conv1 weights, BN1 scale folded
    b1_ref : (1, Cpm)              f32   folded BN1 bias
    w2_ref : (9*Cpm, Cpo)          bf16  conv2 weights (tap-major), BN2 folded
    b2_ref : (1, Cpo)              f32   folded BN2 bias
    o_ref  : (1, 1, TH*W, Cpo)     bf16  lane-dense output block
    mid_ref: (TH+2, W+32, Cpm)     bf16  scratch: column-padded intermediate
    """
    TH2, Wp, Cpm = mid_ref.shape
    TH = TH2 - 2
    W = Wp - 2 * _COL0
    Cpo = o_ref.shape[-1]
    t = pl.program_id(1)

    # ---- stage 1: conv3x3 (pad=1) + folded BN + ReLU -----------------------
    # One MXU matmul over the wrapper-built, jointly-padded im2col window.
    lhs1 = win_ref[0, 0]                                       # ((TH+2)*W, K1)
    y1 = jnp.dot(lhs1, w1_ref[...], preferred_element_type=jnp.float32)
    y1 = jnp.maximum(y1 + b1_ref[...], 0.0)                    # f32
    # Dropout2d #1: identity (eval mode).

    # ---- handoff: y1 -> column-padded VMEM scratch (never touches HBM) -----
    # Halo-only init (only the left/right zero columns are ever read as halo);
    # the interior store is unmasked, lane-dense and 16-aligned for bf16.
    mid_ref[:, 0:_COL0, :] = jnp.zeros((TH2, _COL0, Cpm), mid_ref.dtype)
    mid_ref[:, _COL0 + W:Wp, :] = jnp.zeros((TH2, _COL0, Cpm), mid_ref.dtype)
    mid_ref[:, _COL0:_COL0 + W, :] = (
        y1.astype(mid_ref.dtype).reshape(TH2, W, Cpm))

    # Rows of y1 outside the image must be exactly zero for conv2's padding;
    # the window's zero patch rows produce relu(b1) != 0 there, so mask them.
    @pl.when(t == 0)
    def _():
        mid_ref[0:1, :, :] = jnp.zeros((1, Wp, Cpm), mid_ref.dtype)

    @pl.when(t == pl.num_programs(1) - 1)
    def _():
        mid_ref[TH + 1:TH + 2, :, :] = jnp.zeros((1, Wp, Cpm), mid_ref.dtype)

    # ---- stage 2: conv3x3 (pad=1) + folded BN + ReLU -----------------------
    # Per-tap-pair accumulation: no 9x im2col patch is ever materialized.
    def tap(ti):
        ky, kx = divmod(ti, 3)
        c0 = _COL0 - 1 + kx
        return mid_ref[ky:ky + TH, c0:c0 + W, :].reshape(TH * W, Cpm)

    def pair_dot(p):
        lhs = jnp.concatenate([tap(2 * p), tap(2 * p + 1)], axis=1)  # K = 2*Cpm
        return jnp.dot(lhs, w2_ref[2 * p * Cpm:(2 * p + 2) * Cpm, :],
                       preferred_element_type=jnp.float32)

    acc = pair_dot(0)
    for p in range(1, 4):
        acc = acc + pair_dot(p)
    acc = acc + jnp.dot(tap(8), w2_ref[8 * Cpm:9 * Cpm, :],
                        preferred_element_type=jnp.float32)
    y2 = jnp.maximum(acc + b2_ref[...], 0.0)                    # (TH*W, Cpo) f32
    # Dropout2d #2: identity (eval mode).

    o_ref[0, 0] = y2.astype(o_ref.dtype)                        # bf16 writeback


def unet_double_conv_block(x_nchw, params):
    """Fused UNetDoubleConvBlock forward (eval mode). NCHW in / NCHW out."""
    w1, s1, b1 = params["w1"], params["s1"], params["b1"]
    w2, s2, b2 = params["w2"], params["s2"], params["b2"]
    N, Cin, H, W = x_nchw.shape
    Cmid = w1.shape[3]
    Cout = w2.shape[3]
    K1 = _round_up(9 * Cin, LANE)
    Cpm = _round_up(Cmid, LANE)
    Cpo = _round_up(Cout, LANE)

    vmem_cap = _vmem_capacity_bytes()
    TH, fp = _pick_tile_rows(H, W, K1, Cpm, Cpo, int(0.45 * vmem_cap))
    T = H // TH
    vmem_limit = int(min(max(2 * fp, 32 << 20), int(0.85 * vmem_cap)))

    # ---- wrapper-side prep (plain XLA; cheap relative to the convs) --------
    x = jnp.transpose(x_nchw, (0, 2, 3, 1)).astype(jnp.bfloat16)   # NHWC bf16
    xp = jnp.pad(x, ((0, 0), (1, 1), (1, 1), (0, 0)))
    # conv1 im2col in the wrapper with 9*Cin padded JOINTLY to 128 lanes.
    patches = jnp.concatenate(
        [xp[:, ky:ky + H, kx:kx + W, :] for ky in range(3) for kx in range(3)],
        axis=-1)                                                   # (N,H,W,9*Cin)
    patches = jnp.pad(patches, ((0, 0), (0, 0), (0, 0), (0, K1 - 9 * Cin)))
    # One zero row top/bottom so every row tile reads a full (TH+2)-row window.
    patches = jnp.pad(patches, ((0, 0), (1, 1), (0, 0), (0, 0)))   # (N,H+2,W,K1)
    windows = jnp.stack(
        [patches[:, t * TH:t * TH + TH + 2] for t in range(T)], axis=1)
    windows = windows.reshape(N, T, (TH + 2) * W, K1)              # lane-dense

    # Fold BN scale into the conv weights; lane-aligned im2col slabs in bf16.
    w1s = (w1 * s1[None, None, None, :]).reshape(9 * Cin, Cmid)
    w1s = jnp.pad(w1s, ((0, K1 - 9 * Cin), (0, Cpm - Cmid))).astype(jnp.bfloat16)
    w2s = jnp.pad(w2 * s2[None, None, None, :],
                  ((0, 0), (0, 0), (0, Cpm - Cmid), (0, Cpo - Cout)))
    w2s = w2s.reshape(9 * Cpm, Cpo).astype(jnp.bfloat16)
    b1f = jnp.pad(b1.reshape(1, Cmid), ((0, 0), (0, Cpm - Cmid))).astype(jnp.float32)
    b2f = jnp.pad(b2.reshape(1, Cout), ((0, 0), (0, Cpo - Cout))).astype(jnp.float32)

    def _const_spec(shape):
        # Constant index_map => the pipeline never re-fetches these operands.
        return pl.BlockSpec(shape, lambda n, t: (0,) * len(shape))

    out = pl.pallas_call(
        _double_conv_kernel,
        out_shape=jax.ShapeDtypeStruct((N, T, TH * W, Cpo), jnp.bfloat16),
        grid=(N, T),
        in_specs=[
            pl.BlockSpec((1, 1, (TH + 2) * W, K1), lambda n, t: (n, t, 0, 0)),
            _const_spec((K1, Cpm)),
            _const_spec((1, Cpm)),
            _const_spec((9 * Cpm, Cpo)),
            _const_spec((1, Cpo)),
        ],
        out_specs=pl.BlockSpec((1, 1, TH * W, Cpo), lambda n, t: (n, t, 0, 0)),
        scratch_shapes=[pltpu.VMEM((TH + 2, W + 2 * _COL0, Cpm), jnp.bfloat16)],
        compiler_params=pltpu.CompilerParams(
            dimension_semantics=("parallel", "parallel"),
            vmem_limit_bytes=vmem_limit),
    )(windows, w1s, b1f, w2s, b2f)

    # Drop channel padding, restore NCHW / f32 like the PyTorch module.
    out = out.reshape(N, H, W, Cpo)[..., :Cout]
    return jnp.transpose(out, (0, 3, 1, 2)).astype(jnp.float32)


# ---------------- pure-JAX reference (matches kernel numerics) ----------------
def _double_conv_ref(x_nchw, params):
    w1, s1, b1 = params["w1"], params["s1"], params["b1"]
    w2, s2, b2 = params["w2"], params["s2"], params["b2"]

    def _bf16(a):
        return a.astype(jnp.bfloat16)

    def _conv(x_, w_):
        return jax.lax.conv_general_dilated(
            x_, w_, window_strides=(1, 1), padding=((1, 1), (1, 1)),
            dimension_numbers=("NHWC", "HWIO", "NHWC"),
            preferred_element_type=jnp.float32)

    x = _bf16(jnp.transpose(x_nchw, (0, 2, 3, 1)))
    w1s = _bf16(w1 * s1[None, None, None, :])
    w2s = _bf16(w2 * s2[None, None, None, :])
    y1 = jnp.maximum(_conv(x, w1s) + b1.reshape(1, 1, 1, -1), 0.0)
    y1 = _bf16(y1)                               # kernel keeps intermediate in bf16
    y2 = jnp.maximum(_conv(y1, w2s) + b2.reshape(1, 1, 1, -1), 0.0)
    y2 = _bf16(y2).astype(jnp.float32)           # kernel writes bf16 to HBM
    return jnp.transpose(y2, (0, 3, 1, 2))


def _fold_bn(gamma, beta, running_mean, running_var, eps=1e-5):
    scale = gamma / jnp.sqrt(running_var + eps)
    bias = beta - running_mean * scale
    return scale, bias


def make_params(key, in_channels, out_channels):
    k1, k2 = jax.random.split(key)
    fan1 = in_channels * 9
    w1_oihw = jax.random.normal(k1, (out_channels, in_channels, 3, 3),
                                jnp.float32) * (2.0 / fan1) ** 0.5
    fan2 = out_channels * 9
    w2_oihw = jax.random.normal(k2, (out_channels, out_channels, 3, 3),
                                jnp.float32) * (2.0 / fan2) ** 0.5
    w1 = jnp.transpose(w1_oihw, (2, 3, 1, 0))   # (3,3,Cin,Cout)  HWIO
    w2 = jnp.transpose(w2_oihw, (2, 3, 1, 0))   # (3,3,Cout,Cout) HWIO

    c = out_channels
    idx = jnp.arange(c, dtype=jnp.float32)
    g1, b1 = 1.0 + 0.10 * idx, 0.01 * idx
    m1, v1 = 0.05 * idx, 1.0 + 0.02 * idx
    g2, b2 = 1.0 - 0.05 * idx, -0.02 * idx
    m2, v2 = -0.03 * idx, 1.0 + 0.01 * idx
    s1, bb1 = _fold_bn(g1, b1, m1, v1)
    s2, bb2 = _fold_bn(g2, b2, m2, v2)
    return {"w1": w1, "s1": s1, "b1": bb1, "w2": w2, "s2": s2, "b2": bb2}


if __name__ == "__main__":
    key = jax.random.PRNGKey(0)
    kx, kp = jax.random.split(key)

    N, Cin, H, W = 2, 4, 16, 16
    Cout = 8

    x = jax.random.normal(kx, (N, Cin, H, W), jnp.float32)   # NCHW like PyTorch
    params = make_params(kp, Cin, Cout)

    fwd = jax.jit(unet_double_conv_block)
    out = jax.block_until_ready(fwd(x, params))

    ref = _double_conv_ref(x, params)
    assert out.shape == (N, Cout, H, W), out.shape
    max_err = float(jnp.max(jnp.abs(out - ref)))
    assert jnp.allclose(out, ref, atol=3e-2, rtol=3e-2), max_err

    print("KERNEL_OK")
</pallas_src>

<mosaic_0001>
module attributes {stable_mosaic.version = 11 : i64} {
  func.func @_double_conv_kernel(%arg0: i32, %arg1: i32, %arg2: memref<1x1x288x128xbf16, #tpu.memory_space<vmem>>, %arg3: memref<128x128xbf16, #tpu.memory_space<vmem>>, %arg4: memref<1x128xf32, #tpu.memory_space<vmem>>, %arg5: memref<1152x128xbf16, #tpu.memory_space<vmem>>, %arg6: memref<1x128xf32, #tpu.memory_space<vmem>>, %arg7: memref<1x1x256x128xbf16, #tpu.memory_space<vmem>>, %arg8: memref<18x48x128xbf16, #tpu.memory_space<vmem>>) attributes {dimension_semantics = [#tpu.dimension_semantics<parallel>, #tpu.dimension_semantics<parallel>], iteration_bounds = array<i64: 2, 1>, scalar_prefetch = 0 : i64, scratch_operands = 1 : i64, tpu.core_type = #tpu.core_type<tc>, window_params = [{transform_indices = @transform_0, window_bounds = array<i64: 1, 1, 288, 128>}, {pipeline_mode = #tpu.pipeline_mode<synchronous>, transform_indices = @transform_1, window_bounds = array<i64: 128, 128>}, {pipeline_mode = #tpu.pipeline_mode<synchronous>, transform_indices = @transform_2, window_bounds = array<i64: 1, 128>}, {pipeline_mode = #tpu.pipeline_mode<synchronous>, transform_indices = @transform_3, window_bounds = array<i64: 1152, 128>}, {pipeline_mode = #tpu.pipeline_mode<synchronous>, transform_indices = @transform_4, window_bounds = array<i64: 1, 128>}, {transform_indices = @transform_5, window_bounds = array<i64: 1, 1, 256, 128>}]} {
    %c0 = arith.constant 0 : index
    %c0_0 = arith.constant 0 : index
    %c0_1 = arith.constant 0 : index
    %c0_2 = arith.constant 0 : index
    %0 = vector.load %arg2[%c0, %c0_0, %c0_1, %c0_2] : memref<1x1x288x128xbf16, #tpu.memory_space<vmem>>, vector<1x1x288x128xbf16>
    %1 = vector.shape_cast %0 : vector<1x1x288x128xbf16> to vector<288x128xbf16>
    %c0_3 = arith.constant 0 : index
    %c0_4 = arith.constant 0 : index
    %2 = vector.load %arg3[%c0_3, %c0_4] : memref<128x128xbf16, #tpu.memory_space<vmem>>, vector<128x128xbf16>
    %cst = arith.constant dense<0.000000e+00> : vector<288x128xf32>
    %3 = tpu.matmul %1, %2, %cst {dimension_numbers = #tpu.dot_dimension_numbers<[1], [0], [0], [1], [0, 0, 1, 1], [], []>} : vector<288x128xbf16>, vector<128x128xbf16>, vector<288x128xf32> -> vector<288x128xf32>
    %c0_5 = arith.constant 0 : index
    %c0_6 = arith.constant 0 : index
    %4 = vector.load %arg4[%c0_5, %c0_6] : memref<1x128xf32, #tpu.memory_space<vmem>>, vector<1x128xf32>
    %5 = vector.broadcast %4 : vector<1x128xf32> to vector<288x128xf32>
    %6 = arith.addf %3, %5 : vector<288x128xf32>
    %cst_7 = arith.constant 0.000000e+00 : f32
    %7 = vector.broadcast %cst_7 : f32 to vector<288x128xf32>
    %8 = arith.maximumf %6, %7 : vector<288x128xf32>
    %cst_8 = arith.constant 0.000000e+00 : bf16
    %9 = vector.broadcast %cst_8 : bf16 to vector<18x16x128xbf16>
    %c0_9 = arith.constant 0 : index
    %c0_10 = arith.constant 0 : index
    %c0_11 = arith.constant 0 : index
    %10 = vector.load %arg8[%c0_9, %c0_10, %c0_11] : memref<18x48x128xbf16, #tpu.memory_space<vmem>>, vector<18x16x128xbf16>
    tpu.vector_store %arg8[%c0_9, %c0_10, %c0_11], %9 {strides = array<i32>} : memref<18x48x128xbf16, #tpu.memory_space<vmem>>, vector<18x16x128xbf16>,
    %cst_12 = arith.constant 0.000000e+00 : bf16
    %11 = vector.broadcast %cst_12 : bf16 to vector<18x16x128xbf16>
    %c0_13 = arith.constant 0 : index
    %c32 = arith.constant 32 : index
    %c0_14 = arith.constant 0 : index
    %12 = vector.load %arg8[%c0_13, %c32, %c0_14] : memref<18x48x128xbf16, #tpu.memory_space<vmem>>, vector<18x16x128xbf16>
    tpu.vector_store %arg8[%c0_13, %c32, %c0_14], %11 {strides = array<i32>} : memref<18x48x128xbf16, #tpu.memory_space<vmem>>, vector<18x16x128xbf16>,
    %13 = arith.truncf %8 : vector<288x128xf32> to vector<288x128xbf16>
    %14 = vector.shape_cast %13 : vector<288x128xbf16> to vector<18x16x128xbf16>
    %c0_15 = arith.constant 0 : index
    %c16 = arith.constant 16 : index
    %c0_16 = arith.constant 0 : index
    %15 = vector.load %arg8[%c0_15, %c16, %c0_16] : memref<18x48x128xbf16, #tpu.memory_space<vmem>>, vector<18x16x128xbf16>
    tpu.vector_store %arg8[%c0_15, %c16, %c0_16], %14 {strides = array<i32>} : memref<18x48x128xbf16, #tpu.memory_space<vmem>>, vector<18x16x128xbf16>,
    %c0_i32 = arith.constant 0 : i32
    %16 = arith.cmpi eq, %arg1, %c0_i32 : i32
    %17 = arith.extui %16 : i1 to i32
    %c0_i32_17 = arith.constant 0 : i32
    %18 = arith.cmpi ne, %17, %c0_i32_17 : i32
    scf.if %18 {
      %cst_61 = arith.constant 0.000000e+00 : bf16
      %67 = vector.broadcast %cst_61 : bf16 to vector<1x48x128xbf16>
      %c0_62 = arith.constant 0 : index
      %c0_63 = arith.constant 0 : index
      %c0_64 = arith.constant 0 : index
      %68 = vector.load %arg8[%c0_62, %c0_63, %c0_64] : memref<18x48x128xbf16, #tpu.memory_space<vmem>>, vector<1x48x128xbf16>
      tpu.vector_store %arg8[%c0_62, %c0_63, %c0_64], %67 {strides = array<i32>} : memref<18x48x128xbf16, #tpu.memory_space<vmem>>, vector<1x48x128xbf16>,
    } else {
    }
    %c0_i32_18 = arith.constant 0 : i32
    %19 = arith.cmpi eq, %arg1, %c0_i32_18 : i32
    %20 = arith.extui %19 : i1 to i32
    %c0_i32_19 = arith.constant 0 : i32
    %21 = arith.cmpi ne, %20, %c0_i32_19 : i32
    scf.if %21 {
      %cst_61 = arith.constant 0.000000e+00 : bf16
      %67 = vector.broadcast %cst_61 : bf16 to vector<1x48x128xbf16>
      %c17_62 = arith.constant 17 : index
      %c0_63 = arith.constant 0 : index
      %c0_64 = arith.constant 0 : index
      %68 = vector.load %arg8[%c17_62, %c0_63, %c0_64] : memref<18x48x128xbf16, #tpu.memory_space<vmem>>, vector<1x48x128xbf16>
      tpu.vector_store %arg8[%c17_62, %c0_63, %c0_64], %67 {strides = array<i32>} : memref<18x48x128xbf16, #tpu.memory_space<vmem>>, vector<1x48x128xbf16>,
    } else {
    }
    %c0_20 = arith.constant 0 : index
    %c15 = arith.constant 15 : index
    %c0_21 = arith.constant 0 : index
    %22 = vector.load %arg8[%c0_20, %c15, %c0_21] : memref<18x48x128xbf16, #tpu.memory_space<vmem>>, vector<16x16x128xbf16>
    %23 = vector.shape_cast %22 : vector<16x16x128xbf16> to vector<256x128xbf16>
    %c0_22 = arith.constant 0 : index
    %c16_23 = arith.constant 16 : index
    %c0_24 = arith.constant 0 : index
    %24 = vector.load %arg8[%c0_22, %c16_23, %c0_24] : memref<18x48x128xbf16, #tpu.memory_space<vmem>>, vector<16x16x128xbf16>
    %25 = vector.shape_cast %24 : vector<16x16x128xbf16> to vector<256x128xbf16>
    %26 = tpu.concatenate %23, %25 in 1 : vector<256x128xbf16>, vector<256x128xbf16> -> vector<256x256xbf16>
    %c0_25 = arith.constant 0 : index
    %c0_26 = arith.constant 0 : index
    %27 = vector.load %arg5[%c0_25, %c0_26] : memref<1152x128xbf16, #tpu.memory_space<vmem>>, vector<256x128xbf16>
    %cst_27 = arith.constant dense<0.000000e+00> : vector<256x128xf32>
    %28 = tpu.matmul %26, %27, %cst_27 {dimension_numbers = #tpu.dot_dimension_numbers<[1], [0], [0], [1], [0, 0, 1, 1], [], []>} : vector<256x256xbf16>, vector<256x128xbf16>, vector<256x128xf32> -> vector<256x128xf32>
    %c0_28 = arith.constant 0 : index
    %c17 = arith.constant 17 : index
    %c0_29 = arith.constant 0 : index
    %29 = vector.load %arg8[%c0_28, %c17, %c0_29] : memref<18x48x128xbf16, #tpu.memory_space<vmem>>, vector<16x16x128xbf16>
    %30 = vector.shape_cast %29 : vector<16x16x128xbf16> to vector<256x128xbf16>
    %c1 = arith.constant 1 : index
    %c15_30 = arith.constant 15 : index
    %c0_31 = arith.constant 0 : index
    %31 = vector.load %arg8[%c1, %c15_30, %c0_31] : memref<18x48x128xbf16, #tpu.memory_space<vmem>>, vector<16x16x128xbf16>
    %32 = vector.shape_cast %31 : vector<16x16x128xbf16> to vector<256x128xbf16>
    %33 = tpu.concatenate %30, %32 in 1 : vector<256x128xbf16>, vector<256x128xbf16> -> vector<256x256xbf16>
    %c256 = arith.constant 256 : index
    %c0_32 = arith.constant 0 : index
    %34 = vector.load %arg5[%c256, %c0_32] : memref<1152x128xbf16, #tpu.memory_space<vmem>>, vector<256x128xbf16>
    %cst_33 = arith.constant dense<0.000000e+00> : vector<256x128xf32>
    %35 = tpu.matmul %33, %34, %cst_33 {dimension_numbers = #tpu.dot_dimension_numbers<[1], [0], [0], [1], [0, 0, 1, 1], [], []>} : vector<256x256xbf16>, vector<256x128xbf16>, vector<256x128xf32> -> vector<256x128xf32>
    %36 = arith.addf %28, %35 : vector<256x128xf32>
    %c1_34 = arith.constant 1 : index
    %c16_35 = arith.constant 16 : index
    %c0_36 = arith.constant 0 : index
    %37 = vector.load %arg8[%c1_34, %c16_35, %c0_36] : memref<18x48x128xbf16, #tpu.memory_space<vmem>>, vector<16x16x128xbf16>
    %38 = vector.shape_cast %37 : vector<16x16x128xbf16> to vector<256x128xbf16>
    %c1_37 = arith.constant 1 : index
    %c17_38 = arith.constant 17 : index
    %c0_39 = arith.constant 0 : index
    %39 = vector.load %arg8[%c1_37, %c17_38, %c0_39] : memref<18x48x128xbf16, #tpu.memory_space<vmem>>, vector<16x16x128xbf16>
    %40 = vector.shape_cast %39 : vector<16x16x128xbf16> to vector<256x128xbf16>
    %41 = tpu.concatenate %38, %40 in 1 : vector<256x128xbf16>, vector<256x128xbf16> -> vector<256x256xbf16>
    %c512 = arith.constant 512 : index
    %c0_40 = arith.constant 0 : index
    %42 = vector.load %arg5[%c512, %c0_40] : memref<1152x128xbf16, #tpu.memory_space<vmem>>, vector<256x128xbf16>
    %cst_41 = arith.constant dense<0.000000e+00> : vector<256x128xf32>
    %43 = tpu.matmul %41, %42, %cst_41 {dimension_numbers = #tpu.dot_dimension_numbers<[1], [0], [0], [1], [0, 0, 1, 1], [], []>} : vector<256x256xbf16>, vector<256x128xbf16>, vector<256x128xf32> -> vector<256x128xf32>
    %44 = arith.addf %36, %43 : vector<256x128xf32>
    %c2 = arith.constant 2 : index
    %c15_42 = arith.constant 15 : index
    %c0_43 = arith.constant 0 : index
    %45 = vector.load %arg8[%c2, %c15_42, %c0_43] : memref<18x48x128xbf16, #tpu.memory_space<vmem>>, vector<16x16x128xbf16>
    %46 = vector.shape_cast %45 : vector<16x16x128xbf16> to vector<256x128xbf16>
    %c2_44 = arith.constant 2 : index
    %c16_45 = arith.constant 16 : index
    %c0_46 = arith.constant 0 : index
    %47 = vector.load %arg8[%c2_44, %c16_45, %c0_46] : memref<18x48x128xbf16, #tpu.memory_space<vmem>>, vector<16x16x128xbf16>
    %48 = vector.shape_cast %47 : vector<16x16x128xbf16> to vector<256x128xbf16>
    %49 = tpu.concatenate %46, %48 in 1 : vector<256x128xbf16>, vector<256x128xbf16> -> vector<256x256xbf16>
    %c768 = arith.constant 768 : index
    %c0_47 = arith.constant 0 : index
    %50 = vector.load %arg5[%c768, %c0_47] : memref<1152x128xbf16, #tpu.memory_space<vmem>>, vector<256x128xbf16>
    %cst_48 = arith.constant dense<0.000000e+00> : vector<256x128xf32>
    %51 = tpu.matmul %49, %50, %cst_48 {dimension_numbers = #tpu.dot_dimension_numbers<[1], [0], [0], [1], [0, 0, 1, 1], [], []>} : vector<256x256xbf16>, vector<256x128xbf16>, vector<256x128xf32> -> vector<256x128xf32>
    %52 = arith.addf %44, %51 : vector<256x128xf32>
    %c2_49 = arith.constant 2 : index
    %c17_50 = arith.constant 17 : index
    %c0_51 = arith.constant 0 : index
    %53 = vector.load %arg8[%c2_49, %c17_50, %c0_51] : memref<18x48x128xbf16, #tpu.memory_space<vmem>>, vector<16x16x128xbf16>
    %54 = vector.shape_cast %53 : vector<16x16x128xbf16> to vector<256x128xbf16>
    %c1024 = arith.constant 1024 : index
    %c0_52 = arith.constant 0 : index
    %55 = vector.load %arg5[%c1024, %c0_52] : memref<1152x128xbf16, #tpu.memory_space<vmem>>, vector<128x128xbf16>
    %cst_53 = arith.constant dense<0.000000e+00> : vector<256x128xf32>
    %56 = tpu.matmul %54, %55, %cst_53 {dimension_numbers = #tpu.dot_dimension_numbers<[1], [0], [0], [1], [0, 0, 1, 1], [], []>} : vector<256x128xbf16>, vector<128x128xbf16>, vector<256x128xf32> -> vector<256x128xf32>
    %57 = arith.addf %52, %56 : vector<256x128xf32>
    %c0_54 = arith.constant 0 : index
    %c0_55 = arith.constant 0 : index
    %58 = vector.load %arg6[%c0_54, %c0_55] : memref<1x128xf32, #tpu.memory_space<vmem>>, vector<1x128xf32>
    %59 = vector.broadcast %58 : vector<1x128xf32> to vector<256x128xf32>
    %60 = arith.addf %57, %59 : vector<256x128xf32>
    %cst_56 = arith.constant 0.000000e+00 : f32
    %61 = vector.broadcast %cst_56 : f32 to vector<256x128xf32>
    %62 = arith.maximumf %60, %61 : vector<256x128xf32>
    %63 = arith.truncf %62 : vector<256x128xf32> to vector<256x128xbf16>
    %c0_57 = arith.constant 0 : index
    %c0_58 = arith.constant 0 : index
    %c0_59 = arith.constant 0 : index
    %c0_60 = arith.constant 0 : index
    %64 = vector.load %arg7[%c0_57, %c0_58, %c0_59, %c0_60] : memref<1x1x256x128xbf16, #tpu.memory_space<vmem>>, vector<1x1x256x128xbf16>
    %65 = vector.shape_cast %64 : vector<1x1x256x128xbf16> to vector<256x128xbf16>
    %66 = vector.shape_cast %63 : vector<256x128xbf16> to vector<1x1x256x128xbf16>
    tpu.vector_store %arg7[%c0_57, %c0_58, %c0_59, %c0_60], %66 {strides = array<i32>} : memref<1x1x256x128xbf16, #tpu.memory_space<vmem>>, vector<1x1x256x128xbf16>,
    return
  }
  func.func @transform_0(%arg0: i32, %arg1: i32) -> (i32, i32, i32, i32) {
    %c0_i32 = arith.constant 0 : i32
    %c0_i32_0 = arith.constant 0 : i32
    %c0_i32_1 = arith.constant 0 : i32
    return %arg0, %arg1, %c0_i32, %c0_i32_0 : i32, i32, i32, i32
  }
  func.func @transform_1(%arg0: i32, %arg1: i32) -> (i32, i32) {
    %c0_i32 = arith.constant 0 : i32
    %c0_i32_0 = arith.constant 0 : i32
    %c0_i32_1 = arith.constant 0 : i32
    return %c0_i32, %c0_i32_0 : i32, i32
  }
  func.func @transform_2(%arg0: i32, %arg1: i32) -> (i32, i32) {
    %c0_i32 = arith.constant 0 : i32
    %c0_i32_0 = arith.constant 0 : i32
    %c0_i32_1 = arith.constant 0 : i32
    return %c0_i32, %c0_i32_0 : i32, i32
  }
  func.func @transform_3(%arg0: i32, %arg1: i32) -> (i32, i32) {
    %c0_i32 = arith.constant 0 : i32
    %c0_i32_0 = arith.constant 0 : i32
    %c0_i32_1 = arith.constant 0 : i32
    return %c0_i32, %c0_i32_0 : i32, i32
  }
  func.func @transform_4(%arg0: i32, %arg1: i32) -> (i32, i32) {
    %c0_i32 = arith.constant 0 : i32
    %c0_i32_0 = arith.constant 0 : i32
    %c0_i32_1 = arith.constant 0 : i32
    return %c0_i32, %c0_i32_0 : i32, i32
  }
  func.func @transform_5(%arg0: i32, %arg1: i32) -> (i32, i32, i32, i32) {
    %c0_i32 = arith.constant 0 : i32
    %c0_i32_0 = arith.constant 0 : i32
    %c0_i32_1 = arith.constant 0 : i32
    return %arg0, %arg1, %c0_i32, %c0_i32_0 : i32, i32, i32, i32
  }
}

</mosaic_0001>

<bundles_post_ra>
// kernel: unet_double_conv_block.1
= control target key start
LH: loop header
LB: loop body
LE: loop exit
PB: predicated region body
PF: predicated region fallthrough
CT: control target
= control target key end

     0   :  { %s6544_s18 = smov 0   ;;  %s6546_s19 = smov 0   ;;  %s8465_s0 = inlined_call_operand.vmem [shape: bf16[2,1,288,128], index: 0, kind: input, shape index: {}]   ;;  %s8466_s1 = inlined_call_operand.vmem [shape: bf16[128,128], index: 1, kind: input, shape index: {}]   ;;  %s8467_s2 = inlined_call_operand.vmem [shape: f32[1,128], index: 2, kind: input, shape index: {}]   ;;  %s8468_s3 = inlined_call_operand.vmem [shape: bf16[1152,128], index: 3, kind: input, shape index: {}]   ;;  %s8469_s4 = inlined_call_operand.vmem [shape: f32[1,128], index: 4, kind: input, shape index: {}]   ;;  %s8470_s5 = inlined_call_operand.vmem [shape: bf16[2,1,256,128], index: 5, kind: output, shape index: {}]  }
   0x1   :  { %s6548_s20 = smov 0  }
   0x2 LB: > { %s27_s21 = sadd.s32 1, %s6507_s19  ;;  %p5455_p0 = scmp.ge.s32.totalorder %s6511_s20, 1  ;;  %s6511_s20 = sphi %s6548_s20, %s15_s20   ;;  %s6507_s19 = sphi %s6546_s19, %s8822_s19   ;;  %s6503_s18 = sphi %s6544_s18, %s8821_s18  }
   0x3   : > { %p29_p1 = scmp.ge.s32.totalorder %s27_s21, 2  ;;  %p207_p2 = scmp.lt.s32.totalorder %s6511_s20, 3 }
   0x5   : > { %s8824_s21 = smov (%p29_p1, %s27_s21), 0  ;;  %p208_p3 = pnand %p5455_p0, %p207_p2 }
   0x7   : > { %211 = sbr.rel (%p208_p3) target bundleno = 1128 (0x468), region = 40 }
   0xc   : > { %v6119_v0 = vld [vmem:[%s8466_s1 + $0x38] sm:$0xff]  ;;  %v6118_v1 = vld [vmem:[%s8466_s1 + $0x30] sm:$0xff]  ;;  %v6117_v2 = vld [vmem:[%s8466_s1 + $0x28] sm:$0xff]  ;;  %p243_p4 = scmp.lt.s32.totalorder %s6503_s18, 1  ;;  %v8523_v17 = vmov 0  }
   0xd   : > { %474 = vmatpush.bf16.msra.mxu0 %v6119_v0  ;;  %v6116_v3 = vld [vmem:[%s8466_s1 + $0x20] sm:$0xff]  ;;  %v6115_v4 = vld [vmem:[%s8466_s1 + $0x18] sm:$0xff]  ;;  %v6114_v5 = vld [vmem:[%s8466_s1 + $0x10] sm:$0xff]  ;;  %610 = vst [vmem:[#allocation2 + $0x4] sm:$0xf] %v8523_v17 }
   0xe   : > { %s8826_s18 = smov (!%p243_p4, %s6503_s18), 1  ;;  %v6113_v6 = vld [vmem:[%s8466_s1 + $0x8] sm:$0xff]  ;;  %v6112_v7 = vld [vmem:[%s8466_s1] sm:$0xff]  ;;  %v6175_v15 = vld [vmem:[%s8468_s3 + $0xb8] sm:$0xff]  ;;  %612 = vst [vmem:[#allocation2 + $0x1c] sm:$0xf] %v8523_v17 }
   0xf   : > { %s6459_s11 = smul.u32 144, %s8826_s18  ;;  %2265 = vmatpush.bf16.msra.mxu1 %v6175_v15  ;;  %6443 = vmatpush.bf16.msra.mxu3 %v6175_v15  ;;  %v6174_v16 = vld [vmem:[%s8468_s3 + $0xb0] sm:$0xff]  ;;  %614 = vst [vmem:[#allocation2 + $0x34] sm:$0xf] %v8523_v17  ;;  %v6623_v21 = vld [vmem:[%s8467_s2] ss:$0 sm:$0xff] }
  0x10   : > { %616 = vst [vmem:[#allocation2 + $0x4c] sm:$0xf] %v8523_v17  ;;  %v6173_v28 = vld [vmem:[%s8468_s3 + $0xa8] sm:$0xff]  ;;  %v6172_v30 = vld [vmem:[%s8468_s3 + $0xa0] sm:$0xff]  ;;  %v6171_v32 = vld [vmem:[%s8468_s3 + $0x98] sm:$0xff]  ;;  %s6093_s25 = sshll.u32 %s8826_s18, 7 }
  0x11   : > { %475 = vmatpush.bf16.msra.mxu0 %v6118_v1  ;;  %s6592_s16 = scalar_lea.vmem %s8465_s0, %s6459_s11  ;;  %618 = vst [vmem:[#allocation2 + $0x64] sm:$0xf] %v8523_v17  ;;  %v6170_v34 = vld [vmem:[%s8468_s3 + $0x90] sm:$0xff]  ;;  %v6169_v35 = vld [vmem:[%s8468_s3 + $0x88] sm:$0xff]  ;;  %v6168_v36 = vld [vmem:[%s8468_s3 + $0x80] sm:$0xff]  ;;  %s8179_s27 = scalar_lea.vmem %s8470_s5, %s6093_s25 }
  0x12   : > { %v6094_v8 = vld [vmem:[%s6592_s16] sm:$0xff]  ;;  %v6095_v9 = vld [vmem:[%s6592_s16 + $0x8] sm:$0xff]  ;;  %v6096_v10 = vld [vmem:[%s6592_s16 + $0x10] sm:$0xff]  ;;  %620 = vst [vmem:[#allocation2 + $0x7c] sm:$0xf] %v8523_v17 }
  0x13   : > { %v6097_v11 = vld [vmem:[%s6592_s16 + $0x18] sm:$0xff]  ;;  %v6098_v12 = vld [vmem:[%s6592_s16 + $0x20] sm:$0xff]  ;;  %v6099_v13 = vld [vmem:[%s6592_s16 + $0x28] sm:$0xff]  ;;  %2266 = vmatpush.bf16.msra.mxu1 %v6174_v16  ;;  %6444 = vmatpush.bf16.msra.mxu3 %v6174_v16  ;;  %622 = vst [vmem:[#allocation2 + $0x94] sm:$0xf] %v8523_v17 }
  0x14   : > { %v6100_v14 = vld [vmem:[%s6592_s16 + $0x30] sm:$0xff]  ;;  %v6101_v18 = vld [vmem:[%s6592_s16 + $0x38] sm:$0xff]  ;;  %624 = vst [vmem:[#allocation2 + $0xac] sm:$0xf] %v8523_v17  ;;  %v6102_v19 = vld [vmem:[%s6592_s16 + $0x40] sm:$0xff] }
  0x15   : > { %476 = vmatpush.bf16.msra.mxu0 %v6117_v2  ;;  %626 = vst [vmem:[#allocation2 + $0xc4] sm:$0xf] %v8523_v17  ;;  %v6103_v31 = vld [vmem:[%s6592_s16 + $0x48] sm:$0xff]  ;;  %v6104_v37 = vld [vmem:[%s6592_s16 + $0x50] sm:$0xff]  ;;  %v6105_v47 = vld [vmem:[%s6592_s16 + $0x58] sm:$0xff] }
  0x16   : > { %628 = vst [vmem:[#allocation2 + $0xdc] sm:$0xf] %v8523_v17  ;;  %vm1381_vm0 = vsmask.f32 3328  ;;  %vm1382_vm1 = vsmask.f32 7440 }
  0x17   : > { %630 = vst [vmem:[#allocation2 + $0xf4] sm:$0xf] %v8523_v17  ;;  %2267 = vmatpush.bf16.msra.mxu1 %v6173_v28  ;;  %6445 = vmatpush.bf16.msra.mxu3 %v6173_v28  ;;  %vm6700_vm2 = vmor %vm1381_vm0, %vm1382_vm1  ;;  %v6106_v15 = vld [vmem:[%s6592_s16 + $0x60] sm:$0xff]  ;;  %vm818_vm3 = vsmask.f32 256 }
  0x18   : > { %632 = vst [vmem:[#allocation2 + $0x10c] sm:$0xf] %v8523_v17  ;;  %vm819_vm4 = vsmask.f32 4368 }
  0x19   : > { %477 = vmatpush.bf16.msra.mxu0 %v6116_v3  ;;  %634 = vst [vmem:[#allocation2 + $0x124] sm:$0xf] %v8523_v17  ;;  %v8548_v3 = vmov 0  ;;  %vm6862_vm5 = vmor %vm818_vm3, %vm819_vm4 }
  0x1a   : > { %636 = vst [vmem:[#allocation2 + $0x13c] sm:$0xf] %v8523_v17  ;;  %v8549_v3 = vsel %vm6700_vm2, 4294967295, %v8548_v3 }
  0x1b   : > { %638 = vst [vmem:[#allocation2 + $0x154] sm:$0xf] %v8523_v17  ;;  %2268 = vmatpush.bf16.msra.mxu1 %v6172_v30  ;;  %6446 = vmatpush.bf16.msra.mxu3 %v6172_v30 }
  0x1c   : > { %640 = vst [vmem:[#allocation2 + $0x16c] sm:$0xf] %v8523_v17 }
  0x1d   : > { %478 = vmatpush.bf16.msra.mxu0 %v6115_v4  ;;  %642 = vst [vmem:[#allocation2 + $0x184] sm:$0xf] %v8523_v17 }
  0x1e   : > { %644 = vst [vmem:[#allocation2 + $0x19c] sm:$0xf] %v8523_v17 }
  0x1f   : > { %645 = vst [vmem:[#allocation2 + $0x10] sm:$0xf] %v8523_v17  ;;  %2269 = vmatpush.bf16.msra.mxu1 %v6171_v32  ;;  %6447 = vmatpush.bf16.msra.mxu3 %v6171_v32 }
  0x20   : > { %647 = vst [vmem:[#allocation2 + $0x28] sm:$0xf] %v8523_v17 }
  0x21   : > { %479 = vmatpush.bf16.msra.mxu0 %v6114_v5  ;;  %649 = vst [vmem:[#allocation2 + $0x40] sm:$0xf] %v8523_v17 }
  0x22   : > { %651 = vst [vmem:[#allocation2 + $0x58] sm:$0xf] %v8523_v17 }
  0x23   : > { %653 = vst [vmem:[#allocation2 + $0x70] sm:$0xf] %v8523_v17  ;;  %2270 = vmatpush.bf16.msra.mxu1 %v6170_v34  ;;  %6448 = vmatpush.bf16.msra.mxu3 %v6170_v34 }
  0x24   : > { %655 = vst [vmem:[#allocation2 + $0x88] sm:$0xf] %v8523_v17 }
  0x25   : > { %480 = vmatpush.bf16.msra.mxu0 %v6113_v6  ;;  %657 = vst [vmem:[#allocation2 + $0xa0] sm:$0xf] %v8523_v17 }
  0x26   : > { %659 = vst [vmem:[#allocation2 + $0xb8] sm:$0xf] %v8523_v17 }
  0x27   : > { %661 = vst [vmem:[#allocation2 + $0xd0] sm:$0xf] %v8523_v17  ;;  %2271 = vmatpush.bf16.msra.mxu1 %v6169_v35  ;;  %6449 = vmatpush.bf16.msra.mxu3 %v6169_v35 }
  0x28   : > { %663 = vst [vmem:[#allocation2 + $0xe8] sm:$0xf] %v8523_v17 }
  0x29   : > { %481 = vmatpush.bf16.msra.mxu0 %v6112_v7  ;;  %665 = vst [vmem:[#allocation2 + $0x100] sm:$0xf] %v8523_v17 }
  0x2a   : > { %667 = vst [vmem:[#allocation2 + $0x118] sm:$0xf] %v8523_v17 }
  0x2b   : > { %2272 = vmatpush.bf16.msra.mxu1 %v6168_v36  ;;  %6450 = vmatpush.bf16.msra.mxu3 %v6168_v36  ;;  %669 = vst [vmem:[#allocation2 + $0x130] sm:$0xf] %v8523_v17 }
  0x2c   : > { %482 = vmatmul.bf16.vlgmr.msra.gmra.mxu0 %v6094_v8  ;;  %671 = vst [vmem:[#allocation2 + $0x148] sm:$0xf] %v8523_v17 }
  0x2d   : > { %673 = vst [vmem:[#allocation2 + $0x160] sm:$0xf] %v8523_v17 }
  0x2e   : > { %675 = vst [vmem:[#allocation2 + $0x178] sm:$0xf] %v8523_v17 }
  0x2f   : > { %677 = vst [vmem:[#allocation2 + $0x190] sm:$0xf] %v8523_v17 }
  0x30   : > { %679 = vst [vmem:[#allocation2 + $0x1a8] sm:$0xf] %v8523_v17 }
  0x31   : > { %758 = vst [vmem:[#allocation2 + $0x4] sm:$0xf] %v8523_v17 }
  0x32   : > { %761 = vst [vmem:[#allocation2 + $0x10] sm:$0xf] %v8523_v17 }
  0x33   : > { %765 = vst [vmem:[#allocation2 + $0x19c] sm:$0xf] %v8523_v17 }
  0x34   : > { %768 = vst [vmem:[#allocation2 + $0x1a8] sm:$0xf] %v8523_v17 }
  0x35   : > { %8550 = vst [vmem:[#allocation3_spill] sm:$0xff] %v8549_v3 }
  0x39   : > { %v1365_v5 = vld [vmem:[#allocation2 + $0x10] sm:$0x1] }
  0x3c   : > { %487 = vmatmul.bf16.gmra.mxu0 %v6095_v9 }
  0x4c   : > { %492 = vmatmul.bf16.gmra.mxu0 %v6096_v10  ;;  %v1394_v10 = vshll.u32 %v1365_v5, 16 }
  0x5c   : > { %497 = vmatmul.bf16.gmra.mxu0 %v6097_v11 }
  0x6c   : > { %502 = vmatmul.bf16.gmra.mxu0 %v6098_v12  ;;  %v1396_v12 = vrot.slane %v1394_v10, 5 }
  0x7c   : > { %507 = vmatmul.bf16.gmra.mxu0 %v6099_v13  ;;  %v1366_v13 = vld [vmem:[#allocation2 + $0x28] sm:$0x1] }
  0x8c   : > { %512 = vmatmul.bf16.gmra.mxu0 %v6100_v14 }
  0x9c   : > { %517 = vmatmul.bf16.gmra.mxu0 %v6101_v18 }
  0xa9   : > { %v483_v20 = vpop.f32.mrf.mxu0 }
  0xaa   : > { %v484_v22 = vadd.f32 %v6623_v21, %v483_v20 }
  0xac   : > { %522 = vmatmul.bf16.gmra.mxu0 %v6102_v19  ;;  %v573_v25 = vmax.f32 %v484_v22, 0.0 }
  0xb1   : > { %v485_v23 = vpop.f32.mrf.mxu0 }
  0xb2   : > { %v486_v24 = vadd.f32 %v6623_v21, %v485_v23  ;;  %v1408_v23 = vshll.u32 %v1366_v13, 16 }
  0xb4   : > { %v574_v26 = vmax.f32 %v486_v24, 0.0  ;;  %v1410_v35 = vrot.slane %v1408_v23, 5 }
  0xb6   : > { %v6243_v27 = vpack.c.bf16 %v574_v26, %v573_v25 }
  0xb8   : > { %6410 = vst [vmem:[#allocation2 + $0x8] sm:$0xff] %v6243_v27  }
  0xb9   : > { %759 = vst [vmem:[#allocation2 + $0x8] sm:$0xf] %v8523_v17  ;;  %v488_v29 = vpop.f32.mrf.mxu0 }
  0xba   : > { %760 = vst [vmem:[#allocation2 + $0xc] sm:$0xf] %v8523_v17  ;;  %v489_v45 = vadd.f32 %v6623_v21, %v488_v29 }
  0xbc   : > { %527 = vmatmul.bf16.gmra.mxu0 %v6103_v31  ;;  %v575_v56 = vmax.f32 %v489_v45, 0.0 }
  0xc0   : > { %v6670_v40 = vld [vmem:[#allocation2 + $0x8] sm:$0xf] }
  0xc1   : > { %v490_v33 = vpop.f32.mrf.mxu0  ;;  %v8522_v41 = vshrl.u32 %v6670_v40, 16  ;;  %v8516_v42 = vshll.u32 %v6670_v40, 16  ;;  %v6676_v43 = vld [vmem:[#allocation2 + $0xc] sm:$0xf] }
  0xc2   : > { %v491_v44 = vadd.f32 %v6623_v21, %v490_v33  ;;  %v8517_v48 = vshrl.u32 %v6676_v43, 16  ;;  %v8515_v49 = vshll.u32 %v6676_v43, 16 }
  0xc3   : > { %v1384_v50 = vrot.slane %v8522_v41, 4  ;;  %v1385_v51 = vrot.slane %v8516_v42, 5 }
  0xc4   : > { %v576_v54 = vmax.f32 %v491_v44, 0.0  ;;  %v1388_v58 = vrot.slane %v8515_v49, 5  ;;  %v1390_v59 = vrot.slane %v8517_v48, 4 }
  0xc5   : > { %v1386_v57 = vor.u32 %v1385_v51, %v1384_v50 }
  0xc6   : > { %v6248_v61 = vpack.c.bf16 %v576_v54, %v575_v56  ;;  %v1391_v1 = vor.u32 %v1390_v59, %v1388_v58 }
  0xc7   : > { %v1387_v0 = vrot.slane %v1386_v57, 4 }
  0xc8   : > { %6411 = vst [vmem:[#allocation2 + $0x20] sm:$0xff] %v6248_v61   ;;  %v1392_v9 = vrot.slane %v1391_v1, 4  ;;  %v6107_v1 = vld [vmem:[%s6592_s16 + $0x68] sm:$0xff] }
  0xc9   : > { %v493_v38 = vpop.f32.mrf.mxu0  ;;  %v1389_v8 = vsel %vm6700_vm2, %v1387_v0, %v1388_v58  ;;  %v1367_v0 = vld [vmem:[#allocation2 + $0x40] sm:$0x1] }
  0xca   : > { %v494_v53 = vadd.f32 %v6623_v21, %v493_v38  ;;  %v2009_v14 = vunpack.c.l.b16 %v1389_v8  ;;  %v1397_v16 = vsel %vm6700_vm2, %v1392_v9, %v1396_v12 }
  0xcb   : > { %v2010_v19 = vunpack.c.l.b16 %v1397_v16 }
  0xcc   : > { %532 = vmatmul.bf16.gmra.mxu0 %v6104_v37  ;;  %v577_v60 = vmax.f32 %v494_v53, 0.0 }
  0xcd   : > { %v2041_v28 = vpack.c.b16 %v2010_v19, %v2009_v14 }
  0xcf   : > { %v6710_v20 = vld [vmem:[#allocation2 + $0x20] sm:$0xf]  ;;  %v6712_v22 = vld [vmem:[#allocation2 + $0x24] sm:$0xf]  ;;  %2273 = vmatmul.bf16.vlgmr.msra.gmra.mxu1 %v2041_v28 }
  0xd0   : > { %v8514_v24 = vshrl.u32 %v6710_v20, 16  ;;  %v8500_v25 = vshll.u32 %v6710_v20, 16  ;;  %v8509_v26 = vshrl.u32 %v6712_v22, 16  ;;  %v8499_v27 = vshll.u32 %v6712_v22, 16 }
  0xd1   : > { %v495_v39 = vpop.f32.mrf.mxu0 }
  0xd2   : > { %v496_v46 = vadd.f32 %v6623_v21, %v495_v39  ;;  %v1398_v29 = vrot.slane %v8514_v24, 4  ;;  %v1399_v30 = vrot.slane %v8500_v25, 5  ;;  %v1402_v31 = vrot.slane %v8499_v27, 5  ;;  %v1618_v25 = vld [vmem:[#allocation2 + $0x64] sm:$0x8] }
  0xd3   : > { %v1404_v32 = vrot.slane %v8509_v26, 4  ;;  %v1624_v24 = vld [vmem:[#allocation2 + $0x94] sm:$0x8] }
  0xd4   : > { %v578_v55 = vmax.f32 %v496_v46, 0.0  ;;  %v1400_v33 = vor.u32 %v1399_v30, %v1398_v29 }
  0xd5   : > { %v1405_v34 = vor.u32 %v1404_v32, %v1402_v31 }
  0xd6   : > { %v6253_v62 = vpack.c.bf16 %v578_v55, %v577_v60  ;;  %v1401_v38 = vrot.slane %v1400_v33, 4 }
  0xd7   : > { %v1406_v39 = vrot.slane %v1405_v34, 4 }
  0xd8   : > { %6412 = vst [vmem:[#allocation2 + $0x38] sm:$0xff] %v6253_v62   ;;  %v1403_v51 = vsel %vm6700_vm2, %v1401_v38, %v1402_v31 }
  0xd9   : > { %v498_v52 = vpop.f32.mrf.mxu0  ;;  %v2011_v57 = vunpack.c.l.b16 %v1403_v51 }
  0xda   : > { %v499_v63 = vadd.f32 %v6623_v21, %v498_v52  ;;  %v1411_v52 = vsel %vm6700_vm2, %v1406_v39, %v1410_v35 }
  0xdb   : > { %v2012_v58 = vunpack.c.l.b16 %v1411_v52 }
  0xdc   : > { %537 = vmatmul.bf16.gmra.mxu0 %v6105_v47  ;;  %v579_v6 = vmax.f32 %v499_v63, 0.0 }
  0xdf   : > { %v6726_v36 = vld [vmem:[#allocation2 + $0x38] sm:$0xf]  ;;  %v6728_v37 = vld [vmem:[#allocation2 + $0x3c] sm:$0xf] }
  0xe0   : > { %v8498_v46 = vshrl.u32 %v6726_v36, 16  ;;  %v8488_v47 = vshll.u32 %v6726_v36, 16  ;;  %v8489_v53 = vshrl.u32 %v6728_v37, 16  ;;  %v8487_v54 = vshll.u32 %v6728_v37, 16 }
  0xe1   : > { %v500_v2 = vpop.f32.mrf.mxu0 }
  0xe2   : > { %v501_v4 = vadd.f32 %v6623_v21, %v500_v2  ;;  %v1412_v59 = vrot.slane %v8498_v46, 4  ;;  %v1413_v60 = vrot.slane %v8488_v47, 5  ;;  %v1416_v61 = vrot.slane %v8487_v54, 5 }
  0xe3   : > { %v1418_v62 = vrot.slane %v8489_v53, 4 }
  0xe4   : > { %v580_v7 = vmax.f32 %v501_v4, 0.0  ;;  %v2042_v4 = vpack.c.b16 %v2012_v58, %v2011_v57  ;;  %v1414_v5 = vor.u32 %v1413_v60, %v1412_v59 }
  0xe6   : > { %v6258_v11 = vpack.c.bf16 %v580_v7, %v579_v6  ;;  %v1419_v6 = vor.u32 %v1418_v62, %v1416_v61  ;;  %v1422_v7 = vshll.u32 %v1367_v0, 16  ;;  %2278 = vmatmul.bf16.gmra.mxu1 %v2042_v4  ;;  %v1415_v10 = vrot.slane %v1414_v5, 4 }
  0xe8   : > { %6413 = vst [vmem:[#allocation2 + $0x50] sm:$0xff] %v6258_v11   ;;  %v1420_v11 = vrot.slane %v1419_v6, 4  ;;  %v1424_v12 = vrot.slane %v1422_v7, 5  ;;  %v1417_v28 = vsel %vm6700_vm2, %v1415_v10, %v1416_v61 }
  0xe9   : > { %v503_v18 = vpop.f32.mrf.mxu0  ;;  %v2013_v38 = vunpack.c.l.b16 %v1417_v28 }
  0xea   : > { %v504_v44 = vadd.f32 %v6623_v21, %v503_v18  ;;  %v1425_v29 = vsel %vm6700_vm2, %v1420_v11, %v1424_v12 }
  0xeb   : > { %v2014_v39 = vunpack.c.l.b16 %v1425_v29 }
  0xec   : > { %542 = vmatmul.bf16.gmra.mxu0 %v6106_v15  ;;  %v581_v55 = vmax.f32 %v504_v44, 0.0  ;;  %v1368_v44 = vld [vmem:[#allocation2 + $0x58] sm:$0x1] }
  0xed   : > { %v2043_v57 = vpack.c.b16 %v2014_v39, %v2013_v38 }
  0xef   : > { %v6749_v8 = vld [vmem:[#allocation2 + $0x50] sm:$0xf]  ;;  %v6751_v9 = vld [vmem:[#allocation2 + $0x54] sm:$0xf] }
  0xf0   : > { %v8486_v14 = vshrl.u32 %v6749_v8, 16  ;;  %v8484_v15 = vshll.u32 %v6749_v8, 16  ;;  %v8485_v16 = vshrl.u32 %v6751_v9, 16  ;;  %v8483_v18 = vshll.u32 %v6751_v9, 16 }
  0xf1   : > { %v505_v45 = vpop.f32.mrf.mxu0 }
  0xf2   : > { %v506_v50 = vadd.f32 %v6623_v21, %v505_v45  ;;  %v1426_v32 = vrot.slane %v8486_v14, 4  ;;  %v1427_v33 = vrot.slane %v8484_v15, 5  ;;  %v1430_v34 = vrot.slane %v8483_v18, 5 }
  0xf3   : > { %v1432_v35 = vrot.slane %v8485_v16, 4 }
  0xf4   : > { %v582_v56 = vmax.f32 %v506_v50, 0.0  ;;  %v6108_v50 = vld [vmem:[%s6592_s16 + $0x70] sm:$0xff]  ;;  %v1428_v51 = vor.u32 %v1427_v33, %v1426_v32  ;;  %v6109_v33 = vld [vmem:[%s6592_s16 + $0x78] sm:$0xff] }
  0xf5   : > { %v1433_v52 = vor.u32 %v1432_v35, %v1430_v34  ;;  %v1369_v32 = vld [vmem:[#allocation2 + $0x70] sm:$0x1] }
  0xf6   : > { %v6263_v63 = vpack.c.bf16 %v582_v56, %v581_v55  ;;  %v1436_v55 = vshll.u32 %v1368_v44, 16  ;;  %v1429_v58 = vrot.slane %v1428_v51, 4  ;;  %2283 = vmatmul.bf16.gmra.mxu1 %v2043_v57  ;;  %v1450_v44 = vshll.u32 %v1369_v32, 16 }
  0xf7   : > { %v1434_v59 = vrot.slane %v1433_v52, 4  ;;  %v6183_v52 = vld [vmem:[%s8468_s3 + $0xf8] sm:$0xff] }
  0xf8   : > { %6414 = vst [vmem:[#allocation2 + $0x68] sm:$0xff] %v6263_v63   ;;  %v1438_v60 = vrot.slane %v1436_v55, 5  ;;  %v1431_v0 = vsel %vm6700_vm2, %v1429_v58, %v1430_v34  ;;  %v1452_v51 = vrot.slane %v1450_v44, 5  ;;  %6451 = vmatpush.bf16.msra.mxu2 %v6183_v52  ;;  %2354 = vmatpush.bf16.msrb.mxu0 %v6183_v52 }
  0xf9   : > { %v508_v2 = vpop.f32.mrf.mxu0 }
  0xfa   : > { %v509_v13 = vadd.f32 %v6623_v21, %v508_v2 }
  0xfc   : > { %547 = vmatmul.bf16.gmra.mxu0 %v6107_v1  ;;  %v583_v30 = vmax.f32 %v509_v13, 0.0  ;;  %v1439_v1 = vsel %vm6700_vm2, %v1434_v59, %v1438_v60  ;;  %v2015_v13 = vunpack.c.l.b16 %v1431_v0 }
  0xff   : > { %v6772_v61 = vld [vmem:[#allocation2 + $0x68] sm:$0xf]  ;;  %v6774_v62 = vld [vmem:[#allocation2 + $0x6c] sm:$0xf] }
 0x100   : > { %v8482_v2 = vshrl.u32 %v6772_v61, 16  ;;  %v8480_v5 = vshll.u32 %v6772_v61, 16  ;;  %v8481_v6 = vshrl.u32 %v6774_v62, 16  ;;  %v8479_v7 = vshll.u32 %v6774_v62, 16 }
 0x101   : > { %v510_v19 = vpop.f32.mrf.mxu0 }
 0x102   : > { %v511_v23 = vadd.f32 %v6623_v21, %v510_v19  ;;  %v2016_v19 = vunpack.c.l.b16 %v1439_v1  ;;  %v1441_v28 = vrot.slane %v8480_v5, 5  ;;  %v1444_v29 = vrot.slane %v8479_v7, 5 }
 0x104   : > { %v584_v31 = vmax.f32 %v511_v23, 0.0  ;;  %v1440_v23 = vrot.slane %v8482_v2, 4  ;;  %v2044_v35 = vpack.c.b16 %v2016_v19, %v2015_v13 }
 0x106   : > { %v6268_v45 = vpack.c.bf16 %v584_v31, %v583_v30  ;;  %v1446_v30 = vrot.slane %v8481_v6, 4  ;;  %v1442_v38 = vor.u32 %v1441_v28, %v1440_v23  ;;  %2288 = vmatmul.bf16.gmra.mxu1 %v2044_v35  ;;  %v1370_v28 = vld [vmem:[#allocation2 + $0x88] sm:$0x1] }
 0x108   : > { %6415 = vst [vmem:[#allocation2 + $0x80] sm:$0xff] %v6268_v45   ;;  %v1447_v39 = vor.u32 %v1446_v30, %v1444_v29  ;;  %v1443_v45 = vrot.slane %v1442_v38, 4  ;;  %v1464_v38 = vshll.u32 %v1370_v28, 16 }
 0x109   : > { %v513_v56 = vpop.f32.mrf.mxu0 }
 0x10a   : > { %v514_v63 = vadd.f32 %v6623_v21, %v513_v56  ;;  %v1445_v59 = vsel %vm6700_vm2, %v1443_v45, %v1444_v29  ;;  %v1610_v45 = vld [vmem:[#allocation2 + $0x20] sm:$0xf]  ;;  %v1466_v52 = vrot.slane %v1464_v38, 5 }
 0x10b   : > { %v2017_v13 = vunpack.c.l.b16 %v1445_v59  ;;  %v1663_v59 = vshrl.u32 %v1610_v45, 16 }
 0x10c   : > { %552 = vmatmul.bf16.gmra.mxu0 %v6108_v50  ;;  %v585_v11 = vmax.f32 %v514_v63, 0.0  ;;  %v1448_v50 = vrot.slane %v1447_v39, 4 }
 0x10d   : > { %v1665_v38 = vrot.slane %v1663_v59, 7 }
 0x10e   : > { %v1453_v60 = vsel %vm6700_vm2, %v1448_v50, %v1452_v51 }
 0x10f   : > { %v6799_v56 = vld [vmem:[#allocation2 + $0x80] sm:$0xf]  ;;  %v6801_v57 = vld [vmem:[#allocation2 + $0x84] sm:$0xf]  ;;  %v2018_v19 = vunpack.c.l.b16 %v1453_v60 }
 0x110   : > { %v8478_v0 = vshrl.u32 %v6799_v56, 16  ;;  %v8472_v1 = vshll.u32 %v6799_v56, 16 }
 0x111   : > { %v515_v4 = vpop.f32.mrf.mxu0  ;;  %v2045_v35 = vpack.c.b16 %v2018_v19, %v2017_v13  ;;  %v1609_v13 = vld [vmem:[#allocation2 + $0x1c] sm:$0x8] }
 0x112   : > { %v516_v10 = vadd.f32 %v6623_v21, %v515_v4  ;;  %v8476_v4 = vshrl.u32 %v6801_v57, 16  ;;  %v1454_v29 = vrot.slane %v8478_v0, 4  ;;  %v1455_v30 = vrot.slane %v8472_v1, 5  ;;  %v6111_v0 = vld [vmem:[%s6592_s16 + $0x88] sm:$0xff] }
 0x114   : > { %v586_v12 = vmax.f32 %v516_v10, 0.0  ;;  %v8471_v10 = vshll.u32 %v6801_v57, 16  ;;  %v1460_v32 = vrot.slane %v8476_v4, 4  ;;  %v1456_v39 = vor.u32 %v1455_v30, %v1454_v29  ;;  %v6181_v29 = vld [vmem:[%s8468_s3 + $0xe8] sm:$0xff] }
 0x116   : > { %v6273_v31 = vpack.c.bf16 %v586_v12, %v585_v11  ;;  %2293 = vmatmul.bf16.gmra.mxu1 %v2045_v35  ;;  %v1457_v60 = vrot.slane %v1456_v39, 4  ;;  %v1658_v35 = vshrl.u32 %v1609_v13, 16 }
 0x118   : > { %6416 = vst [vmem:[#allocation2 + $0x98] sm:$0xff] %v6273_v31   ;;  %v1458_v31 = vrot.slane %v8471_v10, 5 }
 0x119   : > { %v518_v34 = vpop.f32.mrf.mxu0 }
 0x11a   : > { %v519_v55 = vadd.f32 %v6623_v21, %v518_v34  ;;  %v1461_v44 = vor.u32 %v1460_v32, %v1458_v31  ;;  %v1459_v39 = vsel %vm6700_vm2, %v1457_v60, %v1458_v31  ;;  %v6180_v31 = vld [vmem:[%s8468_s3 + $0xe0] sm:$0xff]  ;;  %v1666_v60 = vshll.u32 %v1610_v45, 16  ;;  %v6179_v45 = vld [vmem:[%s8468_s3 + $0xd8] sm:$0xff] }
 0x11c   : > { %557 = vmatmul.bf16.gmra.mxu0 %v6109_v33  ;;  %v587_v11 = vmax.f32 %v519_v55, 0.0  ;;  %v6110_v33 = vld [vmem:[%s6592_s16 + $0x80] sm:$0xff]  ;;  %v6182_v55 = vld [vmem:[%s8468_s3 + $0xf0] sm:$0xff] }
 0x11d   : > { %6452 = vmatpush.bf16.msra.mxu2 %v6182_v55  ;;  %2355 = vmatpush.bf16.msrb.mxu0 %v6182_v55 }
 0x11f   : > { %v6821_v50 = vld [vmem:[#allocation2 + $0x98] sm:$0xf]  ;;  %v6823_v51 = vld [vmem:[#allocation2 + $0x9c] sm:$0xf] }
 0x120   : > { %v8474_v28 = vshll.u32 %v6823_v51, 16 }
 0x121   : > { %v520_v58 = vpop.f32.mrf.mxu0  ;;  %6453 = vmatpush.bf16.msra.mxu2 %v6181_v29  ;;  %2356 = vmatpush.bf16.msrb.mxu0 %v6181_v29 }
 0x122   : > { %v521_v63 = vadd.f32 %v6623_v21, %v520_v58  ;;  %v1611_v58 = vld [vmem:[#allocation2 + $0x24] sm:$0xf]  ;;  %v6847_v1 = vrot.slane %v8474_v28, 5  ;;  %v5643_v28 = vrot.slane %v1658_v35, 11 }
 0x123   : > { %v1672_v32 = vshrl.u32 %v1611_v58, 16  ;;  %v1675_v4 = vshll.u32 %v1611_v58, 16  ;;  %v1670_v58 = vrot.slane %v1665_v38, 4 }
 0x124   : > { %v588_v12 = vmax.f32 %v521_v63, 0.0  ;;  %v1462_v63 = vrot.slane %v1461_v44, 4 }
 0x125   : > { %6454 = vmatpush.bf16.msra.mxu2 %v6180_v31  ;;  %2357 = vmatpush.bf16.msrb.mxu0 %v6180_v31 }
 0x126   : > { %v6278_v23 = vpack.c.bf16 %v588_v12, %v587_v11  ;;  %v8475_v11 = vshrl.u32 %v6821_v50, 16  ;;  %v8473_v12 = vshll.u32 %v6821_v50, 16 }
 0x128   : > { %6417 = vst [vmem:[#allocation2 + $0xb0] sm:$0xff] %v6278_v23   ;;  %v8477_v23 = vshrl.u32 %v6823_v51, 16  ;;  %v1468_v44 = vrot.slane %v8475_v11, 4  ;;  %v1469_v55 = vrot.slane %v8473_v12, 5  ;;  %v1668_v11 = vor.u32 %v1666_v60, %v1665_v38 }
 0x129   : > { %v523_v34 = vpop.f32.mrf.mxu0  ;;  %6455 = vmatpush.bf16.msra.mxu2 %v6179_v45  ;;  %2358 = vmatpush.bf16.msrb.mxu0 %v6179_v45 }
 0x12a   : > { %v524_v19 = vadd.f32 %v6623_v21, %v523_v34  ;;  %v1467_v34 = vsel %vm6700_vm2, %v1462_v63, %v1466_v52  ;;  %v1474_v59 = vrot.slane %v8477_v23, 4  ;;  %v1371_v52 = vld [vmem:[#allocation2 + $0xa0] sm:$0x1]  ;;  %v1674_v63 = vrot.slane %v1672_v32, 7  ;;  %v6859_v32 = vld [vmem:[#allocation2 + $0x38] sm:$0xf] }
 0x12b   : > { %v1470_v23 = vor.u32 %v1469_v55, %v1468_v44  ;;  %v1478_v29 = vshll.u32 %v1371_v52, 16  ;;  %v6866_v44 = vld [vmem:[#allocation2 + $0x34] sm:$0x8]  ;;  %v1669_v31 = vsel %vm6862_vm5, %v5643_v28, %v1668_v11  ;;  %v6871_v52 = vld [vmem:[#allocation2 + $0x3c] sm:$0xf]  ;;  %v1688_v28 = vshll.u32 %v6859_v32, 16 }
 0x12c   : > { %562 = vmatmul.bf16.gmra.mxu0 %v6110_v33  ;;  %v589_v10 = vmax.f32 %v524_v19, 0.0  ;;  %v2019_v19 = vunpack.c.l.b16 %v1459_v39  ;;  %v1677_v35 = vor.u32 %v1675_v4, %v1674_v63  ;;  %v6151_v4 = vld [vmem:[%s8468_s3 + $0x78] sm:$0xff]  ;;  %v6178_v11 = vld [vmem:[%s8468_s3 + $0xd0] sm:$0xff]  ;;  %v1694_v45 = vshrl.u32 %v6871_v52, 16 }
 0x12d   : > { %v1471_v55 = vrot.slane %v1470_v23, 4  ;;  %v1680_v23 = vshrl.u32 %v6866_v44, 16  ;;  %2628 = vmatpush.bf16.msrb.mxu1 %v6151_v4  ;;  %6456 = vmatpush.bf16.msra.mxu2 %v6178_v11 }
 0x12e   : > { %v6878_v38 = vsel %vm6862_vm5, %v1670_v58, %v1677_v35  ;;  %2359 = vmatpush.bf16.msrb.mxu0 %v6178_v11  ;;  %v6176_v11 = vld [vmem:[%s8468_s3 + $0xc0] sm:$0xff] }
 0x12f   : > { %v6881_v60 = vld [vmem:[#allocation2 + $0xb0] sm:$0xf]  ;;  %v1473_v58 = vsel %vm6700_vm2, %v1471_v55, %v6847_v1 }
 0x130   : > { %v8495_v4 = vshll.u32 %v6881_v60, 16 }
 0x131   : > { %v525_v30 = vpop.f32.mrf.mxu0 }
 0x132   : > { %v526_v33 = vadd.f32 %v6623_v21, %v525_v30  ;;  %v2020_v30 = vunpack.c.l.b16 %v1467_v34 }
 0x134   : > { %v590_v13 = vmax.f32 %v526_v33, 0.0  ;;  %v1475_v33 = vor.u32 %v1474_v59, %v6847_v1  ;;  %v2046_v34 = vpack.c.b16 %v2020_v30, %v2019_v19  ;;  %v6150_v19 = vld [vmem:[%s8468_s3 + $0x70] sm:$0xff]  ;;  %v1630_v1 = vld [vmem:[#allocation2 + $0xc4] sm:$0x8] }
 0x135   : > { %2629 = vmatpush.bf16.msrb.mxu1 %v6150_v19  ;;  %v1696_v19 = vrot.slane %v1694_v45, 7 }
 0x136   : > { %v6283_v12 = vpack.c.bf16 %v590_v13, %v589_v10  ;;  %v8551_v10 = vmov 0  ;;  %v1476_v59 = vrot.slane %v1475_v33, 4  ;;  %v1480_v13 = vrot.slane %v1478_v29, 5  ;;  %2298 = vmatmul.bf16.gmra.mxu1 %v2046_v34 }
 0x137   : > { %v8552_v10 = vsel %vm6862_vm5, 4294967295, %v8551_v10  ;;  %v2073_v33 = vunpack.c.l.b16 %v1669_v31  ;;  %v2074_v31 = vunpack.c.l.b16 %v6878_v38  ;;  %v6149_v38 = vld [vmem:[%s8468_s3 + $0x68] sm:$0xff] }
 0x138   : > { %6418 = vst [vmem:[#allocation2 + $0xc8] sm:$0xff] %v6283_v12   ;;  %v1685_v12 = vshrl.u32 %v6859_v32, 16  ;;  %v1481_v32 = vsel %vm6700_vm2, %v1476_v59, %v1480_v13  ;;  %v1812_v13 = vshrl.u32 %v1630_v1, 16 }
 0x139   : > { %v528_v39 = vpop.f32.mrf.mxu0  ;;  %8553 = vst [vmem:[#allocation4_spill] sm:$0xff] %v8552_v10  ;;  %2630 = vmatpush.bf16.msrb.mxu1 %v6149_v38 }
 0x13a   : > { %v529_v63 = vadd.f32 %v6623_v21, %v528_v39  ;;  %v6893_v29 = vrot.slane %v1685_v12, 7  ;;  %v6177_v39 = vld [vmem:[%s8468_s3 + $0xc8] sm:$0xff]  ;;  %v8497_v12 = vshrl.u32 %v6881_v60, 16 }
 0x13b   : > { %6457 = vmatpush.bf16.msra.mxu2 %v6177_v39  ;;  %2360 = vmatpush.bf16.msrb.mxu0 %v6177_v39  ;;  %v5644_v39 = vrot.slane %v1680_v23, 11  ;;  %v1617_v23 = vld [vmem:[#allocation2 + $0x54] sm:$0xf] }
 0x13c   : > { %567 = vmatmul.bf16.gmra.mxu0 %v6111_v0  ;;  %v6883_v0 = vld [vmem:[#allocation2 + $0xb4] sm:$0xf]  ;;  %v591_v18 = vmax.f32 %v529_v63, 0.0  ;;  %v2022_v63 = vunpack.c.l.b16 %v1481_v32  ;;  %v1482_v53 = vrot.slane %v8497_v12, 4  ;;  %v2105_v32 = vpack.c.b16 %v2074_v31, %v2073_v33  ;;  %v1616_v33 = vld [vmem:[#allocation2 + $0x50] sm:$0xf] }
 0x13d   : > { %v8496_v7 = vshrl.u32 %v6883_v0, 16  ;;  %v8494_v15 = vshll.u32 %v6883_v0, 16  ;;  %v1690_v38 = vor.u32 %v1688_v28, %v6893_v29 }
 0x13f   : > { %v1631_v30 = vld [vmem:[#allocation2 + $0xc8] sm:$0xf]  ;;  %v1632_v35 = vld [vmem:[#allocation2 + $0xcc] sm:$0xf]  ;;  %6458 = vmatpush.bf16.msra.mxu2 %v6176_v11  ;;  %2361 = vmatpush.bf16.msrb.mxu0 %v6176_v11  ;;  %v6191_v11 = vld [vmem:[%s8468_s3 + $0x138] sm:$0xff] }
 0x140   : > { %v1817_v34 = vshrl.u32 %v1631_v30, 16  ;;  %v1826_v55 = vshrl.u32 %v1632_v35, 16  ;;  %v1820_v2 = vshll.u32 %v1631_v30, 16  ;;  %v1829_v14 = vshll.u32 %v1632_v35, 16  ;;  %v6942_v44 = vld [vmem:[#allocation2 + $0xc8] sm:$0xf] }
 0x141   : > { %v530_v5 = vpop.f32.mrf.mxu0  ;;  %v2021_v30 = vunpack.c.l.b16 %v1473_v58  ;;  %v1483_v35 = vrot.slane %v8495_v4, 5  ;;  %v6148_v58 = vld [vmem:[%s8468_s3 + $0x60] sm:$0xff] }
 0x142   : > { %v531_v59 = vadd.f32 %v6623_v21, %v530_v5  ;;  %v1819_v6 = vrot.slane %v1817_v34, 7  ;;  %v1828_v16 = vrot.slane %v1826_v55, 7  ;;  %v5650_v5 = vrot.slane %v1812_v13, 11  ;;  %2631 = vmatpush.bf16.msrb.mxu1 %v6148_v58 }
 0x143   : > { %v6924_v13 = vrot.slane %v8494_v15, 5  ;;  %3437 = vmatpush.bf16.msrb.mxu2 %v6191_v11 }
 0x144   : > { %v592_v54 = vmax.f32 %v531_v59, 0.0  ;;  %v1822_v1 = vor.u32 %v1820_v2, %v1819_v6  ;;  %v1824_v34 = vrot.slane %v1819_v6, 4  ;;  %v1831_v47 = vor.u32 %v1829_v14, %v1828_v16  ;;  %v1372_v6 = vld [vmem:[#allocation2 + $0xb8] sm:$0x1] }
 0x145   : > { %v1488_v2 = vrot.slane %v8496_v7, 4 }
 0x146   : > { %v6288_v55 = vpack.c.bf16 %v592_v54, %v591_v18  ;;  %v1823_v59 = vsel %vm6862_vm5, %v5650_v5, %v1822_v1  ;;  %v1832_v14 = vsel %vm6862_vm5, %v1824_v34, %v1831_v47  ;;  %v1697_v54 = vshll.u32 %v6871_v52, 16 }
 0x147   : > { %v2087_v16 = vunpack.c.l.b16 %v1823_v59  ;;  %v2088_v45 = vunpack.c.l.b16 %v1832_v14  ;;  %v1692_v47 = vrot.slane %v6893_v29, 4  ;;  %v2047_v5 = vpack.c.b16 %v2022_v63, %v2021_v30  ;;  %v1615_v30 = vld [vmem:[#allocation2 + $0x4c] sm:$0x8] }
 0x148   : > { %6419 = vst [vmem:[#allocation2 + $0xe0] sm:$0xff] %v6288_v55   ;;  %v1484_v1 = vor.u32 %v1483_v35, %v1482_v53  ;;  %v1699_v55 = vor.u32 %v1697_v54, %v1696_v19  ;;  %v1489_v52 = vor.u32 %v1488_v2, %v6924_v13  ;;  %v1492_v59 = vshll.u32 %v1372_v6, 16  ;;  %v6147_v53 = vld [vmem:[%s8468_s3 + $0x58] sm:$0xff]  ;;  %v6951_v2 = vld [vmem:[#allocation2 + $0xcc] sm:$0xf] }
 0x149   : > { %v533_v18 = vpop.f32.mrf.mxu0  ;;  %v2112_v34 = vpack.c.b16 %v2088_v45, %v2087_v16  ;;  %2303 = vmatmul.bf16.gmra.mxu1 %v2047_v5  ;;  %v1691_v29 = vsel %vm6862_vm5, %v5644_v39, %v1690_v38  ;;  %v1707_v63 = vshrl.u32 %v1616_v33, 16  ;;  %v8491_v14 = vshrl.u32 %v6942_v44, 16  ;;  %v1373_v54 = vld [vmem:[#allocation2 + $0xd0] sm:$0x1] }
 0x14a   : > { %v1485_v28 = vrot.slane %v1484_v1, 4  ;;  %v1700_v31 = vsel %vm6862_vm5, %v1692_v47, %v1699_v55  ;;  %v1490_v19 = vrot.slane %v1489_v52, 4  ;;  %v1494_v35 = vrot.slane %v1492_v59, 5  ;;  %2632 = vmatpush.bf16.msrb.mxu1 %v6147_v53  ;;  %v6146_v52 = vld [vmem:[%s8468_s3 + $0x50] sm:$0xff] }
 0x14b   : > { %2397 = vmatmul.bf16.vlgmr.msra.gmra.mxu2 %v2112_v34  ;;  %v1716_v16 = vshrl.u32 %v1617_v23, 16  ;;  %v534_v6 = vadd.f32 %v6623_v21, %v533_v18  ;;  %v8490_v45 = vshll.u32 %v6942_v44, 16  ;;  %v2076_v39 = vunpack.c.l.b16 %v1700_v31 }
 0x14c   : > { %2362 = vmatmul.bf16.vlgmr.msrb.gmra.mxu0 %v2105_v32  ;;  %v2075_v32 = vunpack.c.l.b16 %v1691_v29  ;;  %v1702_v38 = vshrl.u32 %v1615_v30, 16  ;;  %v1487_v47 = vsel %vm6700_vm2, %v1485_v28, %v6924_v13  ;;  %v8493_v5 = vshrl.u32 %v6951_v2, 16  ;;  %v6145_v30 = vld [vmem:[%s8468_s3 + $0x48] sm:$0xff] }
 0x14d   : > { %v8492_v1 = vshll.u32 %v6951_v2, 16  ;;  %v1495_v18 = vsel %vm6700_vm2, %v1490_v19, %v1494_v35  ;;  %v1496_v55 = vrot.slane %v8491_v14, 4  ;;  %v6969_v59 = vrot.slane %v1707_v63, 7 }
 0x14e   : > { %v1718_v11 = vrot.slane %v1716_v16, 7  ;;  %v593_v13 = vmax.f32 %v534_v6, 0.0  ;;  %v1497_v28 = vrot.slane %v8490_v45, 5  ;;  %v1506_v53 = vshll.u32 %v1373_v54, 16  ;;  %2633 = vmatpush.bf16.msrb.mxu1 %v6146_v52 }
 0x14f   : > { %v2023_v31 = vunpack.c.l.b16 %v1487_v47  ;;  %v1710_v19 = vshll.u32 %v1616_v33, 16  ;;  %v1719_v35 = vshll.u32 %v1617_v23, 16  ;;  %v6980_v63 = vrot.slane %v8492_v1, 5  ;;  %v1634_v33 = vld [vmem:[#allocation2 + $0xe0] sm:$0xf] }
 0x150   : > { %v1502_v16 = vrot.slane %v8493_v5, 4  ;;  %v2106_v54 = vpack.c.b16 %v2076_v39, %v2075_v32  ;;  %v1714_v47 = vrot.slane %v6969_v59, 4  ;;  %v1498_v45 = vor.u32 %v1497_v28, %v1496_v55  ;;  %v1635_v23 = vld [vmem:[#allocation2 + $0xe4] sm:$0xf]  ;;  %v1633_v28 = vld [vmem:[#allocation2 + $0xdc] sm:$0x8] }
 0x151   : > { %v535_v58 = vpop.f32.mrf.mxu0  ;;  %v6988_v14 = vrot.slane %v1506_v53, 5  ;;  %v1721_v1 = vor.u32 %v1719_v35, %v1718_v11  ;;  %v1842_v32 = vshll.u32 %v1634_v33, 16  ;;  %v1848_v39 = vshrl.u32 %v1635_v23, 16  ;;  %v6996_v53 = vld [vmem:[#allocation2 + $0xe4] sm:$0xf] }
 0x152   : > { %v536_v34 = vadd.f32 %v6623_v21, %v535_v58  ;;  %v6973_v21 = vld [vmem:[#allocation2 + $0x68] sm:$0xf]  ;;  %v2024_v58 = vunpack.c.l.b16 %v1495_v18  ;;  %v6991_v18 = vor.u32 %v1710_v19, %v6969_v59  ;;  %2634 = vmatpush.bf16.msrb.mxu1 %v6145_v30  ;;  %v1503_v55 = vor.u32 %v1502_v16, %v6980_v63  ;;  %v6144_v35 = vld [vmem:[%s8468_s3 + $0x40] sm:$0xff] }
 0x153   : > { %v1729_v52 = vshrl.u32 %v6973_v21, 16  ;;  %v1834_v19 = vshrl.u32 %v1633_v28, 16  ;;  %v1850_v30 = vrot.slane %v1848_v39, 7  ;;  %v8506_v16 = vshll.u32 %v6996_v53, 16 }
 0x154   : > { %v594_v29 = vmax.f32 %v536_v34, 0.0  ;;  %v6984_v34 = vrot.slane %v1702_v38, 11  ;;  %v1851_v38 = vshll.u32 %v1635_v23, 16  ;;  %v2048_v15 = vpack.c.b16 %v2024_v58, %v2023_v31  ;;  %v6190_v31 = vld [vmem:[%s8468_s3 + $0x130] sm:$0xff]  ;;  %v1374_v23 = vld [vmem:[#allocation2 + $0xe8] sm:$0x1] }
 0x155   : > { %v1499_v58 = vrot.slane %v1498_v45, 4  ;;  %v5651_v39 = vrot.slane %v1834_v19, 11  ;;  %3438 = vmatpush.bf16.msrb.mxu2 %v6190_v31  ;;  %v1514_v45 = vrot.slane %v8506_v16, 5  ;;  %v1520_v27 = vshll.u32 %v1374_v23, 16  ;;  %v7019_v19 = vld [vmem:[%s8467_s2] ss:$0 sm:$0xff] }
 0x156   : > { %v6293_v6 = vpack.c.bf16 %v594_v29, %v593_v13  ;;  %v1839_v13 = vshrl.u32 %v1634_v33, 16  ;;  %v6993_v29 = vld [vmem:[#allocation2 + $0xe0] sm:$0xf]  ;;  %v8508_v33 = vshrl.u32 %v6996_v53, 16  ;;  %v1853_v12 = vor.u32 %v1851_v38, %v1850_v30  ;;  %2635 = vmatpush.bf16.msrb.mxu1 %v6144_v35 }
 0x157   : > { %v8507_v59 = vshll.u32 %v6993_v29, 16  ;;  %v1522_v23 = vrot.slane %v1520_v27, 5  ;;  %v1501_v27 = vsel %vm6700_vm2, %v1499_v58, %v6980_v63 }
 0x158   : > { %6420 = vst [vmem:[#allocation2 + $0xf8] sm:$0xff] %v6293_v6   ;;  %v8501_v6 = vshrl.u32 %v6993_v29, 16  ;;  %v1841_v11 = vrot.slane %v1839_v13, 7 }
 0x159   : > { %v538_v5 = vpop.f32.mrf.mxu0  ;;  %v1511_v13 = vrot.slane %v8507_v59, 5  ;;  %2308 = vmatmul.bf16.gmra.mxu1 %v2048_v15 }
 0x15a   : > { %v1510_v28 = vrot.slane %v8501_v6, 4  ;;  %v1844_v4 = vor.u32 %v1842_v32, %v1841_v11  ;;  %v1846_v7 = vrot.slane %v1841_v11, 4  ;;  %v1504_v6 = vrot.slane %v1503_v55, 4 }
 0x15b   : > { %v539_v32 = vadd.f32 %v7019_v19, %v538_v5  ;;  %v1713_v55 = vsel %vm6862_vm5, %v6984_v34, %v6991_v18  ;;  %v1722_v5 = vsel %vm6862_vm5, %v1714_v47, %v1721_v1  ;;  %v7048_v1 = vrot.slane %v1729_v52, 7 }
 0x15c   : > { %2367 = vmatmul.bf16.gmra.mxu0 %v2106_v54  ;;  %v1512_v46 = vor.u32 %v1511_v13, %v1510_v28  ;;  %v1516_v54 = vrot.slane %v8508_v33, 4  ;;  %v1845_v15 = vsel %vm6862_vm5, %v5651_v39, %v1844_v4  ;;  %v1854_v38 = vsel %vm6862_vm5, %v1846_v7, %v1853_v12  ;;  %v7032_v13 = vld [vmem:[#allocation2 + $0x6c] sm:$0xf] }
 0x15d   : > { %v2089_v11 = vunpack.c.l.b16 %v1845_v15  ;;  %v2090_v30 = vunpack.c.l.b16 %v1854_v38  ;;  %v1724_v4 = vshrl.u32 %v1618_v25, 16  ;;  %v1509_v34 = vsel %vm6700_vm2, %v1504_v6, %v6988_v14  ;;  %v6143_v25 = vld [vmem:[%s8468_s3 + $0x38] sm:$0xff] }
 0x15e   : > { %v1513_v35 = vrot.slane %v1512_v46, 4  ;;  %v1517_v31 = vor.u32 %v1516_v54, %v1514_v45  ;;  %v595_v47 = vmax.f32 %v539_v32, 0.0  ;;  %v1738_v63 = vshrl.u32 %v7032_v13, 16  ;;  %2539 = vmatpush.bf16.msrb.mxu3 %v6143_v25 }
 0x15f   : > { %v2113_v39 = vpack.c.b16 %v2090_v30, %v2089_v11  ;;  %v2077_v14 = vunpack.c.l.b16 %v1713_v55  ;;  %v1732_v6 = vshll.u32 %v6973_v21, 16  ;;  %v2025_v15 = vunpack.c.l.b16 %v1501_v27  ;;  %v7060_v27 = vld [vmem:[#allocation2 + $0xf8] sm:$0xf] }
 0x160   : > { %v1515_v7 = vsel %vm6700_vm2, %v1513_v35, %v1514_v45  ;;  %v1518_v12 = vrot.slane %v1517_v31, 4  ;;  %v2026_v38 = vunpack.c.l.b16 %v1509_v34  ;;  %v2078_v30 = vunpack.c.l.b16 %v1722_v5  ;;  %v1637_v31 = vld [vmem:[#allocation2 + $0xf8] sm:$0xf] }
 0x161   : > { %v540_v28 = vpop.f32.mrf.mxu0  ;;  %v2027_v18 = vunpack.c.l.b16 %v1515_v7  ;;  %2402 = vmatmul.bf16.gmra.mxu2 %v2113_v39  ;;  %v7054_v52 = vrot.slane %v1724_v4, 11  ;;  %v1741_v32 = vshll.u32 %v7032_v13, 16  ;;  %v1740_v39 = vrot.slane %v1738_v63, 7  ;;  %v1636_v4 = vld [vmem:[#allocation2 + $0xf4] sm:$0x8] }
 0x162   : > { %v541_v46 = vadd.f32 %v7019_v19, %v540_v28  ;;  %v1523_v45 = vsel %vm6700_vm2, %v1518_v12, %v1522_v23  ;;  %v1638_v23 = vld [vmem:[#allocation2 + $0xfc] sm:$0xf]  ;;  %v7058_v28 = vor.u32 %v1732_v6, %v7048_v1  ;;  %v1861_v7 = vshrl.u32 %v1637_v31, 16  ;;  %v1375_v6 = vld [vmem:[#allocation2 + $0x100] sm:$0x1] }
 0x163   : > { %v2028_v58 = vunpack.c.l.b16 %v1523_v45  ;;  %v1864_v21 = vshll.u32 %v1637_v31, 16  ;;  %v1870_v12 = vshrl.u32 %v1638_v23, 16  ;;  %v2049_v5 = vpack.c.b16 %v2026_v38, %v2025_v15 }
 0x164   : > { %v596_v54 = vmax.f32 %v541_v46, 0.0  ;;  %v1873_v46 = vshll.u32 %v1638_v23, 16  ;;  %v2107_v34 = vpack.c.b16 %v2078_v30, %v2077_v14  ;;  %v8502_v13 = vshrl.u32 %v7060_v27, 16 }
 0x165   : > { %v2050_v35 = vpack.c.b16 %v2028_v58, %v2027_v18  ;;  %v7062_v18 = vld [vmem:[#allocation2 + $0xfc] sm:$0xf]  ;;  %v8503_v25 = vshll.u32 %v7060_v27, 16  ;;  %v1856_v45 = vshrl.u32 %v1636_v4, 16  ;;  %v1872_v63 = vrot.slane %v1870_v12, 7 }
 0x166   : > { %v6298_v11 = vpack.c.bf16 %v596_v54, %v595_v47  ;;  %v7066_v47 = vpop.f32.mrf.mxu1  ;;  %v1863_v54 = vrot.slane %v1861_v7, 7  ;;  %v8505_v58 = vshrl.u32 %v7062_v18, 16  ;;  %v1524_v14 = vrot.slane %v8502_v13, 4  ;;  %v6189_v13 = vld [vmem:[%s8468_s3 + $0x128] sm:$0xff] }
 0x167   : > { %2318 = vmatmul.bf16.vlgmr.msra.gmra.mxu3 %v2050_v35  ;;  %v1525_v15 = vrot.slane %v8503_v25, 5  ;;  %v1736_v38 = vrot.slane %v7048_v1, 4  ;;  %v5652_v30 = vrot.slane %v1856_v45, 11  ;;  %v1875_v23 = vor.u32 %v1873_v46, %v1872_v63  ;;  %v1622_v25 = vld [vmem:[#allocation2 + $0x80] sm:$0xf]  ;;  %3439 = vmatpush.bf16.msrb.mxu2 %v6189_v13 }
 0x168   : > { %6421 = vst [vmem:[#allocation2 + $0x110] sm:$0xff] %v6298_v11   ;;  %v8504_v11 = vshll.u32 %v7062_v18, 16  ;;  %v1866_v35 = vor.u32 %v1864_v21, %v1863_v54  ;;  %v1868_v31 = vrot.slane %v1863_v54, 4  ;;  %v1530_v4 = vrot.slane %v8505_v58, 4 }
 0x169   : > { %v543_v55 = vpop.f32.mrf.mxu0  ;;  %2313 = vmatmul.bf16.gmra.mxu1 %v2049_v5  ;;  %v1526_v7 = vor.u32 %v1525_v15, %v1524_v14  ;;  %v1743_v5 = vor.u32 %v1741_v32, %v1740_v39  ;;  %v7087_v15 = vld [vmem:[#allocation2 + $0x84] sm:$0xf] }
 0x16a   : > { %v1528_v12 = vrot.slane %v8504_v11, 5  ;;  %v544_v1 = vadd.f32 %v7019_v19, %v543_v55  ;;  %v1867_v21 = vsel %vm6862_vm5, %v5652_v30, %v1866_v35  ;;  %v1876_v46 = vsel %vm6862_vm5, %v1868_v31, %v1875_v23 }
 0x16b   : > { %v2091_v45 = vunpack.c.l.b16 %v1867_v21  ;;  %v2092_v54 = vunpack.c.l.b16 %v1876_v46  ;;  %v1527_v63 = vrot.slane %v1526_v7, 4  ;;  %v1735_v55 = vsel %vm6862_vm5, %v7054_v52, %v7058_v28  ;;  %v6142_v7 = vld [vmem:[%s8468_s3 + $0x30] sm:$0xff] }
 0x16c   : > { %2372 = vmatmul.bf16.gmra.mxu0 %v2107_v34  ;;  %v1534_v34 = vshll.u32 %v1375_v6, 16  ;;  %v1531_v14 = vor.u32 %v1530_v4, %v1528_v12  ;;  %v1621_v6 = vld [vmem:[#allocation2 + $0x7c] sm:$0x8]  ;;  %v1751_v30 = vshrl.u32 %v1622_v25, 16  ;;  %v1744_v4 = vsel %vm6862_vm5, %v1736_v38, %v1743_v5  ;;  %2540 = vmatpush.bf16.msrb.mxu3 %v6142_v7 }
 0x16d   : > { %v2114_v35 = vpack.c.b16 %v2092_v54, %v2091_v45  ;;  %v1529_v32 = vsel %vm6700_vm2, %v1527_v63, %v1528_v12  ;;  %v1760_v52 = vshrl.u32 %v7087_v15, 16  ;;  %v597_v28 = vmax.f32 %v544_v1, 0.0  ;;  %v6120_v1 = vld [vmem:[#allocation2 + $0x8] sm:$0xff] }
 0x16e   : > { %v1536_v11 = vrot.slane %v1534_v34, 5  ;;  %v1532_v39 = vrot.slane %v1531_v14, 4  ;;  %v7096_v23 = vpop.f32.mrf.mxu1  ;;  %v2029_v13 = vunpack.c.l.b16 %v1529_v32  ;;  %v1746_v34 = vshrl.u32 %v1621_v6, 16 }
 0x16f   : > { %v2079_v46 = vunpack.c.l.b16 %v1735_v55  ;;  %v2080_v54 = vunpack.c.l.b16 %v1744_v4  ;;  %v7106_v63 = vrot.slane %v1751_v30, 7  ;;  %v1754_v14 = vshll.u32 %v1622_v25, 16  ;;  %v1640_v6 = vld [vmem:[#allocation2 + $0x110] sm:$0xf]  ;;  %v1639_v30 = vld [vmem:[#allocation2 + $0x10c] sm:$0x8] }
 0x170   : > { %v1537_v12 = vsel %vm6700_vm2, %v1532_v39, %v1536_v11  ;;  %v7108_v16 = vrot.slane %v1746_v34, 11  ;;  %v1762_v38 = vrot.slane %v1760_v52, 7  ;;  %v1763_v5 = vshll.u32 %v7087_v15, 16  ;;  %v7111_v4 = vld [vmem:[#allocation2 + $0x110] sm:$0xf] }
 0x171   : > { %v545_v58 = vpop.f32.mrf.mxu0  ;;  %2407 = vmatmul.bf16.gmra.mxu2 %v2114_v35  ;;  %v1641_v35 = vld [vmem:[#allocation2 + $0x114] sm:$0xf]  ;;  %v1883_v39 = vshrl.u32 %v1640_v6, 16  ;;  %v2108_v25 = vpack.c.b16 %v2080_v54, %v2079_v46  ;;  %v8510_v34 = vshrl.u32 %v7111_v4, 16  ;;  %v8511_v15 = vshll.u32 %v7111_v4, 16 }
 0x172   : > { %v546_v31 = vadd.f32 %v7019_v19, %v545_v58  ;;  %v2030_v58 = vunpack.c.l.b16 %v1537_v12  ;;  %v1892_v55 = vshrl.u32 %v1641_v35, 16  ;;  %v1895_v7 = vshll.u32 %v1641_v35, 16 }
 0x173   : > { %v1756_v52 = vor.u32 %v1754_v14, %v7106_v63  ;;  %v1878_v12 = vshrl.u32 %v1639_v30, 16  ;;  %v1538_v46 = vrot.slane %v8510_v34, 4  ;;  %v1539_v54 = vrot.slane %v8511_v15, 5  ;;  %v6141_v15 = vld [vmem:[%s8468_s3 + $0x28] sm:$0xff] }
 0x174   : > { %v598_v21 = vmax.f32 %v546_v31, 0.0  ;;  %v2051_v32 = vpack.c.b16 %v2030_v58, %v2029_v13  ;;  %v1886_v31 = vshll.u32 %v1640_v6, 16  ;;  %v7113_v13 = vld [vmem:[#allocation2 + $0x114] sm:$0xf]  ;;  %v1894_v58 = vrot.slane %v1892_v55, 7  ;;  %2541 = vmatpush.bf16.msrb.mxu3 %v6141_v15 }
 0x175   : > { %v8512_v6 = vshll.u32 %v7113_v13, 16  ;;  %v1758_v35 = vrot.slane %v7106_v63, 4  ;;  %v5653_v14 = vrot.slane %v1878_v12, 11  ;;  %v1540_v55 = vor.u32 %v1539_v54, %v1538_v46  ;;  %v6188_v63 = vld [vmem:[%s8468_s3 + $0x120] sm:$0xff]  ;;  %v7144_v54 = vld [vmem:[#allocation2 + $0x9c] sm:$0xf] }
 0x176   : > { %v6303_v45 = vpack.c.bf16 %v598_v21, %v597_v28  ;;  %v7118_v28 = vpop.f32.mrf.mxu1  ;;  %v1885_v21 = vrot.slane %v1883_v39, 7  ;;  %v1897_v30 = vor.u32 %v1895_v7, %v1894_v58  ;;  %v7127_v39 = vld [vmem:[#allocation2 + $0x98] sm:$0xf]  ;;  %v1765_v12 = vor.u32 %v1763_v5, %v1762_v38  ;;  %3440 = vmatpush.bf16.msrb.mxu2 %v6188_v63 }
 0x177   : > { %2323 = vmatmul.bf16.gmra.mxu3 %v2051_v32  ;;  %v1376_v32 = vld [vmem:[#allocation2 + $0x118] sm:$0x1]  ;;  %v1782_v15 = vshrl.u32 %v7144_v54, 16  ;;  %v1768_v63 = vshrl.u32 %v1624_v24, 16 }
 0x178   : > { %6422 = vst [vmem:[#allocation2 + $0x128] sm:$0xff] %v6303_v45   ;;  %v8513_v45 = vshrl.u32 %v7113_v13, 16  ;;  %v1888_v59 = vor.u32 %v1886_v31, %v1885_v21  ;;  %v1890_v33 = vrot.slane %v1885_v21, 4  ;;  %v1548_v34 = vshll.u32 %v1376_v32, 16 }
 0x179   : > { %v548_v11 = vpop.f32.mrf.mxu0  ;;  %2636 = vmatmul.bf16.vlgmr.msrb.gmra.mxu1 %v6120_v1  ;;  %v1541_v32 = vrot.slane %v1540_v55, 4 }
 0x17a   : > { %v1544_v26 = vrot.slane %v8513_v45, 4  ;;  %v549_v31 = vadd.f32 %v7019_v19, %v548_v11  ;;  %v1889_v1 = vsel %vm6862_vm5, %v5653_v14, %v1888_v59  ;;  %v1898_v7 = vsel %vm6862_vm5, %v1890_v33, %v1897_v30 }
 0x17b   : > { %v2093_v21 = vunpack.c.l.b16 %v1889_v1  ;;  %v2094_v58 = vunpack.c.l.b16 %v1898_v7  ;;  %v1773_v11 = vshrl.u32 %v7127_v39, 16 }
 0x17c   : > { %2377 = vmatmul.bf16.gmra.mxu0 %v2108_v25  ;;  %v1542_v25 = vrot.slane %v8512_v6, 5  ;;  %v1550_v6 = vrot.slane %v1548_v34, 5  ;;  %v1766_v34 = vsel %vm6862_vm5, %v1758_v35, %v1765_v12  ;;  %v599_v30 = vmax.f32 %v549_v31, 0.0 }
 0x17d   : > { %v2115_v49 = vpack.c.b16 %v2094_v58, %v2093_v21  ;;  %v2082_v21 = vunpack.c.l.b16 %v1766_v34  ;;  %v7160_v58 = vrot.slane %v1773_v11, 7  ;;  %v1785_v35 = vshll.u32 %v7144_v54, 16  ;;  %v1642_v11 = vld [vmem:[#allocation2 + $0x124] sm:$0x8] }
 0x17e   : > { %v1545_v46 = vor.u32 %v1544_v26, %v1542_v25  ;;  %v1543_v59 = vsel %vm6700_vm2, %v1541_v32, %v1542_v25  ;;  %v7150_v38 = vpop.f32.mrf.mxu1  ;;  %v1757_v26 = vsel %vm6862_vm5, %v7108_v16, %v1756_v52  ;;  %v1776_v16 = vshll.u32 %v7127_v39, 16 }
 0x17f   : > { %v2031_v5 = vunpack.c.l.b16 %v1543_v59  ;;  %v2081_v7 = vunpack.c.l.b16 %v1757_v26  ;;  %v1784_v52 = vrot.slane %v1782_v15, 7  ;;  %v1643_v31 = vld [vmem:[#allocation2 + $0x128] sm:$0xf]  ;;  %v7164_v12 = vrot.slane %v1768_v63, 11  ;;  %v7168_v26 = vld [vmem:[#allocation2 + $0x12c] sm:$0xf] }
 0x180   : > { %v1546_v14 = vrot.slane %v1545_v46, 4  ;;  %v1905_v24 = vshrl.u32 %v1643_v31, 16  ;;  %v1908_v46 = vshll.u32 %v1643_v31, 16  ;;  %8555 = vst [vmem:[#allocation6_spill] sm:$0xff] %v7168_v26  ;;  %v1778_v34 = vor.u32 %v1776_v16, %v7160_v58 }
 0x181   : > { %v550_v45 = vpop.f32.mrf.mxu0  ;;  %2412 = vmatmul.bf16.gmra.mxu2 %v2115_v49  ;;  %v1644_v49 = vld [vmem:[#allocation2 + $0x12c] sm:$0xf]  ;;  %v8521_v63 = vshrl.u32 %v7168_v26, 16  ;;  %v1780_v16 = vrot.slane %v7160_v58, 4 }
 0x182   : > { %v551_v33 = vadd.f32 %v7019_v19, %v550_v45  ;;  %v1551_v55 = vsel %vm6700_vm2, %v1546_v14, %v1550_v6  ;;  %v1914_v59 = vshrl.u32 %v1644_v49, 16  ;;  %v1917_v14 = vshll.u32 %v1644_v49, 16 }
 0x183   : > { %v2032_v45 = vunpack.c.l.b16 %v1551_v55  ;;  %v1907_v55 = vrot.slane %v1905_v24, 7 }
 0x184   : > { %v600_v25 = vmax.f32 %v551_v33, 0.0  ;;  %v7166_v33 = vld [vmem:[#allocation2 + $0x128] sm:$0xf] }
 0x185   : > { %v2052_v32 = vpack.c.b16 %v2032_v45, %v2031_v5  ;;  %8554 = vst [vmem:[#allocation5_spill] sm:$0xff] %v7166_v33  ;;  %v2109_v5 = vpack.c.b16 %v2082_v21, %v2081_v7  ;;  %v8518_v39 = vshrl.u32 %v7166_v33, 16  ;;  %v8519_v54 = vshll.u32 %v7166_v33, 16  ;;  %v1377_v45 = vld [vmem:[#allocation2 + $0x130] sm:$0x1] }
 0x186   : > { %v6308_v1 = vpack.c.bf16 %v600_v25, %v599_v30  ;;  %v7173_v15 = vpop.f32.mrf.mxu1  ;;  %v1900_v30 = vshrl.u32 %v1642_v11, 16  ;;  %v1916_v25 = vrot.slane %v1914_v59, 7  ;;  %v8520_v7 = vshll.u32 %v7168_v26, 16  ;;  %v3648_v33 = vld [vmem:[#allocation2 + $0x34] sm:$0x8] }
 0x187   : > { %2328 = vmatmul.bf16.gmra.mxu3 %v2052_v32  ;;  %8556 = vst [vmem:[#allocation7_spill] sm:$0xff] %v7173_v15  ;;  %v1552_v21 = vrot.slane %v8518_v39, 4  ;;  %v1553_v32 = vrot.slane %v8519_v54, 5  ;;  %v1910_v49 = vor.u32 %v1908_v46, %v1907_v55  ;;  %v1912_v11 = vrot.slane %v1907_v55, 4  ;;  %v6140_v39 = vld [vmem:[%s8468_s3 + $0x20] sm:$0xff] }
 0x188   : > { %6423 = vst [vmem:[#allocation2 + $0x140] sm:$0xff] %v6308_v1   ;;  %v6121_v1 = vld [vmem:[#allocation2 + $0x20] sm:$0xff]  ;;  %v5654_v31 = vrot.slane %v1900_v30, 11  ;;  %v1919_v24 = vor.u32 %v1917_v14, %v1916_v25  ;;  %v1556_v42 = vrot.slane %v8520_v7, 5  ;;  %v1562_v48 = vshll.u32 %v1377_v45, 16  ;;  %2542 = vmatpush.bf16.msrb.mxu3 %v6140_v39  ;;  %v6187_v39 = vld [vmem:[%s8468_s3 + $0x118] sm:$0xff] }
 0x189   : > { %v553_v6 = vpop.f32.mrf.mxu0  ;;  %2641 = vmatmul.bf16.gmra.mxu1 %v6121_v1  ;;  %v1554_v59 = vor.u32 %v1553_v32, %v1552_v21  ;;  %v1628_v54 = vld [vmem:[#allocation2 + $0xb0] sm:$0xf]  ;;  %v1787_v30 = vor.u32 %v1785_v35, %v1784_v52  ;;  %v7194_v45 = vld [vmem:[#allocation2 + $0xb4] sm:$0xf]  ;;  %3441 = vmatpush.bf16.msrb.mxu2 %v6187_v39 }
 0x18a   : > { %v554_v58 = vadd.f32 %v7019_v19, %v553_v6  ;;  %v1911_v46 = vsel %vm6862_vm5, %v5654_v31, %v1910_v49  ;;  %v1920_v14 = vsel %vm6862_vm5, %v1912_v11, %v1919_v24  ;;  %v1564_v32 = vrot.slane %v1562_v48, 5  ;;  %v7199_v11 = vld [vmem:[#allocation2 + $0x38] sm:$0xf]  ;;  %v3652_v15 = vld [vmem:[#allocation2 + $0x50] sm:$0xf] }
 0x18b   : > { %v2095_v55 = vunpack.c.l.b16 %v1911_v46  ;;  %v2096_v25 = vunpack.c.l.b16 %v1920_v14  ;;  %v1555_v1 = vrot.slane %v1554_v59, 4  ;;  %v1795_v41 = vshrl.u32 %v1628_v54, 16 }
 0x18c   : > { %2382 = vmatmul.bf16.gmra.mxu0 %v2109_v5  ;;  %v1558_v5 = vrot.slane %v8521_v63, 4  ;;  %v1627_v63 = vld [vmem:[#allocation2 + $0xac] sm:$0x8]  ;;  %v1779_v48 = vsel %vm6862_vm5, %v7164_v12, %v1778_v34  ;;  %v1788_v24 = vsel %vm6862_vm5, %v1780_v16, %v1787_v30  ;;  %v601_v59 = vmax.f32 %v554_v58, 0.0 }
 0x18d   : > { %v2116_v17 = vpack.c.b16 %v2096_v25, %v2095_v55  ;;  %v1557_v6 = vsel %vm6700_vm2, %v1555_v1, %v1556_v42  ;;  %v1790_v46 = vshrl.u32 %v1627_v63, 16  ;;  %v2083_v1 = vunpack.c.l.b16 %v1779_v48 }
 0x18e   : > { %v1559_v21 = vor.u32 %v1558_v5, %v1556_v42  ;;  %v7201_v52 = vpop.f32.mrf.mxu1  ;;  %v2033_v35 = vunpack.c.l.b16 %v1557_v6  ;;  %v1804_v42 = vshrl.u32 %v7194_v45, 16  ;;  %v7215_v12 = vrot.slane %v1795_v41, 7  ;;  %v6122_v41 = vld [vmem:[#allocation2 + $0x38] sm:$0xff] }
 0x18f   : > { %8557 = vst [vmem:[#allocation8_spill] sm:$0xff] %v7201_v52  ;;  %v1798_v16 = vshll.u32 %v1628_v54, 16  ;;  %v1807_v58 = vshll.u32 %v7194_v45, 16  ;;  %v1647_v6 = vld [vmem:[#allocation2 + $0x144] sm:$0xf] }
 0x190   : > { %v1560_v31 = vrot.slane %v1559_v21, 4  ;;  %v2084_v21 = vunpack.c.l.b16 %v1788_v24  ;;  %v1806_v30 = vrot.slane %v1804_v42, 7  ;;  %v1936_v39 = vshrl.u32 %v1647_v6, 16  ;;  %v7220_v48 = vld [vmem:[#allocation2 + $0x140] sm:$0xf] }
 0x191   : > { %v555_v7 = vpop.f32.mrf.mxu0  ;;  %2417 = vmatmul.bf16.gmra.mxu2 %v2116_v17  ;;  %v1646_v17 = vld [vmem:[#allocation2 + $0x140] sm:$0xf]  ;;  %8558 = vst [vmem:[#allocation9_spill] sm:$0xff] %v7220_v48  ;;  %v1645_v24 = vld [vmem:[#allocation2 + $0x13c] sm:$0x8]  ;;  %v8525_v45 = vshrl.u32 %v7220_v48, 16 }
 0x192   : > { %v556_v49 = vadd.f32 %v7019_v19, %v555_v7  ;;  %v1565_v7 = vsel %vm6700_vm2, %v1560_v31, %v1564_v32  ;;  %v7218_v32 = vrot.slane %v1790_v46, 11  ;;  %v1927_v31 = vshrl.u32 %v1646_v17, 16  ;;  %v7222_v54 = vld [vmem:[#allocation2 + $0x144] sm:$0xf] }
 0x193   : > { %v2034_v14 = vunpack.c.l.b16 %v1565_v7  ;;  %8559 = vst [vmem:[#allocation10_spill] sm:$0xff] %v7222_v54  ;;  %v8528_v42 = vshll.u32 %v7220_v48, 16  ;;  %v1800_v7 = vor.u32 %v1798_v16, %v7215_v12  ;;  %v1922_v46 = vshrl.u32 %v1645_v24, 16  ;;  %v6139_v16 = vld [vmem:[%s8468_s3 + $0x18] sm:$0xff] }
 0x194   : > { %v602_v5 = vmax.f32 %v556_v49, 0.0  ;;  %v1930_v49 = vshll.u32 %v1646_v17, 16  ;;  %v1378_v17 = vld [vmem:[#allocation2 + $0x148] sm:$0x1]  ;;  %2543 = vmatpush.bf16.msrb.mxu3 %v6139_v16 }
 0x195   : > { %v2053_v34 = vpack.c.b16 %v2034_v14, %v2033_v35  ;;  %v2110_v35 = vpack.c.b16 %v2084_v21, %v2083_v1  ;;  %v1929_v14 = vrot.slane %v1927_v31, 7  ;;  %v1566_v1 = vrot.slane %v8525_v45, 4  ;;  %v6223_v31 = vld [vmem:[%s8468_s3 + $0x1b8] sm:$0xff] }
 0x196   : > { %v6313_v25 = vpack.c.bf16 %v602_v5, %v601_v59  ;;  %v1939_v59 = vshll.u32 %v1647_v6, 16  ;;  %v7227_v5 = vpop.f32.mrf.mxu1  ;;  %v1567_v21 = vrot.slane %v8528_v42, 5  ;;  %v5655_v24 = vrot.slane %v1922_v46, 11  ;;  %4336 = vmatpush.bf16.msra.mxu0 %v6223_v31 }
 0x197   : > { %2333 = vmatmul.bf16.gmra.mxu3 %v2053_v34  ;;  %8560 = vst [vmem:[#allocation11_spill] sm:$0xff] %v7227_v5  ;;  %v1934_v55 = vrot.slane %v1929_v14, 4  ;;  %v8561_v45 = vshll.u32 %v7222_v54, 16  ;;  %v8562_v42 = vshrl.u32 %v7222_v54, 16  ;;  %v1576_v26 = vshll.u32 %v1378_v17, 16 }
 0x198   : > { %6424 = vst [vmem:[#allocation2 + $0x158] sm:$0xff] %v6313_v25   ;;  %v1938_v25 = vrot.slane %v1936_v39, 7  ;;  %v1802_v39 = vrot.slane %v7215_v12, 4  ;;  %v1568_v6 = vor.u32 %v1567_v21, %v1566_v1  ;;  %v7254_v1 = vld [vmem:[#allocation2 + $0x3c] sm:$0xf] }
 0x199   : > { %v558_v63 = vpop.f32.mrf.mxu0  ;;  %2646 = vmatmul.bf16.gmra.mxu1 %v6122_v41  ;;  %v1570_v48 = vrot.slane %v8561_v45, 5  ;;  %v1572_v5 = vrot.slane %v8562_v42, 4  ;;  %v1809_v41 = vor.u32 %v1807_v58, %v1806_v30  ;;  %v6186_v30 = vld [vmem:[%s8468_s3 + $0x110] sm:$0xff] }
 0x19a   : > { %v1941_v34 = vor.u32 %v1939_v59, %v1938_v25  ;;  %v559_v52 = vadd.f32 %v7019_v19, %v558_v63  ;;  %v6222_v59 = vld [vmem:[%s8468_s3 + $0x1b0] sm:$0xff]  ;;  %v1569_v42 = vrot.slane %v1568_v6, 4  ;;  %v1578_v25 = vrot.slane %v1576_v26, 5  ;;  %v6221_v26 = vld [vmem:[%s8468_s3 + $0x1a8] sm:$0xff]  ;;  %3442 = vmatpush.bf16.msrb.mxu2 %v6186_v30 }
 0x19b   : > { %v3697_v63 = vshrl.u32 %v3648_v33, 16  ;;  %4337 = vmatpush.bf16.msra.mxu0 %v6222_v59  ;;  %v1801_v33 = vsel %vm6862_vm5, %v7218_v32, %v1800_v7  ;;  %v1810_v58 = vsel %vm6862_vm5, %v1802_v39, %v1809_v41  ;;  %v3705_v41 = vshll.u32 %v7199_v11, 16 }
 0x19c   : > { %2387 = vmatmul.bf16.gmra.mxu0 %v2110_v35  ;;  %v1932_v35 = vor.u32 %v1930_v49, %v1929_v14  ;;  %v1942_v49 = vsel %vm6862_vm5, %v1934_v55, %v1941_v34  ;;  %v1573_v14 = vor.u32 %v1572_v5, %v1570_v48  ;;  %v1571_v16 = vsel %vm6700_vm2, %v1569_v42, %v1570_v48 }
 0x19d   : > { %v2098_v46 = vunpack.c.l.b16 %v1942_v49  ;;  %v8564_v48 = vshrl.u32 %v7199_v11, 16  ;;  %v603_v6 = vmax.f32 %v559_v52, 0.0  ;;  %v3711_v49 = vshrl.u32 %v7254_v1, 16  ;;  %v6220_v52 = vld [vmem:[%s8468_s3 + $0x1a0] sm:$0xff] }
 0x19e   : > { %v1933_v12 = vsel %vm6862_vm5, %v5655_v24, %v1932_v35  ;;  %v1574_v55 = vrot.slane %v1573_v14, 4  ;;  %v7259_v31 = vpop.f32.mrf.mxu1  ;;  %v2035_v24 = vunpack.c.l.b16 %v1571_v16  ;;  %v2086_v32 = vunpack.c.l.b16 %v1810_v58 }
 0x19f   : > { %v2097_v45 = vunpack.c.l.b16 %v1933_v12  ;;  %8563 = vst [vmem:[#allocation12_spill] sm:$0xff] %v7259_v31  ;;  %v7274_v5 = vrot.slane %v8564_v48, 7  ;;  %v7279_v7 = vrot.slane %v3697_v63, 11  ;;  %4338 = vmatpush.bf16.msra.mxu0 %v6221_v26  ;;  %v3714_v14 = vshll.u32 %v7254_v1, 16  ;;  %v7287_v30 = vld [vmem:[#allocation2 + $0x158] sm:$0xf] }
 0x1a0   : > { %v1579_v35 = vsel %vm6700_vm2, %v1574_v55, %v1578_v25  ;;  %v1649_v25 = vld [vmem:[#allocation2 + $0x158] sm:$0xf]  ;;  %v1648_v26 = vld [vmem:[#allocation2 + $0x154] sm:$0x8]  ;;  %v7289_v58 = vld [vmem:[#allocation2 + $0x15c] sm:$0xf] }
 0x1a1   : > { %v560_v17 = vpop.f32.mrf.mxu0  ;;  %v2117_v21 = vpack.c.b16 %v2098_v46, %v2097_v45  ;;  %v2036_v59 = vunpack.c.l.b16 %v1579_v35  ;;  %v2085_v46 = vunpack.c.l.b16 %v1801_v33  ;;  %v3709_v42 = vrot.slane %v7274_v5, 4 }
 0x1a2   : > { %v561_v34 = vadd.f32 %v7019_v19, %v560_v17  ;;  %v1650_v17 = vld [vmem:[#allocation2 + $0x15c] sm:$0xf]  ;;  %v1949_v63 = vshrl.u32 %v1649_v25, 16  ;;  %v1952_v55 = vshll.u32 %v1649_v25, 16  ;;  %v8535_v11 = vshrl.u32 %v7287_v30, 16 }
 0x1a3   : > { %2422 = vmatmul.bf16.gmra.mxu2 %v2117_v21  ;;  %v2054_v39 = vpack.c.b16 %v2036_v59, %v2035_v24  ;;  %v3713_v21 = vrot.slane %v3711_v49, 7  ;;  %v1961_v24 = vshll.u32 %v1650_v17, 16  ;;  %v2111_v33 = vpack.c.b16 %v2086_v32, %v2085_v46  ;;  %4339 = vmatpush.bf16.msra.mxu0 %v6220_v52  ;;  %v6138_v59 = vld [vmem:[%s8468_s3 + $0x10] sm:$0xff]  ;;  %v6219_v46 = vld [vmem:[%s8468_s3 + $0x198] sm:$0xff] }
 0x1a4   : > { %v604_v12 = vmax.f32 %v561_v34, 0.0  ;;  %v1958_v34 = vshrl.u32 %v1650_v17, 16  ;;  %v8538_v1 = vshll.u32 %v7287_v30, 16  ;;  %v3707_v48 = vor.u32 %v3705_v41, %v7274_v5  ;;  %v6123_v32 = vld [vmem:[#allocation2 + $0x50] sm:$0xff]  ;;  %2544 = vmatpush.bf16.msrb.mxu3 %v6138_v59 }
 0x1a5   : > { %v1944_v35 = vshrl.u32 %v1648_v26, 16  ;;  %v8537_v5 = vshll.u32 %v7289_v58, 16  ;;  %v1580_v52 = vrot.slane %v8535_v11, 4  ;;  %v3716_v25 = vor.u32 %v3714_v14, %v3713_v21 }
 0x1a6   : > { %v6318_v45 = vpack.c.bf16 %v604_v12, %v603_v6  ;;  %v7294_v6 = vpop.f32.mrf.mxu1  ;;  %v1951_v12 = vrot.slane %v1949_v63, 7  ;;  %v1960_v49 = vrot.slane %v1958_v34, 7  ;;  %v1581_v41 = vrot.slane %v8538_v1, 5 }
 0x1a7   : > { %2338 = vmatmul.bf16.gmra.mxu3 %v2054_v39  ;;  %8565 = vst [vmem:[#allocation13_spill] sm:$0xff] %v7294_v6  ;;  %v1379_v39 = vld [vmem:[#allocation2 + $0x160] sm:$0x1]  ;;  %v5656_v17 = vrot.slane %v1944_v35, 11  ;;  %v8566_v6 = vshrl.u32 %v7289_v58, 16  ;;  %4340 = vmatpush.bf16.msra.mxu0 %v6219_v46 }
 0x1a8   : > { %6425 = vst [vmem:[#allocation2 + $0x170] sm:$0xff] %v6318_v45   ;;  %v1954_v63 = vor.u32 %v1952_v55, %v1951_v12  ;;  %v1956_v34 = vrot.slane %v1951_v12, 4  ;;  %v1963_v26 = vor.u32 %v1961_v24, %v1960_v49  ;;  %v1582_v45 = vor.u32 %v1581_v41, %v1580_v52  ;;  %v6218_v55 = vld [vmem:[%s8468_s3 + $0x190] sm:$0xff] }
 0x1a9   : > { %v563_v16 = vpop.f32.mrf.mxu0  ;;  %2651 = vmatmul.bf16.gmra.mxu1 %v6123_v32  ;;  %v1586_v54 = vrot.slane %v8566_v6, 4  ;;  %v1590_v31 = vshll.u32 %v1379_v39, 16  ;;  %v3717_v32 = vsel %vm6862_vm5, %v3709_v42, %v3716_v25  ;;  %v3724_v39 = vshrl.u32 %v3652_v15, 16  ;;  %v6185_v42 = vld [vmem:[%s8468_s3 + $0x108] sm:$0xff] }
 0x1aa   : > { %v564_v11 = vadd.f32 %v7019_v19, %v563_v16  ;;  %v1955_v14 = vsel %vm6862_vm5, %v5656_v17, %v1954_v63  ;;  %v1964_v21 = vsel %vm6862_vm5, %v1956_v34, %v1963_v26  ;;  %v1583_v12 = vrot.slane %v1582_v45, 4  ;;  %v3651_v63 = vld [vmem:[#allocation2 + $0x4c] sm:$0x8]  ;;  %v7328_v45 = vld [vmem:[#allocation2 + $0x54] sm:$0xf]  ;;  %3443 = vmatpush.bf16.msrb.mxu2 %v6185_v42 }
 0x1ab   : > { %v2099_v24 = vunpack.c.l.b16 %v1955_v14  ;;  %v2100_v35 = vunpack.c.l.b16 %v1964_v21  ;;  %v1592_v6 = vrot.slane %v1590_v31, 5  ;;  %v3708_v16 = vsel %vm6862_vm5, %v7279_v7, %v3707_v48  ;;  %4341 = vmatpush.bf16.msra.mxu0 %v6218_v55  ;;  %v6217_v7 = vld [vmem:[%s8468_s3 + $0x188] sm:$0xff] }
 0x1ac   : > { %2392 = vmatmul.bf16.gmra.mxu0 %v2111_v33  ;;  %v1584_v33 = vrot.slane %v8537_v5, 5  ;;  %v6137_v48 = vld [vmem:[%s8468_s3 + $0x8] sm:$0xff]  ;;  %v605_v25 = vmax.f32 %v564_v11, 0.0  ;;  %v4048_v14 = vunpack.c.l.b16 %v3708_v16  ;;  %v4049_v21 = vunpack.c.l.b16 %v3717_v32  ;;  %v6216_v11 = vld [vmem:[%s8468_s3 + $0x180] sm:$0xff] }
 0x1ad   : > { %v2118_v52 = vpack.c.b16 %v2100_v35, %v2099_v24  ;;  %2545 = vmatpush.bf16.msrb.mxu3 %v6137_v48  ;;  %v3719_v55 = vshrl.u32 %v3651_v63, 16  ;;  %v7343_v35 = vrot.slane %v3724_v39, 7  ;;  %v1651_v39 = vld [vmem:[#allocation2 + $0x16c] sm:$0x8]  ;;  %v3736_v42 = vshll.u32 %v7328_v45, 16 }
 0x1ae   : > { %v1587_v49 = vor.u32 %v1586_v54, %v1584_v33  ;;  %v1585_v46 = vsel %vm6700_vm2, %v1583_v12, %v1584_v33  ;;  %v7330_v54 = vpop.f32.mrf.mxu1  ;;  %v3733_v12 = vshrl.u32 %v7328_v45, 16 }
 0x1af   : > { %v2037_v31 = vunpack.c.l.b16 %v1585_v46  ;;  %4342 = vmatpush.bf16.msra.mxu0 %v6217_v7  ;;  %v3731_v45 = vrot.slane %v7343_v35, 4 }
 0x1b0   : > { %v1588_v41 = vrot.slane %v1587_v49, 4  ;;  %v3735_v7 = vrot.slane %v3733_v12, 7 }
 0x1b1   : > { %v565_v59 = vpop.f32.mrf.mxu0 }
 0x1b2   : > { %v566_v17 = vadd.f32 %v7019_v19, %v565_v59  ;;  %v1593_v34 = vsel %vm6700_vm2, %v1588_v41, %v1592_v6  ;;  %v1652_v6 = vld [vmem:[#allocation2 + $0x170] sm:$0xf]  ;;  %v1653_v59 = vld [vmem:[#allocation2 + $0x174] sm:$0xf]  ;;  %v4080_v41 = vpack.c.b16 %v4049_v21, %v4048_v14  ;;  %v6124_v14 = vld [vmem:[#allocation2 + $0x68] sm:$0xff] }
 0x1b3   : > { %2427 = vmatmul.bf16.gmra.mxu2 %v2118_v52  ;;  %v2038_v33 = vunpack.c.l.b16 %v1593_v34  ;;  %v3727_v52 = vshll.u32 %v3652_v15, 16  ;;  %v1971_v16 = vshrl.u32 %v1652_v6, 16  ;;  %v1980_v32 = vshrl.u32 %v1653_v59, 16  ;;  %4343 = vmatpush.bf16.msra.mxu0 %v6216_v11 }
 0x1b4   : > { %v606_v26 = vmax.f32 %v566_v17, 0.0  ;;  %v7349_v17 = vrot.slane %v3719_v55, 11  ;;  %v1974_v63 = vshll.u32 %v1652_v6, 16  ;;  %v7360_v55 = vld [vmem:[#allocation2 + $0x174] sm:$0xf] }
 0x1b5   : > { %v2055_v49 = vpack.c.b16 %v2038_v33, %v2037_v31  ;;  %v7352_v31 = vor.u32 %v3727_v52, %v7343_v35  ;;  %v1973_v15 = vrot.slane %v1971_v16, 7  ;;  %v1982_v34 = vrot.slane %v1980_v32, 7  ;;  %v7357_v33 = vld [vmem:[#allocation2 + $0x170] sm:$0xf]  ;;  %v1380_v16 = vld [vmem:[#allocation2 + $0x178] sm:$0x1] }
 0x1b6   : > { %v6323_v24 = vpack.c.bf16 %v606_v26, %v605_v25  ;;  %v7355_v48 = vpop.f32.mrf.mxu1  ;;  %v1966_v25 = vshrl.u32 %v1651_v39, 16  ;;  %v1983_v26 = vshll.u32 %v1653_v59, 16  ;;  %8568 = vst [vmem:[#allocation15_spill] sm:$0xff] %v7357_v33  ;;  %v8539_v12 = vshll.u32 %v7357_v33, 16 }
 0x1b7   : > { %2343 = vmatmul.bf16.gmra.mxu3 %v2055_v49  ;;  %8567 = vst [vmem:[#allocation14_spill] sm:$0xff] %v7355_v48  ;;  %v1976_v6 = vor.u32 %v1974_v63, %v1973_v15  ;;  %v1978_v11 = vrot.slane %v1973_v15, 4  ;;  %v8543_v59 = vshrl.u32 %v7360_v55, 16  ;;  %v8542_v32 = vshll.u32 %v7360_v55, 16  ;;  %v3655_v48 = vld [vmem:[#allocation2 + $0x68] sm:$0xf] }
 0x1b8   : > { %6426 = vst [vmem:[#allocation2 + $0x188] sm:$0xff] %v6323_v24   ;;  %v8536_v24 = vshrl.u32 %v7357_v33, 16  ;;  %v5657_v49 = vrot.slane %v1966_v25, 11  ;;  %v1985_v52 = vor.u32 %v1983_v26, %v1982_v34  ;;  %v1595_v39 = vrot.slane %v8539_v12, 5 }
 0x1b9   : > { %v568_v46 = vpop.f32.mrf.mxu0  ;;  %2656 = vmatmul.bf16.gmra.mxu1 %v6124_v14  ;;  %v1604_v25 = vshll.u32 %v1380_v16, 16  ;;  %v3738_v15 = vor.u32 %v3736_v42, %v3735_v7  ;;  %v1598_v14 = vrot.slane %v8542_v32, 5  ;;  %v6184_v16 = vld [vmem:[%s8468_s3 + $0x100] sm:$0xff] }
 0x1ba   : > { %v569_v21 = vadd.f32 %v7019_v19, %v568_v46  ;;  %v1594_v46 = vrot.slane %v8536_v24, 4  ;;  %v1977_v35 = vsel %vm6862_vm5, %v5657_v49, %v1976_v6  ;;  %v1986_v63 = vsel %vm6862_vm5, %v1978_v11, %v1985_v52  ;;  %v3654_v6 = vld [vmem:[#allocation2 + $0x64] sm:$0x8]  ;;  %3444 = vmatpush.bf16.msrb.mxu2 %v6184_v16 }
 0x1bb   : > { %v2101_v34 = vunpack.c.l.b16 %v1977_v35  ;;  %v1600_v24 = vrot.slane %v8543_v59, 4  ;;  %v1606_v42 = vrot.slane %v1604_v25, 5  ;;  %v6136_v52 = vld [vmem:[%s8468_s3] sm:$0xff]  ;;  %v3741_v35 = vshrl.u32 %v3654_v6, 16 }
 0x1bc   : > { %4344 = vmatmul.bf16.vlgmr.msra.gmra.mxu0 %v4080_v41  ;;  %v2102_v41 = vunpack.c.l.b16 %v1986_v63  ;;  %v1596_v26 = vor.u32 %v1595_v39, %v1594_v46  ;;  %v607_v1 = vmax.f32 %v569_v21, 0.0  ;;  %v3656_v46 = vld [vmem:[#allocation2 + $0x6c] sm:$0xf]  ;;  %2546 = vmatpush.bf16.msrb.mxu3 %v6136_v52  ;;  %v3749_v6 = vshll.u32 %v3655_v48, 16  ;;  %v1654_v52 = vld [vmem:[#allocation2 + $0x184] sm:$0x8] }
 0x1bd   : > { %v1601_v7 = vor.u32 %v1600_v24, %v1598_v14  ;;  %v3739_v24 = vsel %vm6862_vm5, %v3731_v45, %v3738_v15 }
 0x1be   : > { %v2119_v12 = vpack.c.b16 %v2102_v41, %v2101_v34  ;;  %v1597_v33 = vrot.slane %v1596_v26, 4  ;;  %v7380_v11 = vpop.f32.mrf.mxu1  ;;  %v3746_v34 = vshrl.u32 %v3655_v48, 16  ;;  %v4051_v26 = vunpack.c.l.b16 %v3739_v24 }
 0x1bf   : > { %v1602_v39 = vrot.slane %v1601_v7, 4  ;;  %v1655_v16 = vld [vmem:[#allocation2 + $0x188] sm:$0xf]  ;;  %v8572_v48 = vshrl.u32 %v6676_v43, 16 }
 0x1c0   : > { %v1599_v21 = vsel %vm6700_vm2, %v1597_v33, %v1598_v14  ;;  %v3748_v15 = vrot.slane %v3746_v34, 7 }
 0x1c1   : > { %v570_v5 = vpop.f32.mrf.mxu0  ;;  %v2039_v63 = vunpack.c.l.b16 %v1599_v21  ;;  %v1607_v33 = vsel %vm6700_vm2, %v1602_v39, %v1606_v42  ;;  %v1656_v21 = vld [vmem:[#allocation2 + $0x18c] sm:$0xf]  ;;  %v770_v39 = vld [vmem:[#allocation2 + $0x4] sm:$0x8]  ;;  %v838_v34 = vrot.slane %v8572_v48, 7 }
 0x1c2   : > { %v571_v49 = vadd.f32 %v7019_v19, %v570_v5  ;;  %v3730_v5 = vsel %vm6862_vm5, %v7349_v17, %v7352_v31  ;;  %v2040_v14 = vunpack.c.l.b16 %v1607_v33  ;;  %v5917_v17 = vrot.slane %v3741_v35, 11  ;;  %v6125_v31 = vld [vmem:[#allocation2 + $0x80] sm:$0xff]  ;;  %v773_v48 = vld [vmem:[#allocation2 + $0x1c] sm:$0x8] }
 0x1c3   : > { %2432 = vmatmul.bf16.gmra.mxu2 %v2119_v12  ;;  %v3755_v12 = vshrl.u32 %v3656_v46, 16  ;;  %v4050_v41 = vunpack.c.l.b16 %v3730_v5  ;;  %v1993_v5 = vshrl.u32 %v1655_v16, 16  ;;  %v2002_v24 = vshrl.u32 %v1656_v21, 16 }
 0x1c4   : > { %v608_v19 = vmax.f32 %v571_v49, 0.0  ;;  %v8569_v49 = vmov 0   ;;  %v2056_v45 = vpack.c.b16 %v2040_v14, %v2039_v63  ;;  %v1996_v35 = vshll.u32 %v1655_v16, 16 }
 0x1c5   : > { %v3757_v7 = vrot.slane %v3755_v12, 7  ;;  %v4081_v42 = vpack.c.b16 %v4051_v26, %v4050_v41  ;;  %v822_v33 = vshrl.u32 %v770_v39, 16  ;;  %v8571_v63 = vshrl.u32 %v6670_v40, 16 }
 0x1c6   : > { %v6328_v25 = vpack.c.bf16 %v608_v19, %v607_v1  ;;  %v7400_v1 = vpop.f32.mrf.mxu1  ;;  %v1988_v19 = vshrl.u32 %v1654_v52, 16  ;;  %v2004_v32 = vrot.slane %v2002_v24, 7  ;;  %v2005_v59 = vshll.u32 %v1656_v21, 16 }
 0x1c7   : > { %8570 = vst [vmem:[#allocation16_spill] sm:$0xff] %v7400_v1  ;;  %2348 = vmatmul.bf16.gmra.mxu3 %v2056_v45  ;;  %v829_v14 = vrot.slane %v8571_v63, 7  ;;  %v5563_v41 = vrot.slane %v822_v33, 11  ;;  %v8573_v26 = vshll.u32 %v6670_v40, 16  ;;  %v3751_v1 = vor.u32 %v3749_v6, %v3748_v15 }
 0x1c8   : > { %6427 = vst [vmem:[#allocation2 + $0x1a0] sm:$0xff] %v6328_v25   ;;  %v3758_v25 = vshll.u32 %v3656_v46, 16  ;;  %v5658_v12 = vrot.slane %v1988_v19, 11  ;;  %v8574_v46 = vshll.u32 %v6676_v43, 16  ;;  %v2007_v63 = vor.u32 %v2005_v59, %v2004_v32  ;;  %v6199_v32 = vld [vmem:[%s8468_s3 + $0x178] sm:$0xff] }
 0x1c9   : > { %766 = vst [vmem:[#allocation2 + $0x1a0] sm:$0xf] %v8569_v49  ;;  %2661 = vmatmul.bf16.gmra.mxu1 %v6125_v31  ;;  %v832_v45 = vor.u32 %v8573_v26, %v829_v14  ;;  %v834_v52 = vrot.slane %v829_v14, 4  ;;  %v3753_v21 = vrot.slane %v3748_v15, 4  ;;  %3526 = vmatpush.bf16.msra.mxu3 %v6199_v32  ;;  %v3752_v15 = vsel %vm6862_vm5, %v5917_v17, %v3751_v1  ;;  %v6239_v17 = vld [vmem:[%s8468_s3 + $0x238] sm:$0xff] }
 0x1ca   : > { %767 = vst [vmem:[#allocation2 + $0x1a4] sm:$0xf] %v8569_v49  ;;  %v1995_v49 = vrot.slane %v1993_v5, 7  ;;  %v841_v16 = vor.u32 %v8574_v46, %v838_v34  ;;  %v8576_v1 = vshrl.u32 %v6712_v22, 16  ;;  %5106 = vmatpush.bf16.msra.mxu2 %v6239_v17  ;;  %v3661_v17 = vld [vmem:[#allocation2 + $0x98] sm:$0xf] }
 0x1cb   : > { %v833_v31 = vsel %vm6862_vm5, %v5563_v41, %v832_v45  ;;  %v844_v45 = vshrl.u32 %v773_v48, 16 }
 0x1cc   : > { %4349 = vmatmul.bf16.gmra.mxu0 %v4081_v42  ;;  %v1998_v39 = vor.u32 %v1996_v35, %v1995_v49  ;;  %v2000_v3 = vrot.slane %v1995_v49, 4  ;;  %v842_v19 = vsel %vm6862_vm5, %v834_v52, %v841_v16  ;;  %v3760_v42 = vor.u32 %v3758_v25, %v3757_v7  ;;  %v3659_v25 = vld [vmem:[#allocation2 + $0x84] sm:$0xf]  ;;  %v3657_v16 = vld [vmem:[#allocation2 + $0x7c] sm:$0x8] }
 0x1cd   : > { %v1173_v6 = vunpack.c.l.b16 %v833_v31  ;;  %v1174_v33 = vunpack.c.l.b16 %v842_v19  ;;  %v3777_v26 = vshrl.u32 %v3659_v25, 16  ;;  %v8575_v52 = vshrl.u32 %v6710_v20, 16  ;;  %v6231_v31 = vld [vmem:[%s8468_s3 + $0x1f8] sm:$0xff] }
 0x1ce   : > { %v1999_v40 = vsel %vm6862_vm5, %v5658_v12, %v1998_v39  ;;  %v2008_v5 = vsel %vm6862_vm5, %v2000_v3, %v2007_v63  ;;  %v7418_v43 = vpop.f32.mrf.mxu1  ;;  %v2398_v59 = vpop.f32.mrf.mxu2  ;;  %v3761_v7 = vsel %vm6862_vm5, %v3753_v21, %v3760_v42  ;;  %v3658_v3 = vld [vmem:[#allocation2 + $0x80] sm:$0xf]  ;;  %v4052_v12 = vunpack.c.l.b16 %v3752_v15  ;;  %v6126_v19 = vld [vmem:[#allocation2 + $0x98] sm:$0xff]  ;;  %4425 = vmatpush.bf16.msra.mxu1 %v6231_v31  ;;  %v776_v31 = vld [vmem:[#allocation2 + $0x34] sm:$0x8] }
 0x1cf   : > { %v2103_v24 = vunpack.c.l.b16 %v1999_v40  ;;  %v2104_v35 = vunpack.c.l.b16 %v2008_v5  ;;  %v1205_v34 = vpack.c.b16 %v1174_v33, %v1173_v6  ;;  %v4053_v49 = vunpack.c.l.b16 %v3761_v7 }
 0x1d0   : > { %v3768_v41 = vshrl.u32 %v3658_v3, 16  ;;  %v851_v46 = vrot.slane %v8575_v52, 7  ;;  %v860_v63 = vrot.slane %v8576_v1, 7  ;;  %v3763_v5 = vshrl.u32 %v3657_v16, 16  ;;  %v3662_v1 = vld [vmem:[#allocation2 + $0x9c] sm:$0xf] }
 0x1d1   : > { %v2120_v14 = vpack.c.b16 %v2104_v35, %v2103_v24  ;;  %v4082_v42 = vpack.c.b16 %v4053_v49, %v4052_v12  ;;  %v3779_v35 = vrot.slane %v3777_v26, 7  ;;  %v5564_v32 = vrot.slane %v844_v45, 11 }
 0x1d2   : > { %v3770_v24 = vrot.slane %v3768_v41, 7  ;;  %v8577_v6 = vshll.u32 %v6710_v20, 16  ;;  %v8578_v15 = vshll.u32 %v6712_v22, 16  ;;  %v3771_v48 = vshll.u32 %v3658_v3, 16 }
 0x1d3   : > { %2437 = vmatmul.bf16.gmra.mxu2 %v2120_v14  ;;  %v856_v14 = vrot.slane %v851_v46, 4  ;;  %v5918_v12 = vrot.slane %v3763_v5, 11  ;;  %v3790_v5 = vshrl.u32 %v3661_v17, 16 }
 0x1d4   : > { %v854_v33 = vor.u32 %v8577_v6, %v851_v46  ;;  %v863_v7 = vor.u32 %v8578_v15, %v860_v63  ;;  %v3773_v49 = vor.u32 %v3771_v48, %v3770_v24  ;;  %v3775_v52 = vrot.slane %v3770_v24, 4  ;;  %v6152_v46 = vld [vmem:[#allocation2 + $0x20] sm:$0xff] }
 0x1d5   : > { %v3799_v24 = vshrl.u32 %v3662_v1, 16  ;;  %v8579_v6 = vshrl.u32 %v6726_v36, 16 }
 0x1d6   : > { %v2309_v39 = vpop.f32.mrf.mxu1  ;;  %v2400_v40 = vpop.f32.mrf.mxu2  ;;  %v855_v26 = vsel %vm6862_vm5, %v5564_v32, %v854_v33  ;;  %v864_v20 = vsel %vm6862_vm5, %v856_v14, %v863_v7  ;;  %v3774_v22 = vsel %vm6862_vm5, %v5918_v12, %v3773_v49  ;;  %v866_v32 = vshrl.u32 %v776_v31, 16  ;;  %v3660_v14 = vld [vmem:[#allocation2 + $0x94] sm:$0x8] }
 0x1d7   : > { %2547 = vmatmul.bf16.vlgmr.msrb.gmra.mxu3 %v1205_v34  ;;  %v7437_v21 = vadd.f32 %v2398_v59, %v2309_v39  ;;  %v3780_v59 = vshll.u32 %v3659_v25, 16  ;;  %v7443_v34 = vpop.f32.mrf.mxu0  ;;  %v1175_v25 = vunpack.c.l.b16 %v855_v26  ;;  %v1176_v39 = vunpack.c.l.b16 %v864_v20 }
 0x1d8   : > { %v873_v33 = vrot.slane %v8579_v6, 7  ;;  %v8580_v7 = vshrl.u32 %v6728_v37, 16  ;;  %v3801_v26 = vrot.slane %v3799_v24, 7  ;;  %v5565_v20 = vrot.slane %v866_v32, 11 }
 0x1d9   : > { %2666 = vmatmul.bf16.gmra.mxu1 %v6126_v19  ;;  %v3782_v16 = vor.u32 %v3780_v59, %v3779_v35  ;;  %v4054_v19 = vunpack.c.l.b16 %v3774_v22  ;;  %v1206_v35 = vpack.c.b16 %v1176_v39, %v1175_v25  ;;  %v6127_v59 = vld [vmem:[#allocation2 + $0xb0] sm:$0xff]  ;;  %v8582_v39 = vshll.u32 %v6728_v37, 16 }
 0x1da   : > { %v882_v48 = vrot.slane %v8580_v7, 7  ;;  %v878_v25 = vrot.slane %v873_v33, 4  ;;  %v3793_v6 = vshll.u32 %v3661_v17, 16 }
 0x1db   : > { %v3783_v3 = vsel %vm6862_vm5, %v3775_v52, %v3782_v16  ;;  %v3785_v16 = vshrl.u32 %v3660_v14, 16 }
 0x1dc   : > { %4354 = vmatmul.bf16.gmra.mxu0 %v4082_v42  ;;  %v4055_v42 = vunpack.c.l.b16 %v3783_v3  ;;  %v885_v31 = vor.u32 %v8582_v39, %v882_v48 }
 0x1de   : > { %v2311_v41 = vpop.f32.mrf.mxu1  ;;  %v4083_v52 = vpack.c.b16 %v4055_v42, %v4054_v19  ;;  %v886_v24 = vsel %vm6862_vm5, %v878_v25, %v885_v31 }
 0x1df   : > { %v7449_v45 = vadd.f32 %v2400_v40, %v2311_v41  ;;  %v7455_v40 = vpop.f32.mrf.mxu0  ;;  %v3792_v41 = vrot.slane %v3790_v5, 7 }
 0x1e1   : > { %v3797_v7 = vrot.slane %v3792_v41, 4 }
 0x1e3   : > { %3445 = vmatmul.bf16.vlgmr.msrb.gmra.mxu2 %v6152_v46  ;;  %v8581_v46 = vshll.u32 %v6726_v36, 16  ;;  %v6198_v36 = vld [vmem:[%s8468_s3 + $0x170] sm:$0xff] }
 0x1e4   : > { %v2403_v63 = vpop.f32.mrf.mxu2  ;;  %3527 = vmatpush.bf16.msra.mxu3 %v6198_v36 }
 0x1e5   : > { %v876_v22 = vor.u32 %v8581_v46, %v873_v33 }
 0x1e6   : > { %v2314_v15 = vpop.f32.mrf.mxu1 }
 0x1e7   : > { %2552 = vmatmul.bf16.gmra.mxu3 %v1206_v35  ;;  %v7461_v12 = vadd.f32 %v2403_v63, %v2314_v15  ;;  %v3802_v35 = vshll.u32 %v3662_v1, 16  ;;  %v5919_v63 = vrot.slane %v3785_v16, 11  ;;  %v3795_v15 = vor.u32 %v3793_v6, %v3792_v41  ;;  %v7474_v32 = vpop.f32.mrf.mxu0  ;;  %v6153_v1 = vld [vmem:[#allocation2 + $0x38] sm:$0xff]  ;;  %v3665_v16 = vld [vmem:[#allocation2 + $0xb4] sm:$0xf] }
 0x1e8   : > { %v877_v5 = vsel %vm6862_vm5, %v5565_v20, %v876_v22  ;;  %v3821_v25 = vshrl.u32 %v3665_v16, 16  ;;  %v8585_v6 = vshrl.u32 %v6749_v8, 16 }
 0x1e9   : > { %2671 = vmatmul.bf16.gmra.mxu1 %v6127_v59  ;;  %v3804_v19 = vor.u32 %v3802_v35, %v3801_v26  ;;  %v3796_v33 = vsel %vm6862_vm5, %v5919_v63, %v3795_v15  ;;  %v1177_v48 = vunpack.c.l.b16 %v877_v5  ;;  %v1178_v59 = vunpack.c.l.b16 %v886_v24  ;;  %v779_v26 = vld [vmem:[#allocation2 + $0x4c] sm:$0x8] }
 0x1ea   : > { %v2319_v49 = vpop.f32.mrf.mxu3  ;;  %v4056_v46 = vunpack.c.l.b16 %v3796_v33  ;;  %v888_v31 = vshrl.u32 %v779_v26, 16  ;;  %v895_v35 = vrot.slane %v8585_v6, 7  ;;  %v3663_v63 = vld [vmem:[#allocation2 + $0xac] sm:$0x8] }
 0x1eb   : > { %v3805_v14 = vsel %vm6862_vm5, %v3797_v7, %v3804_v19  ;;  %v1207_v39 = vpack.c.b16 %v1178_v59, %v1177_v48  ;;  %v6238_v7 = vld [vmem:[%s8468_s3 + $0x230] sm:$0xff]  ;;  %v8587_v19 = vshrl.u32 %v6751_v9, 16  ;;  %v6128_v5 = vld [vmem:[#allocation2 + $0xc8] sm:$0xff] }
 0x1ec   : > { %4359 = vmatmul.bf16.gmra.mxu0 %v4083_v52  ;;  %v2405_v3 = vpop.f32.mrf.mxu2  ;;  %v3664_v52 = vld [vmem:[#allocation2 + $0xb0] sm:$0xf]  ;;  %v4057_v22 = vunpack.c.l.b16 %v3805_v14  ;;  %5107 = vmatpush.bf16.msra.mxu2 %v6238_v7  ;;  %v3823_v14 = vrot.slane %v3821_v25, 7  ;;  %v5566_v59 = vrot.slane %v888_v31, 11 }
 0x1ee   : > { %v2316_v42 = vpop.f32.mrf.mxu1  ;;  %v4084_v36 = vpack.c.b16 %v4057_v22, %v4056_v46  ;;  %v3824_v46 = vshll.u32 %v3665_v16, 16 }
 0x1ef   : > { %v7476_v37 = vadd.f32 %v2405_v3, %v2316_v42  ;;  %v3812_v3 = vshrl.u32 %v3664_v52, 16  ;;  %v6230_v42 = vld [vmem:[%s8468_s3 + $0x1f0] sm:$0xff]  ;;  %v7496_v48 = vpop.f32.mrf.mxu0 }
 0x1f0   : > { %4426 = vmatpush.bf16.msra.mxu1 %v6230_v42  ;;  %v3826_v7 = vor.u32 %v3824_v46, %v3823_v14 }
 0x1f1   : > { %8583 = vst [vmem:[#allocation17_spill] sm:$0xff] %v7476_v37  ;;  %v3814_v33 = vrot.slane %v3812_v3, 7 }
 0x1f2   : > { %v2321_v17 = vpop.f32.mrf.mxu3 }
 0x1f3   : > { %3450 = vmatmul.bf16.gmra.mxu2 %v6153_v1  ;;  %v3807_v1 = vshrl.u32 %v3663_v63, 16  ;;  %v3819_v25 = vrot.slane %v3814_v33, 4 }
 0x1f4   : > { %v2408_v41 = vpop.f32.mrf.mxu2 }
 0x1f5   : > { %v7482_v20 = vadd.f32 %v2408_v41, %v2319_v49  ;;  %v904_v49 = vrot.slane %v8587_v19, 7  ;;  %v8588_v41 = vshll.u32 %v6749_v8, 16  ;;  %v900_v19 = vrot.slane %v895_v35, 4 }
 0x1f6   : > { %v7486_v15 = vpop.f32.mrf.mxu1  ;;  %v5920_v63 = vrot.slane %v3807_v1, 11 }
 0x1f7   : > { %8584 = vst [vmem:[#allocation18_spill] sm:$0xff] %v7482_v20  ;;  %2557 = vmatmul.bf16.gmra.mxu3 %v1207_v39  ;;  %v898_v26 = vor.u32 %v8588_v41, %v895_v35  ;;  %v3815_v20 = vshll.u32 %v3664_v52, 16  ;;  %v7514_v1 = vpop.f32.mrf.mxu0 }
 0x1f8   : > { %8586 = vst [vmem:[#allocation19_spill] sm:$0xff] %v7486_v15  ;;  %v8589_v15 = vshll.u32 %v6751_v9, 16 }
 0x1f9   : > { %2676 = vmatmul.bf16.gmra.mxu1 %v6128_v5  ;;  %v3817_v3 = vor.u32 %v3815_v20, %v3814_v33  ;;  %v899_v31 = vsel %vm6862_vm5, %v5566_v59, %v898_v26  ;;  %v6154_v5 = vld [vmem:[#allocation2 + $0x50] sm:$0xff]  ;;  %v3667_v20 = vld [vmem:[#allocation2 + $0xc8] sm:$0xf] }
 0x1fa   : > { %v2324_v24 = vpop.f32.mrf.mxu3  ;;  %v907_v39 = vor.u32 %v8589_v15, %v904_v49  ;;  %v1179_v52 = vunpack.c.l.b16 %v899_v31  ;;  %v3668_v15 = vld [vmem:[#allocation2 + $0xcc] sm:$0xf]  ;;  %v3834_v41 = vshrl.u32 %v3667_v20, 16  ;;  %v6129_v31 = vld [vmem:[#allocation2 + $0xe0] sm:$0xff] }
 0x1fb   : > { %v3818_v9 = vsel %vm6862_vm5, %v5920_v63, %v3817_v3  ;;  %v3843_v26 = vshrl.u32 %v3668_v15, 16  ;;  %v3666_v63 = vld [vmem:[#allocation2 + $0xc4] sm:$0x8] }
 0x1fc   : > { %4364 = vmatmul.bf16.gmra.mxu0 %v4084_v36  ;;  %v2410_v6 = vpop.f32.mrf.mxu2  ;;  %v908_v8 = vsel %vm6862_vm5, %v900_v19, %v907_v39  ;;  %v782_v36 = vld [vmem:[#allocation2 + $0x64] sm:$0x8]  ;;  %v4058_v14 = vunpack.c.l.b16 %v3818_v9  ;;  %v8593_v39 = vshrl.u32 %v6772_v61, 16  ;;  %v3836_v9 = vrot.slane %v3834_v41, 7 }
 0x1fd   : > { %v7502_v22 = vadd.f32 %v2410_v6, %v2321_v17  ;;  %v3827_v17 = vsel %vm6862_vm5, %v3819_v25, %v3826_v7  ;;  %v1180_v16 = vunpack.c.l.b16 %v908_v8  ;;  %v910_v19 = vshrl.u32 %v782_v36, 16 }
 0x1fe   : > { %v7504_v42 = vpop.f32.mrf.mxu1  ;;  %v4059_v59 = vunpack.c.l.b16 %v3827_v17  ;;  %v917_v46 = vrot.slane %v8593_v39, 7  ;;  %v8595_v25 = vshrl.u32 %v6774_v62, 16  ;;  %v3845_v17 = vrot.slane %v3843_v26, 7 }
 0x1ff   : > { %8590 = vst [vmem:[#allocation20_spill] sm:$0xff] %v7502_v22  ;;  %v1208_v6 = vpack.c.b16 %v1180_v16, %v1179_v52  ;;  %v5567_v52 = vrot.slane %v910_v19, 11  ;;  %v8596_v16 = vshll.u32 %v6772_v61, 16  ;;  %v7530_v26 = vpop.f32.mrf.mxu0 }
 0x200   : > { %8591 = vst [vmem:[#allocation21_spill] sm:$0xff] %v7504_v42  ;;  %v926_v7 = vrot.slane %v8595_v25, 7  ;;  %v922_v39 = vrot.slane %v917_v46, 4  ;;  %v3846_v25 = vshll.u32 %v3668_v15, 16 }
 0x202   : > { %v2326_v35 = vpop.f32.mrf.mxu3  ;;  %v3848_v41 = vor.u32 %v3846_v25, %v3845_v17 }
 0x203   : > { %3455 = vmatmul.bf16.gmra.mxu2 %v6154_v5  ;;  %v3829_v5 = vshrl.u32 %v3666_v63, 16 }
 0x204   : > { %v2413_v49 = vpop.f32.mrf.mxu2 }
 0x205   : > { %v7516_v33 = vadd.f32 %v2413_v49, %v2324_v24  ;;  %v4085_v24 = vpack.c.b16 %v4059_v59, %v4058_v14  ;;  %v920_v49 = vor.u32 %v8596_v16, %v917_v46  ;;  %v3841_v59 = vrot.slane %v3836_v9, 4 }
 0x206   : > { %v7520_v3 = vpop.f32.mrf.mxu1 }
 0x207   : > { %8592 = vst [vmem:[#allocation22_spill] sm:$0xff] %v7516_v33  ;;  %2562 = vmatmul.bf16.gmra.mxu3 %v1208_v6  ;;  %v3837_v33 = vshll.u32 %v3667_v20, 16  ;;  %v5921_v6 = vrot.slane %v3829_v5, 11  ;;  %v921_v61 = vsel %vm6862_vm5, %v5567_v52, %v920_v49  ;;  %v6155_v20 = vld [vmem:[#allocation2 + $0x68] sm:$0xff] }
 0x208   : > { %8594 = vst [vmem:[#allocation23_spill] sm:$0xff] %v7520_v3  ;;  %v8597_v3 = vshll.u32 %v6774_v62, 16  ;;  %v6197_v62 = vld [vmem:[%s8468_s3 + $0x168] sm:$0xff]  ;;  %v1181_v46 = vunpack.c.l.b16 %v921_v61 }
 0x209   : > { %2681 = vmatmul.bf16.gmra.mxu1 %v6129_v31  ;;  %v3839_v14 = vor.u32 %v3837_v33, %v3836_v9  ;;  %3528 = vmatpush.bf16.msra.mxu3 %v6197_v62  ;;  %v3849_v33 = vsel %vm6862_vm5, %v3841_v59, %v3848_v41  ;;  %v3671_v31 = vld [vmem:[#allocation2 + $0xe4] sm:$0xf]  ;;  %v6237_v59 = vld [vmem:[%s8468_s3 + $0x228] sm:$0xff]  ;;  %v8603_v41 = vshrl.u32 %v6801_v57, 16  ;;  %v6130_v62 = vld [vmem:[#allocation2 + $0xf8] sm:$0xff] }
 0x20a   : > { %v2329_v8 = vpop.f32.mrf.mxu3  ;;  %v929_v42 = vor.u32 %v8597_v3, %v926_v7  ;;  %v3670_v7 = vld [vmem:[#allocation2 + $0xe0] sm:$0xf]  ;;  %v4061_v17 = vunpack.c.l.b16 %v3849_v33  ;;  %v3865_v16 = vshrl.u32 %v3671_v31, 16  ;;  %v6229_v61 = vld [vmem:[%s8468_s3 + $0x1e8] sm:$0xff]  ;;  %5108 = vmatpush.bf16.msra.mxu2 %v6237_v59 }
 0x20b   : > { %v3840_v15 = vsel %vm6862_vm5, %v5921_v6, %v3839_v14  ;;  %v3856_v52 = vshrl.u32 %v3670_v7, 16  ;;  %v3669_v6 = vld [vmem:[#allocation2 + $0xdc] sm:$0x8]  ;;  %4427 = vmatpush.bf16.msra.mxu1 %v6229_v61  ;;  %v6156_v59 = vld [vmem:[#allocation2 + $0x80] sm:$0xff] }
 0x20c   : > { %4369 = vmatmul.bf16.gmra.mxu0 %v4085_v24  ;;  %v2415_v36 = vpop.f32.mrf.mxu2  ;;  %v930_v19 = vsel %vm6862_vm5, %v922_v39, %v929_v42  ;;  %v785_v42 = vld [vmem:[#allocation2 + $0x7c] sm:$0x8]  ;;  %v4060_v9 = vunpack.c.l.b16 %v3840_v15  ;;  %v8601_v39 = vshrl.u32 %v6799_v56, 16  ;;  %v3851_v33 = vshrl.u32 %v3669_v6, 16 }
 0x20d   : > { %v7528_v22 = vadd.f32 %v2415_v36, %v2326_v35  ;;  %v1182_v3 = vunpack.c.l.b16 %v930_v19  ;;  %v932_v36 = vshrl.u32 %v785_v42, 16  ;;  %v7559_v19 = vpop.f32.mrf.mxu0  ;;  %v8604_v42 = vshll.u32 %v6799_v56, 16 }
 0x20e   : > { %v7532_v63 = vpop.f32.mrf.mxu1  ;;  %v939_v25 = vrot.slane %v8601_v39, 7  ;;  %v4086_v15 = vpack.c.b16 %v4061_v17, %v4060_v9  ;;  %v5922_v9 = vrot.slane %v3851_v33, 11 }
 0x20f   : > { %8598 = vst [vmem:[#allocation24_spill] sm:$0xff] %v7528_v22  ;;  %v1209_v49 = vpack.c.b16 %v1182_v3, %v1181_v46  ;;  %v3858_v46 = vrot.slane %v3856_v52, 7  ;;  %v3867_v3 = vrot.slane %v3865_v16, 7  ;;  %v3859_v22 = vshll.u32 %v3670_v7, 16 }
 0x210   : > { %8599 = vst [vmem:[#allocation25_spill] sm:$0xff] %v7532_v63  ;;  %v942_v39 = vor.u32 %v8604_v42, %v939_v25  ;;  %v8605_v63 = vshll.u32 %v6801_v57, 16  ;;  %v8608_v42 = vshrl.u32 %v6821_v50, 16 }
 0x211   : > { %v3861_v17 = vor.u32 %v3859_v22, %v3858_v46  ;;  %v3863_v6 = vrot.slane %v3858_v46, 4 }
 0x212   : > { %v2331_v35 = vpop.f32.mrf.mxu3 }
 0x213   : > { %3460 = vmatmul.bf16.gmra.mxu2 %v6155_v20  ;;  %v3862_v57 = vsel %vm6862_vm5, %v5922_v9, %v3861_v17  ;;  %v8610_v9 = vshrl.u32 %v6823_v51, 16 }
 0x214   : > { %v2418_v24 = vpop.f32.mrf.mxu2 }
 0x215   : > { %v7545_v5 = vadd.f32 %v2418_v24, %v2329_v8  ;;  %v948_v8 = vrot.slane %v8603_v41, 7  ;;  %v5568_v24 = vrot.slane %v932_v36, 11  ;;  %v970_v17 = vrot.slane %v8610_v9, 7 }
 0x216   : > { %v7549_v14 = vpop.f32.mrf.mxu1 }
 0x217   : > { %8600 = vst [vmem:[#allocation26_spill] sm:$0xff] %v7545_v5  ;;  %2567 = vmatmul.bf16.gmra.mxu3 %v1209_v49  ;;  %v951_v5 = vor.u32 %v8605_v63, %v948_v8  ;;  %v3868_v49 = vshll.u32 %v3671_v31, 16  ;;  %v943_v36 = vsel %vm6862_vm5, %v5568_v24, %v942_v39  ;;  %v3673_v31 = vld [vmem:[#allocation2 + $0xf8] sm:$0xf]  ;;  %v3674_v8 = vld [vmem:[#allocation2 + $0xfc] sm:$0xf] }
 0x218   : > { %8602 = vst [vmem:[#allocation27_spill] sm:$0xff] %v7549_v14  ;;  %v944_v14 = vrot.slane %v939_v25, 4  ;;  %v1183_v22 = vunpack.c.l.b16 %v943_v36  ;;  %v3878_v33 = vshrl.u32 %v3673_v31, 16  ;;  %v3887_v46 = vshrl.u32 %v3674_v8, 16 }
 0x219   : > { %2686 = vmatmul.bf16.gmra.mxu1 %v6130_v62  ;;  %v3870_v52 = vor.u32 %v3868_v49, %v3867_v3  ;;  %v788_v62 = vld [vmem:[#allocation2 + $0x94] sm:$0x8]  ;;  %v961_v39 = vrot.slane %v8608_v42, 7  ;;  %v3890_v9 = vshll.u32 %v3674_v8, 16  ;;  %v6157_v8 = vld [vmem:[#allocation2 + $0x98] sm:$0xff] }
 0x21a   : > { %v2334_v20 = vpop.f32.mrf.mxu3  ;;  %v952_v56 = vsel %vm6862_vm5, %v944_v14, %v951_v5  ;;  %v4062_v5 = vunpack.c.l.b16 %v3862_v57  ;;  %v954_v24 = vshrl.u32 %v788_v62, 16  ;;  %v8612_v62 = vshll.u32 %v6823_v51, 16  ;;  %v6196_v51 = vld [vmem:[%s8468_s3 + $0x160] sm:$0xff] }
 0x21b   : > { %v3871_v63 = vsel %vm6862_vm5, %v3863_v6, %v3870_v52  ;;  %v1184_v7 = vunpack.c.l.b16 %v952_v56  ;;  %v6131_v6 = vld [vmem:[#allocation2 + $0x110] sm:$0xff]  ;;  %v3880_v56 = vrot.slane %v3878_v33, 7  ;;  %3529 = vmatpush.bf16.msra.mxu3 %v6196_v51  ;;  %v6132_v51 = vld [vmem:[#allocation2 + $0x128] sm:$0xff] }
 0x21c   : > { %4374 = vmatmul.bf16.gmra.mxu0 %v4086_v15  ;;  %v2420_v41 = vpop.f32.mrf.mxu2  ;;  %v4063_v14 = vunpack.c.l.b16 %v3871_v63  ;;  %v5569_v57 = vrot.slane %v954_v24, 11  ;;  %v8611_v63 = vshll.u32 %v6821_v50, 16  ;;  %v973_v42 = vor.u32 %v8612_v62, %v970_v17 }
 0x21d   : > { %v7565_v37 = vadd.f32 %v2420_v41, %v2331_v35  ;;  %v7577_v35 = vpop.f32.mrf.mxu0  ;;  %v1210_v3 = vpack.c.b16 %v1184_v7, %v1183_v22  ;;  %v3672_v41 = vld [vmem:[#allocation2 + $0xf4] sm:$0x8]  ;;  %v3885_v33 = vrot.slane %v3880_v56, 4 }
 0x21e   : > { %v7567_v16 = vpop.f32.mrf.mxu1  ;;  %v3873_v36 = vshrl.u32 %v3672_v41, 16  ;;  %v964_v22 = vor.u32 %v8611_v63, %v961_v39 }
 0x21f   : > { %8606 = vst [vmem:[#allocation28_spill] sm:$0xff] %v7567_v16 }
 0x220   : > { %v965_v50 = vsel %vm6862_vm5, %v5569_v57, %v964_v22 }
 0x222   : > { %v2336_v25 = vpop.f32.mrf.mxu3 }
 0x223   : > { %3465 = vmatmul.bf16.gmra.mxu2 %v6156_v59  ;;  %v3889_v59 = vrot.slane %v3887_v46, 7 }
 0x225   : > { %v7591_v16 = vpop.f32.mrf.mxu0  ;;  %v3892_v46 = vor.u32 %v3890_v9, %v3889_v59  ;;  %v8616_v9 = vshrl.u32 %v6881_v60, 16 }
 0x226   : > { %v2423_v61 = vpop.f32.mrf.mxu2  ;;  %v7583_v49 = vpop.f32.mrf.mxu1 }
 0x227   : > { %v7579_v15 = vadd.f32 %v2423_v61, %v2334_v20  ;;  %8609 = vst [vmem:[#allocation30_spill] sm:$0xff] %v7583_v49  ;;  %2572 = vmatmul.bf16.gmra.mxu3 %v1210_v3  ;;  %v4087_v20 = vpack.c.b16 %v4063_v14, %v4062_v5  ;;  %v966_v61 = vrot.slane %v961_v39, 4  ;;  %v3881_v49 = vshll.u32 %v3673_v31, 16 }
 0x228   : > { %v5923_v5 = vrot.slane %v3873_v36, 11  ;;  %v3893_v39 = vsel %vm6862_vm5, %v3885_v33, %v3892_v46  ;;  %v6236_v46 = vld [vmem:[%s8468_s3 + $0x220] sm:$0xff] }
 0x229   : > { %8607 = vst [vmem:[#allocation29_spill] sm:$0xff] %v7579_v15  ;;  %2691 = vmatmul.bf16.gmra.mxu1 %v6131_v6  ;;  %v3883_v14 = vor.u32 %v3881_v49, %v3880_v56  ;;  %v974_v24 = vsel %vm6862_vm5, %v966_v61, %v973_v42  ;;  %v1185_v49 = vunpack.c.l.b16 %v965_v50  ;;  %v3676_v6 = vld [vmem:[#allocation2 + $0x110] sm:$0xf]  ;;  %v791_v56 = vld [vmem:[#allocation2 + $0xac] sm:$0x8]  ;;  %v4065_v63 = vunpack.c.l.b16 %v3893_v39  ;;  %5109 = vmatpush.bf16.msra.mxu2 %v6236_v46 }
 0x22a   : > { %v2339_v52 = vpop.f32.mrf.mxu3  ;;  %v1186_v17 = vunpack.c.l.b16 %v974_v24  ;;  %v3900_v22 = vshrl.u32 %v3676_v6, 16  ;;  %v976_v42 = vshrl.u32 %v791_v56, 16  ;;  %v6228_v24 = vld [vmem:[%s8468_s3 + $0x1e0] sm:$0xff]  ;;  %v8619_v56 = vshll.u32 %v6881_v60, 16  ;;  %v3679_v46 = vld [vmem:[#allocation2 + $0x128] sm:$0xf] }
 0x22b   : > { %4428 = vmatpush.bf16.msra.mxu1 %v6228_v24 }
 0x22c   : > { %4379 = vmatmul.bf16.gmra.mxu0 %v4087_v20  ;;  %v3677_v20 = vld [vmem:[#allocation2 + $0x114] sm:$0xf]  ;;  %v1211_v62 = vpack.c.b16 %v1186_v17, %v1185_v49  ;;  %v3902_v49 = vrot.slane %v3900_v22, 7 }
 0x22d   : > { %v7610_v61 = vpop.f32.mrf.mxu0 }
 0x22e   : > { %v2425_v7 = vpop.f32.mrf.mxu2  ;;  %v7595_v41 = vpop.f32.mrf.mxu1 }
 0x22f   : > { %v7593_v3 = vadd.f32 %v2425_v7, %v2336_v25  ;;  %8614 = vst [vmem:[#allocation32_spill] sm:$0xff] %v7595_v41  ;;  %v3884_v25 = vsel %vm6862_vm5, %v5923_v5, %v3883_v14  ;;  %v3909_v7 = vshrl.u32 %v3677_v20, 16  ;;  %v983_v5 = vrot.slane %v8616_v9, 7  ;;  %v3675_v14 = vld [vmem:[#allocation2 + $0x10c] sm:$0x8] }
 0x230   : > { %v4064_v57 = vunpack.c.l.b16 %v3884_v25  ;;  %v3895_v39 = vshrl.u32 %v3675_v14, 16  ;;  %v8620_v41 = vshll.u32 %v6883_v0, 16  ;;  %v3907_v14 = vrot.slane %v3902_v49, 4 }
 0x231   : > { %8613 = vst [vmem:[#allocation31_spill] sm:$0xff] %v7593_v3  ;;  %v3911_v17 = vrot.slane %v3909_v7, 7  ;;  %v986_v9 = vor.u32 %v8619_v56, %v983_v5  ;;  %v3903_v3 = vshll.u32 %v3676_v6, 16  ;;  %v8622_v56 = vshrl.u32 %v6942_v44, 16 }
 0x232   : > { %v2341_v31 = vpop.f32.mrf.mxu3  ;;  %v4088_v25 = vpack.c.b16 %v4065_v63, %v4064_v57  ;;  %v5924_v57 = vrot.slane %v3895_v39, 11  ;;  %v3922_v39 = vshrl.u32 %v3679_v46, 16 }
 0x233   : > { %3470 = vmatmul.bf16.gmra.mxu2 %v6157_v8  ;;  %v3905_v63 = vor.u32 %v3903_v3, %v3902_v49 }
 0x236   : > { %v2428_v36 = vpop.f32.mrf.mxu2  ;;  %v7614_v33 = vpop.f32.mrf.mxu1 }
 0x237   : > { %v7608_v59 = vadd.f32 %v2428_v36, %v2339_v52  ;;  %8617 = vst [vmem:[#allocation34_spill] sm:$0xff] %v7614_v33  ;;  %v8618_v52 = vshrl.u32 %v6883_v0, 16  ;;  %2577 = vmatmul.bf16.gmra.mxu3 %v1211_v62  ;;  %v5570_v36 = vrot.slane %v976_v42, 11  ;;  %v988_v33 = vrot.slane %v983_v5, 4  ;;  %v7636_v5 = vpop.f32.mrf.mxu0 }
 0x238   : > { %v3912_v62 = vshll.u32 %v3677_v20, 16 }
 0x239   : > { %8615 = vst [vmem:[#allocation33_spill] sm:$0xff] %v7608_v59  ;;  %v992_v50 = vrot.slane %v8618_v52, 7  ;;  %2696 = vmatmul.bf16.gmra.mxu1 %v6132_v51  ;;  %v987_v42 = vsel %vm6862_vm5, %v5570_v36, %v986_v9  ;;  %v794_v51 = vld [vmem:[#allocation2 + $0xc4] sm:$0x8]  ;;  %v1005_v9 = vrot.slane %v8622_v56, 7 }
 0x23a   : > { %v2344_v8 = vpop.f32.mrf.mxu3  ;;  %v3914_v22 = vor.u32 %v3912_v62, %v3911_v17  ;;  %v1187_v6 = vunpack.c.l.b16 %v987_v42  ;;  %v998_v36 = vshrl.u32 %v794_v51, 16  ;;  %v3924_v42 = vrot.slane %v3922_v39, 7 }
 0x23b   : > { %v995_v59 = vor.u32 %v8620_v41, %v992_v50  ;;  %v6158_v41 = vld [vmem:[#allocation2 + $0xb0] sm:$0xff]  ;;  %v3680_v50 = vld [vmem:[#allocation2 + $0x12c] sm:$0xf]  ;;  %v1010_v56 = vrot.slane %v1005_v9, 4  ;;  %v3925_v39 = vshll.u32 %v3679_v46, 16 }
 0x23c   : > { %4384 = vmatmul.bf16.gmra.mxu0 %v4088_v25  ;;  %v3915_v3 = vsel %vm6862_vm5, %v3907_v14, %v3914_v22  ;;  %v3931_v49 = vshrl.u32 %v3680_v50, 16  ;;  %v6133_v14 = vld [vmem:[#allocation2 + $0x140] sm:$0xff] }
 0x23d   : > { %v996_v60 = vsel %vm6862_vm5, %v988_v33, %v995_v59  ;;  %v4067_v33 = vunpack.c.l.b16 %v3915_v3  ;;  %v8625_v3 = vshll.u32 %v6942_v44, 16 }
 0x23e   : > { %v2430_v52 = vpop.f32.mrf.mxu2  ;;  %v7630_v7 = vpop.f32.mrf.mxu1  ;;  %v1188_v20 = vunpack.c.l.b16 %v996_v60  ;;  %v3933_v60 = vrot.slane %v3931_v49, 7  ;;  %v3934_v49 = vshll.u32 %v3680_v50, 16  ;;  %v6159_v50 = vld [vmem:[#allocation2 + $0xc8] sm:$0xff] }
 0x23f   : > { %v7628_v15 = vadd.f32 %v2430_v52, %v2341_v31  ;;  %8621 = vst [vmem:[#allocation35_spill] sm:$0xff] %v7630_v7  ;;  %v3906_v31 = vsel %vm6862_vm5, %v5924_v57, %v3905_v63  ;;  %v3678_v52 = vld [vmem:[#allocation2 + $0x124] sm:$0x8]  ;;  %v8624_v57 = vshrl.u32 %v6951_v2, 16 }
 0x240   : > { %v4066_v59 = vunpack.c.l.b16 %v3906_v31  ;;  %v1212_v17 = vpack.c.b16 %v1188_v20, %v1187_v6  ;;  %v5571_v31 = vrot.slane %v998_v36, 11  ;;  %v1008_v6 = vor.u32 %v8625_v3, %v1005_v9  ;;  %v6227_v20 = vld [vmem:[%s8468_s3 + $0x1d8] sm:$0xff]  ;;  %v6225_v9 = vld [vmem:[%s8468_s3 + $0x1c8] sm:$0xff]  ;;  %v3683_v3 = vld [vmem:[#allocation2 + $0x144] sm:$0xf] }
 0x241   : > { %v1014_v63 = vrot.slane %v8624_v57, 7  ;;  %4429 = vmatpush.bf16.msra.mxu1 %v6227_v20  ;;  %v3927_v36 = vor.u32 %v3925_v39, %v3924_v42  ;;  %v3929_v57 = vrot.slane %v3924_v42, 4  ;;  %v3936_v44 = vor.u32 %v3934_v49, %v3933_v60  ;;  %v797_v20 = vld [vmem:[#allocation2 + $0xdc] sm:$0x8] }
 0x242   : > { %v2346_v0 = vpop.f32.mrf.mxu3  ;;  %v4089_v22 = vpack.c.b16 %v4067_v33, %v4066_v59  ;;  %v8626_v59 = vshll.u32 %v6951_v2, 16  ;;  %v6226_v2 = vld [vmem:[%s8468_s3 + $0x1d0] sm:$0xff]  ;;  %v3953_v39 = vshrl.u32 %v3683_v3, 16 }
 0x243   : > { %3475 = vmatmul.bf16.gmra.mxu2 %v6158_v41  ;;  %v7650_v41 = vpop.f32.mrf.mxu0 }
 0x244   : > { %v1017_v33 = vor.u32 %v8626_v59, %v1014_v63 }
 0x245   : > { %4430 = vmatpush.bf16.msra.mxu1 %v6226_v2 }
 0x246   : > { %v2433_v24 = vpop.f32.mrf.mxu2  ;;  %v7646_v62 = vpop.f32.mrf.mxu1 }
 0x247   : > { %v7642_v25 = vadd.f32 %v2433_v24, %v2344_v8  ;;  %8623 = vst [vmem:[#allocation36_spill] sm:$0xff] %v7646_v62  ;;  %2582 = vmatmul.bf16.gmra.mxu3 %v1212_v17  ;;  %v3917_v8 = vshrl.u32 %v3678_v52, 16 }
 0x249   : > { %2701 = vmatmul.bf16.gmra.mxu1 %v6133_v14  ;;  %v5925_v52 = vrot.slane %v3917_v8, 11  ;;  %v1009_v14 = vsel %vm6862_vm5, %v5571_v31, %v1008_v6  ;;  %v3937_v8 = vsel %vm6862_vm5, %v3929_v57, %v3936_v44  ;;  %v3682_v31 = vld [vmem:[#allocation2 + $0x140] sm:$0xf]  ;;  %v3681_v44 = vld [vmem:[#allocation2 + $0x13c] sm:$0x8] }
 0x24a   : > { %v2349_v24 = vpop.f32.mrf.mxu3  ;;  %v1189_v42 = vunpack.c.l.b16 %v1009_v14  ;;  %v4069_v59 = vunpack.c.l.b16 %v3937_v8  ;;  %4431 = vmatpush.bf16.msra.mxu1 %v6225_v9 }
 0x24b   : > { %v3928_v63 = vsel %vm6862_vm5, %v5925_v52, %v3927_v36  ;;  %v1020_v52 = vshrl.u32 %v797_v20, 16  ;;  %v8628_v36 = vshrl.u32 %v6993_v29, 16  ;;  %v2364_v20 = vadd.f32 %v7443_v34, %v7066_v47 }
 0x24c   : > { %4389 = vmatmul.bf16.gmra.mxu0 %v4089_v22  ;;  %v1018_v22 = vsel %vm6862_vm5, %v1010_v56, %v1017_v33  ;;  %v4068_v56 = vunpack.c.l.b16 %v3928_v63  ;;  %v3944_v33 = vshrl.u32 %v3682_v31, 16  ;;  %v6134_v63 = vld [vmem:[#allocation2 + $0x158] sm:$0xff] }
 0x24d   : > { %v1190_v60 = vunpack.c.l.b16 %v1018_v22  ;;  %v1027_v57 = vrot.slane %v8628_v36, 7  ;;  %v6224_v22 = vld [vmem:[%s8468_s3 + $0x1c0] sm:$0xff]  ;;  %v5572_v36 = vrot.slane %v1020_v52, 11 }
 0x24e   : > { %v2435_v51 = vpop.f32.mrf.mxu2  ;;  %v7671_v46 = vpop.f32.mrf.mxu1  ;;  %v4090_v8 = vpack.c.b16 %v4069_v59, %v4068_v56  ;;  %4432 = vmatpush.bf16.msra.mxu1 %v6224_v22  ;;  %v8632_v56 = vshll.u32 %v6996_v53, 16 }
 0x24f   : > { %v7659_v17 = vadd.f32 %v2435_v51, %v2346_v0  ;;  %v6195_v0 = vld [vmem:[%s8468_s3 + $0x158] sm:$0xff]  ;;  %8627 = vst [vmem:[#allocation37_spill] sm:$0xff] %v7671_v46  ;;  %v7680_v51 = vpop.f32.mrf.mxu0  ;;  %v1213_v49 = vpack.c.b16 %v1190_v60, %v1189_v42  ;;  %v3939_v42 = vshrl.u32 %v3681_v44, 16  ;;  %v3946_v60 = vrot.slane %v3944_v33, 7 }
 0x250   : > { %3530 = vmatpush.bf16.msra.mxu3 %v6195_v0  ;;  %v6235_v0 = vld [vmem:[%s8468_s3 + $0x218] sm:$0xff]  ;;  %v8631_v46 = vshll.u32 %v6993_v29, 16  ;;  %v1032_v7 = vrot.slane %v1027_v57, 4  ;;  %v3956_v44 = vshll.u32 %v3683_v3, 16 }
 0x251   : > { %5110 = vmatpush.bf16.msra.mxu2 %v6235_v0  ;;  %v3951_v47 = vrot.slane %v3946_v60, 4 }
 0x252   : > { %v2351_v6 = vpop.f32.mrf.mxu3  ;;  %v1030_v62 = vor.u32 %v8631_v46, %v1027_v57  ;;  %v6160_v46 = vld [vmem:[#allocation2 + $0xe0] sm:$0xff]  ;;  %v2366_v57 = vadd.f32 %v7455_v40, %v7096_v23  ;;  %v8634_v23 = vshrl.u32 %v7060_v27, 16 }
 0x253   : > { %3480 = vmatmul.bf16.gmra.mxu2 %v6159_v50  ;;  %v8629_v50 = vshrl.u32 %v6996_v53, 16 }
 0x254   : > { %v1031_v29 = vsel %vm6862_vm5, %v5572_v36, %v1030_v62  ;;  %v800_v62 = vld [vmem:[#allocation2 + $0xf4] sm:$0x8]  ;;  %v1049_v40 = vrot.slane %v8634_v23, 7  ;;  %v8637_v23 = vshll.u32 %v7062_v18, 16 }
 0x255   : > { %v1036_v9 = vrot.slane %v8629_v50, 7 }
 0x256   : > { %v2438_v2 = vpop.f32.mrf.mxu2 }
 0x257   : > { %v7684_v14 = vadd.f32 %v2438_v2, %v2349_v24  ;;  %2587 = vmatmul.bf16.gmra.mxu3 %v1213_v49  ;;  %v3955_v24 = vrot.slane %v3953_v39, 7  ;;  %v7696_v2 = vpop.f32.mrf.mxu1  ;;  %v1039_v59 = vor.u32 %v8632_v56, %v1036_v9  ;;  %v3947_v49 = vshll.u32 %v3682_v31, 16  ;;  %v7704_v0 = vpop.f32.mrf.mxu0 }
 0x258   : > { %8630 = vst [vmem:[#allocation38_spill] sm:$0xff] %v7696_v2  ;;  %v5926_v39 = vrot.slane %v3939_v42, 11  ;;  %v1191_v9 = vunpack.c.l.b16 %v1031_v29  ;;  %v3686_v42 = vld [vmem:[#allocation2 + $0x15c] sm:$0xf] }
 0x259   : > { %2706 = vmatmul.bf16.gmra.mxu1 %v6134_v63  ;;  %v3949_v22 = vor.u32 %v3947_v49, %v3946_v60  ;;  %v3958_v34 = vor.u32 %v3956_v44, %v3955_v24  ;;  %v1040_v53 = vsel %vm6862_vm5, %v1032_v7, %v1039_v59  ;;  %v3975_v56 = vshrl.u32 %v3686_v42, 16 }
 0x25a   : > { %v2548_v50 = vpop.f32.mrf.mxu3  ;;  %v1042_v44 = vshrl.u32 %v800_v62, 16  ;;  %v1054_v62 = vrot.slane %v1049_v40, 4 }
 0x25b   : > { %v7702_v33 = vadd.f32 %v2548_v50, %v2364_v20  ;;  %v3950_v31 = vsel %vm6862_vm5, %v5926_v39, %v3949_v22  ;;  %v3959_v3 = vsel %vm6862_vm5, %v3951_v47, %v3958_v34  ;;  %v3684_v39 = vld [vmem:[#allocation2 + $0x154] sm:$0x8]  ;;  %v8635_v22 = vshrl.u32 %v7062_v18, 16 }
 0x25c   : > { %4394 = vmatmul.bf16.gmra.mxu0 %v4090_v8  ;;  %v1192_v8 = vunpack.c.l.b16 %v1040_v53  ;;  %v4070_v20 = vunpack.c.l.b16 %v3950_v31  ;;  %v4071_v36 = vunpack.c.l.b16 %v3959_v3  ;;  %v3961_v53 = vshrl.u32 %v3684_v39, 16  ;;  %v6194_v18 = vld [vmem:[%s8468_s3 + $0x150] sm:$0xff] }
 0x25d   : > { %v1058_v47 = vrot.slane %v8635_v22, 7  ;;  %v3977_v31 = vrot.slane %v3975_v56, 7  ;;  %v2369_v3 = vadd.f32 %v7474_v32, %v7118_v28  ;;  %3531 = vmatpush.bf16.msra.mxu3 %v6194_v18 }
 0x25e   : > { %v2440_v63 = vpop.f32.mrf.mxu2  ;;  %v1214_v59 = vpack.c.b16 %v1192_v8, %v1191_v9  ;;  %v4091_v29 = vpack.c.b16 %v4071_v36, %v4070_v20  ;;  %v8636_v9 = vshll.u32 %v7060_v27, 16  ;;  %v5927_v36 = vrot.slane %v3961_v53, 11  ;;  %v3688_v53 = vld [vmem:[#allocation2 + $0x170] sm:$0xf] }
 0x25f   : > { %v7706_v52 = vadd.f32 %v2440_v63, %v2351_v6  ;;  %v3685_v6 = vld [vmem:[#allocation2 + $0x158] sm:$0xf]  ;;  %v7718_v24 = vpop.f32.mrf.mxu1  ;;  %v7728_v34 = vpop.f32.mrf.mxu0  ;;  %v6135_v63 = vld [vmem:[#allocation2 + $0x170] sm:$0xff]  ;;  %v1061_v22 = vor.u32 %v8637_v23, %v1058_v47 }
 0x260   : > { %8633 = vst [vmem:[#allocation39_spill] sm:$0xff] %v7718_v24  ;;  %v3966_v50 = vshrl.u32 %v3685_v6, 16  ;;  %v1052_v8 = vor.u32 %v8636_v9, %v1049_v40  ;;  %v3969_v24 = vshll.u32 %v3685_v6, 16  ;;  %v6161_v6 = vld [vmem:[#allocation2 + $0xf8] sm:$0xff]  ;;  %v2371_v40 = vadd.f32 %v7496_v48, %v7150_v38 }
 0x261   : > { %v8639_v38 = vshrl.u32 %v7111_v4, 16 }
 0x262   : > { %v2550_v60 = vpop.f32.mrf.mxu3 }
 0x263   : > { %3485 = vmatmul.bf16.gmra.mxu2 %v6160_v46  ;;  %v7720_v7 = vadd.f32 %v2550_v60, %v2366_v57  ;;  %v3968_v46 = vrot.slane %v3966_v50, 7  ;;  %v5573_v57 = vrot.slane %v1042_v44, 11  ;;  %v1062_v44 = vsel %vm6862_vm5, %v1054_v62, %v1061_v22 }
 0x264   : > { %v1071_v48 = vrot.slane %v8639_v38, 7 }
 0x265   : > { %v3971_v50 = vor.u32 %v3969_v24, %v3968_v46  ;;  %v3973_v56 = vrot.slane %v3968_v46, 4  ;;  %v1053_v27 = vsel %vm6862_vm5, %v5573_v57, %v1052_v8  ;;  %v3689_v46 = vld [vmem:[#allocation2 + $0x174] sm:$0xf] }
 0x266   : > { %v7722_v49 = vpop.f32.mrf.mxu2  ;;  %v3997_v62 = vshrl.u32 %v3689_v46, 16 }
 0x267   : > { %2592 = vmatmul.bf16.gmra.mxu3 %v1214_v59  ;;  %v3978_v59 = vshll.u32 %v3686_v42, 16  ;;  %v7738_v28 = vpop.f32.mrf.mxu1  ;;  %v3972_v42 = vsel %vm6862_vm5, %v5927_v36, %v3971_v50  ;;  %v7755_v47 = vpop.f32.mrf.mxu0  ;;  %v3687_v36 = vld [vmem:[#allocation2 + $0x16c] sm:$0x8]  ;;  %v6234_v50 = vld [vmem:[%s8468_s3 + $0x210] sm:$0xff] }
 0x268   : > { %8638 = vst [vmem:[#allocation40_spill] sm:$0xff] %v7738_v28  ;;  %v4072_v9 = vunpack.c.l.b16 %v3972_v42  ;;  %5111 = vmatpush.bf16.msra.mxu2 %v6234_v50 }
 0x269   : > { %2711 = vmatmul.bf16.gmra.mxu1 %v6135_v63  ;;  %v3980_v39 = vor.u32 %v3978_v59, %v3977_v31  ;;  %v1193_v63 = vunpack.c.l.b16 %v1053_v27 }
 0x26a   : > { %v2553_v60 = vpop.f32.mrf.mxu3 }
 0x26b   : > { %v7736_v20 = vadd.f32 %v2553_v60, %v2369_v3  ;;  %v3981_v24 = vsel %vm6862_vm5, %v3973_v56, %v3980_v39  ;;  %v803_v3 = vld [vmem:[#allocation2 + $0x10c] sm:$0x8]  ;;  %v3988_v60 = vshrl.u32 %v3688_v53, 16  ;;  %v8640_v56 = vshrl.u32 %v7113_v13, 16 }
 0x26c   : > { %4399 = vmatmul.bf16.gmra.mxu0 %v4091_v29  ;;  %v1194_v29 = vunpack.c.l.b16 %v1062_v44  ;;  %v4073_v8 = vunpack.c.l.b16 %v3981_v24  ;;  %v1064_v59 = vshrl.u32 %v803_v3, 16  ;;  %v6200_v44 = vld [vmem:[#allocation2 + $0x38] sm:$0xff]  ;;  %v3999_v24 = vrot.slane %v3997_v62, 7 }
 0x26d   : > { %v1080_v39 = vrot.slane %v8640_v56, 7  ;;  %v3990_v42 = vrot.slane %v3988_v60, 7  ;;  %v1076_v56 = vrot.slane %v1071_v48, 4 }
 0x26e   : > { %v7740_v32 = vpop.f32.mrf.mxu2  ;;  %v1215_v23 = vpack.c.b16 %v1194_v29, %v1193_v63  ;;  %v4092_v18 = vpack.c.b16 %v4073_v8, %v4072_v9  ;;  %v5574_v29 = vrot.slane %v1064_v59, 11  ;;  %v4000_v9 = vshll.u32 %v3689_v46, 16 }
 0x26f   : > { %v7768_v27 = vpop.f32.mrf.mxu1  ;;  %v7776_v8 = vpop.f32.mrf.mxu0 }
 0x270   : > { %8641 = vst [vmem:[#allocation41_spill] sm:$0xff] %v7768_v27  ;;  %v8644_v27 = vshll.u32 %v7113_v13, 16  ;;  %v4002_v50 = vor.u32 %v4000_v9, %v3999_v24  ;;  %v6162_v13 = vld [vmem:[#allocation2 + $0x110] sm:$0xff]  ;;  %v3692_v24 = vld [vmem:[#allocation2 + $0x18c] sm:$0xf] }
 0x272   : > { %v2555_v31 = vpop.f32.mrf.mxu3  ;;  %v1083_v28 = vor.u32 %v8644_v27, %v1080_v39 }
 0x273   : > { %3490 = vmatmul.bf16.gmra.mxu2 %v6161_v6  ;;  %v7757_v57 = vadd.f32 %v2555_v31, %v2371_v40  ;;  %v3983_v6 = vshrl.u32 %v3687_v36, 16  ;;  %v8642_v40 = vld [vmem:[#allocation7_spill] sm:$0xff]  ;;  %v8643_v31 = vshll.u32 %v7111_v4, 16 }
 0x274   : > { %v2374_v63 = vadd.f32 %v7514_v1, %v8642_v40  ;;  %v3995_v1 = vrot.slane %v3990_v42, 4  ;;  %v1084_v59 = vsel %vm6862_vm5, %v1076_v56, %v1083_v28 }
 0x275   : > { %v1074_v3 = vor.u32 %v8643_v31, %v1071_v48  ;;  %v5928_v62 = vrot.slane %v3983_v6, 11  ;;  %v8646_v48 = vld [vmem:[#allocation8_spill] sm:$0xff]  ;;  %v1196_v6 = vunpack.c.l.b16 %v1084_v59 }
 0x276   : > { %v7759_v22 = vpop.f32.mrf.mxu2  ;;  %v4003_v46 = vsel %vm6862_vm5, %v3995_v1, %v4002_v50  ;;  %v2376_v39 = vadd.f32 %v7530_v26, %v8646_v48  ;;  %v3690_v50 = vld [vmem:[#allocation2 + $0x184] sm:$0x8]  ;;  %v6201_v48 = vld [vmem:[#allocation2 + $0x50] sm:$0xff] }
 0x277   : > { %2597 = vmatmul.bf16.gmra.mxu3 %v1215_v23  ;;  %v3991_v23 = vshll.u32 %v3688_v53, 16  ;;  %v1075_v4 = vsel %vm6862_vm5, %v5574_v29, %v1074_v3  ;;  %v7792_v27 = vpop.f32.mrf.mxu1  ;;  %v4075_v31 = vunpack.c.l.b16 %v4003_v46  ;;  %v7796_v56 = vpop.f32.mrf.mxu0 }
 0x278   : > { %8647 = vst [vmem:[#allocation8_spill] sm:$0xff] %v7792_v27  ;;  %v8654_v27 = vld [vmem:[#allocation11_spill] sm:$0xff] }
 0x279   : > { %4433 = vmatmul.bf16.vlgmr.msra.gmra.mxu1 %v6200_v44  ;;  %v3993_v36 = vor.u32 %v3991_v23, %v3990_v42  ;;  %v3691_v42 = vld [vmem:[#allocation2 + $0x188] sm:$0xf]  ;;  %v2379_v2 = vadd.f32 %v7559_v19, %v8654_v27 }
 0x27a   : > { %v2558_v38 = vpop.f32.mrf.mxu3  ;;  %v4010_v3 = vshrl.u32 %v3691_v42, 16 }
 0x27b   : > { %v7778_v60 = vadd.f32 %v2558_v38, %v2374_v63  ;;  %v3994_v53 = vsel %vm6862_vm5, %v5928_v62, %v3993_v36  ;;  %v806_v63 = vld [vmem:[#allocation2 + $0x124] sm:$0x8]  ;;  %v4019_v38 = vshrl.u32 %v3692_v24, 16 }
 0x27c   : > { %4404 = vmatmul.bf16.gmra.mxu0 %v4092_v18  ;;  %v1195_v18 = vunpack.c.l.b16 %v1075_v4  ;;  %v4074_v29 = vunpack.c.l.b16 %v3994_v53  ;;  %v1086_v26 = vshrl.u32 %v806_v63, 16  ;;  %v8650_v62 = vld [vmem:[#allocation5_spill] sm:$0xff]  ;;  %v8652_v4 = vld [vmem:[#allocation6_spill] sm:$0xff]  ;;  %v4005_v53 = vshrl.u32 %v3690_v50, 16 }
 0x27d   : > { %8645 = vst [vmem:[#allocation7_spill] sm:$0xff] %v7778_v60  ;;  %v8651_v36 = vshrl.u32 %v8650_v62, 16  ;;  %v8653_v59 = vshrl.u32 %v8652_v4, 16  ;;  %v4012_v46 = vrot.slane %v4010_v3, 7  ;;  %v4013_v60 = vshll.u32 %v3691_v42, 16  ;;  %v6193_v42 = vld [vmem:[%s8468_s3 + $0x148] sm:$0xff] }
 0x27e   : > { %v7780_v44 = vpop.f32.mrf.mxu2  ;;  %v1216_v23 = vpack.c.b16 %v1196_v6, %v1195_v18  ;;  %v5575_v18 = vrot.slane %v1086_v26, 11  ;;  %v8655_v6 = vshll.u32 %v8650_v62, 16  ;;  %v5929_v3 = vrot.slane %v4005_v53, 11  ;;  %3532 = vmatpush.bf16.msra.mxu3 %v6193_v42  ;;  %v8664_v42 = vld [vmem:[#allocation13_spill] sm:$0xff] }
 0x27f   : > { %v1093_v1 = vrot.slane %v8651_v36, 7  ;;  %v4017_v19 = vrot.slane %v4012_v46, 4 }
 0x281   : > { %v1096_v63 = vor.u32 %v8655_v6, %v1093_v1 }
 0x282   : > { %v2560_v40 = vpop.f32.mrf.mxu3 }
 0x283   : > { %3495 = vmatmul.bf16.gmra.mxu2 %v6162_v13  ;;  %v7794_v28 = vadd.f32 %v2560_v40, %v2376_v39  ;;  %v1102_v13 = vrot.slane %v8653_v59, 7  ;;  %v4093_v39 = vpack.c.b16 %v4075_v31, %v4074_v29  ;;  %v4021_v40 = vrot.slane %v4019_v38, 7  ;;  %v7810_v29 = vpop.f32.mrf.mxu1 }
 0x284   : > { %8657 = vst [vmem:[#allocation5_spill] sm:$0xff] %v7810_v29  ;;  %v4015_v38 = vor.u32 %v4013_v60, %v4012_v46  ;;  %v1097_v26 = vsel %vm6862_vm5, %v5575_v18, %v1096_v63 }
 0x285   : > { %8648 = vst [vmem:[#allocation42_spill] sm:$0xff] %v7794_v28  ;;  %v1098_v28 = vrot.slane %v1093_v1, 4  ;;  %v8658_v1 = vld [vmem:[#allocation12_spill] sm:$0xff] }
 0x286   : > { %v7798_v9 = vpop.f32.mrf.mxu2  ;;  %v4016_v60 = vsel %vm6862_vm5, %v5929_v3, %v4015_v38  ;;  %v8662_v38 = vld [vmem:[#allocation10_spill] sm:$0xff] }
 0x287   : > { %8649 = vst [vmem:[#allocation43_spill] sm:$0xff] %v7798_v9  ;;  %2602 = vmatmul.bf16.gmra.mxu3 %v1216_v23  ;;  %v8656_v9 = vshll.u32 %v8652_v4, 16  ;;  %v4022_v23 = vshll.u32 %v3692_v24, 16  ;;  %v7823_v24 = vpop.f32.mrf.mxu0  ;;  %v2381_v4 = vadd.f32 %v7577_v35, %v8658_v1  ;;  %v4076_v53 = vunpack.c.l.b16 %v4016_v60  ;;  %v8660_v35 = vld [vmem:[#allocation9_spill] sm:$0xff] }
 0x289   : > { %4438 = vmatmul.bf16.gmra.mxu1 %v6201_v48  ;;  %v1105_v59 = vor.u32 %v8656_v9, %v1102_v13  ;;  %v4024_v27 = vor.u32 %v4022_v23, %v4021_v40  ;;  %v1197_v13 = vunpack.c.l.b16 %v1097_v26  ;;  %v809_v40 = vld [vmem:[#allocation2 + $0x13c] sm:$0x8]  ;;  %v8661_v23 = vshrl.u32 %v8660_v35, 16  ;;  %v6202_v26 = vld [vmem:[#allocation2 + $0x68] sm:$0xff] }
 0x28a   : > { %v2563_v36 = vpop.f32.mrf.mxu3 }
 0x28b   : > { %v7812_v31 = vadd.f32 %v2563_v36, %v2379_v2  ;;  %v1106_v62 = vsel %vm6862_vm5, %v1098_v28, %v1105_v59  ;;  %v6163_v2 = vld [vmem:[#allocation2 + $0x128] sm:$0xff]  ;;  %v4025_v9 = vsel %vm6862_vm5, %v4017_v19, %v4024_v27  ;;  %v7833_v18 = vpop.f32.mrf.mxu1  ;;  %v1108_v59 = vshrl.u32 %v809_v40, 16 }
 0x28c   : > { %4409 = vmatmul.bf16.gmra.mxu0 %v4093_v39  ;;  %v1198_v48 = vunpack.c.l.b16 %v1106_v62  ;;  %v4077_v46 = vunpack.c.l.b16 %v4025_v9  ;;  %8659 = vst [vmem:[#allocation6_spill] sm:$0xff] %v7833_v18  ;;  %v6233_v36 = vld [vmem:[%s8468_s3 + $0x208] sm:$0xff]  ;;  %v1115_v3 = vrot.slane %v8661_v23, 7  ;;  %v8663_v19 = vshrl.u32 %v8662_v38, 16 }
 0x28d   : > { %5112 = vmatpush.bf16.msra.mxu2 %v6233_v36  ;;  %v5576_v1 = vrot.slane %v1108_v59, 11  ;;  %v6164_v36 = vld [vmem:[#allocation2 + $0x140] sm:$0xff]  ;;  %v2386_v59 = vadd.f32 %v7610_v61, %v7330_v54  ;;  %v8670_v54 = vld [vmem:[#allocation14_spill] sm:$0xff] }
 0x28e   : > { %v7814_v50 = vpop.f32.mrf.mxu2  ;;  %v1217_v6 = vpack.c.b16 %v1198_v48, %v1197_v13  ;;  %v1124_v27 = vrot.slane %v8663_v19, 7  ;;  %v4094_v62 = vpack.c.b16 %v4077_v46, %v4076_v53  ;;  %v1120_v48 = vrot.slane %v1115_v3, 4 }
 0x28f   : > { %v7846_v60 = vpop.f32.mrf.mxu0  ;;  %v2389_v61 = vadd.f32 %v7636_v5, %v8670_v54 }
 0x292   : > { %v2565_v28 = vpop.f32.mrf.mxu3 }
 0x293   : > { %3500 = vmatmul.bf16.gmra.mxu2 %v6163_v2  ;;  %v7831_v39 = vadd.f32 %v2565_v28, %v2381_v4  ;;  %v2384_v2 = vadd.f32 %v7591_v16, %v8664_v42  ;;  %v8665_v4 = vshll.u32 %v8660_v35, 16  ;;  %v8666_v28 = vshll.u32 %v8662_v38, 16 }
 0x295   : > { %v1118_v13 = vor.u32 %v8665_v4, %v1115_v3  ;;  %v1127_v40 = vor.u32 %v8666_v28, %v1124_v27  ;;  %v812_v27 = vld [vmem:[#allocation2 + $0x154] sm:$0x8] }
 0x296   : > { %v7835_v63 = vpop.f32.mrf.mxu2  ;;  %v1130_v42 = vshrl.u32 %v812_v27, 16 }
 0x297   : > { %2607 = vmatmul.bf16.gmra.mxu3 %v1217_v6  ;;  %v1119_v16 = vsel %vm6862_vm5, %v5576_v1, %v1118_v13  ;;  %v1128_v46 = vsel %vm6862_vm5, %v1120_v48, %v1127_v40  ;;  %v7860_v6 = vpop.f32.mrf.mxu1  ;;  %v8669_v1 = vshrl.u32 %v7289_v58, 16  ;;  %v6203_v13 = vld [vmem:[#allocation2 + $0x80] sm:$0xff] }
 0x298   : > { %8667 = vst [vmem:[#allocation11_spill] sm:$0xff] %v7860_v6  ;;  %v1199_v35 = vunpack.c.l.b16 %v1119_v16  ;;  %v1200_v3 = vunpack.c.l.b16 %v1128_v46  ;;  %v5577_v40 = vrot.slane %v1130_v42, 11  ;;  %v8672_v16 = vshll.u32 %v7287_v30, 16 }
 0x299   : > { %4443 = vmatmul.bf16.gmra.mxu1 %v6202_v26  ;;  %v1146_v4 = vrot.slane %v8669_v1, 7 }
 0x29a   : > { %v2568_v9 = vpop.f32.mrf.mxu3  ;;  %v1218_v26 = vpack.c.b16 %v1200_v3, %v1199_v35 }
 0x29b   : > { %v7852_v23 = vadd.f32 %v2568_v9, %v2384_v2  ;;  %v8668_v2 = vshrl.u32 %v7287_v30, 16  ;;  %v6165_v30 = vld [vmem:[#allocation2 + $0x158] sm:$0xff] }
 0x29c   : > { %4414 = vmatmul.bf16.gmra.mxu0 %v4094_v62 }
 0x29d   : > { %v1137_v9 = vrot.slane %v8668_v2, 7 }
 0x29e   : > { %v7854_v53 = vpop.f32.mrf.mxu2 }
 0x29f   : > { %v7874_v48 = vpop.f32.mrf.mxu1  ;;  %v1140_v46 = vor.u32 %v8672_v16, %v1137_v9  ;;  %v8676_v16 = vld [vmem:[#allocation15_spill] sm:$0xff] }
 0x2a0   : > { %8671 = vst [vmem:[#allocation12_spill] sm:$0xff] %v7874_v48 }
 0x2a1   : > { %v1141_v27 = vsel %vm6862_vm5, %v5577_v40, %v1140_v46  ;;  %v8677_v46 = vshrl.u32 %v8676_v16, 16 }
 0x2a2   : > { %v2570_v38 = vpop.f32.mrf.mxu3  ;;  %v1201_v42 = vunpack.c.l.b16 %v1141_v27  ;;  %v8679_v27 = vld [vmem:[#allocation16_spill] sm:$0xff] }
 0x2a3   : > { %3505 = vmatmul.bf16.gmra.mxu2 %v6164_v36  ;;  %v7864_v19 = vadd.f32 %v2570_v38, %v2386_v59  ;;  %v1142_v36 = vrot.slane %v1137_v9, 4  ;;  %v8673_v59 = vshll.u32 %v7289_v58, 16  ;;  %v2391_v58 = vadd.f32 %v7650_v41, %v7380_v11 }
 0x2a4   : > { %v1159_v11 = vrot.slane %v8677_v46, 7  ;;  %v8678_v41 = vshrl.u32 %v7360_v55, 16 }
 0x2a5   : > { %v1149_v35 = vor.u32 %v8673_v59, %v1146_v4  ;;  %v6204_v59 = vld [vmem:[#allocation2 + $0x98] sm:$0xff] }
 0x2a6   : > { %v7866_v62 = vpop.f32.mrf.mxu2 }
 0x2a7   : > { %2612 = vmatmul.bf16.gmra.mxu3 %v1218_v26  ;;  %v1150_v5 = vsel %vm6862_vm5, %v1142_v36, %v1149_v35  ;;  %v6192_v26 = vld [vmem:[%s8468_s3 + $0x140] sm:$0xff]  ;;  %v7893_v1 = vpop.f32.mrf.mxu1  ;;  %v1168_v36 = vrot.slane %v8678_v41, 7 }
 0x2a8   : > { %3533 = vmatpush.bf16.msra.mxu3 %v6192_v26  ;;  %v1202_v2 = vunpack.c.l.b16 %v1150_v5  ;;  %8674 = vst [vmem:[#allocation9_spill] sm:$0xff] %v7893_v1  ;;  %v2717_v35 = vld [vmem:[#allocation2 + $0x20] sm:$0xf]  ;;  %v2394_v5 = vadd.f32 %v7680_v51, %v8679_v27  ;;  %v2718_v26 = vld [vmem:[#allocation2 + $0x24] sm:$0xf]  ;;  %v2396_v27 = vadd.f32 %v7704_v0, %v7418_v43 }
 0x2a9   : > { %4448 = vmatmul.bf16.gmra.mxu1 %v6203_v13  ;;  %v815_v13 = vld [vmem:[#allocation2 + $0x16c] sm:$0x8]  ;;  %v2766_v41 = vshrl.u32 %v2717_v35, 16  ;;  %v2779_v51 = vshrl.u32 %v2718_v26, 16 }
 0x2aa   : > { %v2573_v28 = vpop.f32.mrf.mxu3  ;;  %v1219_v54 = vpack.c.b16 %v1202_v2, %v1201_v42  ;;  %v1152_v40 = vshrl.u32 %v815_v13, 16  ;;  %v8680_v42 = vshll.u32 %v8676_v16, 16  ;;  %v8681_v13 = vshll.u32 %v7360_v55, 16  ;;  %v6166_v55 = vld [vmem:[#allocation2 + $0x170] sm:$0xff] }
 0x2ab   : > { %v7880_v3 = vadd.f32 %v2573_v28, %v2389_v61  ;;  %v6232_v28 = vld [vmem:[%s8468_s3 + $0x200] sm:$0xff] }
 0x2ac   : > { %5113 = vmatpush.bf16.msra.mxu2 %v6232_v28  ;;  %v1162_v2 = vor.u32 %v8680_v42, %v1159_v11  ;;  %v1171_v46 = vor.u32 %v8681_v13, %v1168_v36  ;;  %v2775_v28 = vshll.u32 %v2718_v26, 16  ;;  %v2719_v13 = vld [vmem:[#allocation2 + $0x28] sm:$0x1] }
 0x2ae   : > { %v7882_v38 = vpop.f32.mrf.mxu2  ;;  %v2777_v36 = vrot.slane %v2775_v28, 5  ;;  %v6205_v28 = vld [vmem:[#allocation2 + $0xb0] sm:$0xff] }
 0x2af   : > { %v7914_v48 = vpop.f32.mrf.mxu1 }
 0x2b0   : > { %8683 = vst [vmem:[#allocation14_spill] sm:$0xff] %v7914_v48 }
 0x2b2   : > { %v2575_v9 = vpop.f32.mrf.mxu3 }
 0x2b3   : > { %3510 = vmatmul.bf16.gmra.mxu2 %v6165_v30  ;;  %v7895_v4 = vadd.f32 %v2575_v9, %v2391_v58  ;;  %v5578_v58 = vrot.slane %v1152_v40, 11  ;;  %v1164_v9 = vrot.slane %v1159_v11, 4  ;;  %v2768_v11 = vrot.slane %v2766_v41, 4  ;;  %v4547_v41 = vld [vmem:[#allocation2 + $0x3c] sm:$0xf] }
 0x2b5   : > { %8675 = vst [vmem:[#allocation10_spill] sm:$0xff] %v7895_v4  ;;  %v1163_v40 = vsel %vm6862_vm5, %v5578_v58, %v1162_v2  ;;  %v1172_v16 = vsel %vm6862_vm5, %v1164_v9, %v1171_v46  ;;  %v4546_v58 = vld [vmem:[#allocation2 + $0x38] sm:$0xf]  ;;  %v2785_v46 = vshll.u32 %v2719_v13, 16 }
 0x2b6   : > { %v7897_v61 = vpop.f32.mrf.mxu2  ;;  %v4595_v0 = vshrl.u32 %v4546_v58, 16 }
 0x2b7   : > { %2617 = vmatmul.bf16.gmra.mxu3 %v1219_v54  ;;  %v2769_v54 = vshll.u32 %v2717_v35, 16  ;;  %v1203_v35 = vunpack.c.l.b16 %v1163_v40  ;;  %v4604_v40 = vshll.u32 %v4547_v41, 16 }
 0x2b8   : > { %v4597_v13 = vrot.slane %v4595_v0, 4 }
 0x2b9   : > { %4453 = vmatmul.bf16.gmra.mxu1 %v6204_v59  ;;  %v2771_v59 = vrot.slane %v2769_v54, 5  ;;  %v7928_v54 = vpop.f32.mrf.mxu1 }
 0x2ba   : > { %v2578_v30 = vpop.f32.mrf.mxu3  ;;  %8687 = vst [vmem:[#allocation45_spill] sm:$0xff] %v7928_v54 }
 0x2bb   : > { %v7912_v1 = vadd.f32 %v2578_v30, %v2394_v5  ;;  %v1204_v5 = vunpack.c.l.b16 %v1172_v16  ;;  %v2781_v30 = vrot.slane %v2779_v51, 4  ;;  %v2772_v48 = vor.u32 %v2771_v59, %v2768_v11  ;;  %v2720_v11 = vld [vmem:[#allocation2 + $0x38] sm:$0xf] }
 0x2bc   : > { %v4598_v51 = vshll.u32 %v4546_v58, 16  ;;  %v4608_v16 = vshrl.u32 %v4547_v41, 16  ;;  %v2790_v29 = vshrl.u32 %v2720_v11, 16  ;;  %v2793_v41 = vshll.u32 %v2720_v11, 16 }
 0x2bd   : > { %8682 = vst [vmem:[#allocation13_spill] sm:$0xff] %v7912_v1  ;;  %v1220_v2 = vpack.c.b16 %v1204_v5, %v1203_v35  ;;  %v2782_v9 = vor.u32 %v2781_v30, %v2777_v36  ;;  %v2773_v43 = vrot.slane %v2772_v48, 4  ;;  %v2721_v35 = vld [vmem:[#allocation2 + $0x3c] sm:$0xf] }
 0x2be   : > { %v7916_v6 = vpop.f32.mrf.mxu2  ;;  %v4600_v54 = vrot.slane %v4598_v51, 5  ;;  %v4610_v48 = vrot.slane %v4608_v16, 4  ;;  %v2803_v10 = vshrl.u32 %v2721_v35, 16  ;;  %v2792_v0 = vrot.slane %v2790_v29, 4  ;;  %v4550_v29 = vld [vmem:[#allocation2 + $0x54] sm:$0xf] }
 0x2bf   : > { %8684 = vst [vmem:[#allocation15_spill] sm:$0xff] %v7916_v6  ;;  %v2795_v51 = vrot.slane %v2793_v41, 5  ;;  %v6206_v41 = vld [vmem:[#allocation2 + $0xc8] sm:$0xff] }
 0x2c0   : > { %v2805_v16 = vrot.slane %v2803_v10, 4 }
 0x2c2   : > { %v2580_v42 = vpop.f32.mrf.mxu3 }
 0x2c3   : > { %3515 = vmatmul.bf16.gmra.mxu2 %v6166_v55  ;;  %v7924_v26 = vadd.f32 %v2580_v42, %v2396_v27  ;;  %v2783_v55 = vrot.slane %v2782_v9, 4  ;;  %v2787_v27 = vrot.slane %v2785_v46, 5  ;;  %v2778_v42 = vsel %vm6700_vm2, %v2773_v43, %v2777_v36  ;;  %v4548_v46 = vld [vmem:[#allocation2 + $0x40] sm:$0x1]  ;;  %v7939_v43 = vpop.f32.mrf.mxu1 }
 0x2c4   : > { %v4614_v36 = vshll.u32 %v4548_v46, 16  ;;  %8691 = vst [vmem:[#allocation47_spill] sm:$0xff] %v7939_v43 }
 0x2c5   : > { %8685 = vst [vmem:[#allocation16_spill] sm:$0xff] %v7924_v26  ;;  %v2788_v9 = vsel %vm6700_vm2, %v2783_v55, %v2787_v27  ;;  %v3245_v26 = vunpack.c.l.b16 %v2778_v42  ;;  %v4549_v42 = vld [vmem:[#allocation2 + $0x50] sm:$0xf] }
 0x2c6   : > { %v7926_v18 = vpop.f32.mrf.mxu2  ;;  %v4619_v10 = vshrl.u32 %v4549_v42, 16 }
 0x2c7   : > { %8686 = vst [vmem:[#allocation44_spill] sm:$0xff] %v7926_v18  ;;  %2622 = vmatmul.bf16.gmra.mxu3 %v1220_v2  ;;  %v4606_v2 = vrot.slane %v4604_v40, 5  ;;  %v2722_v18 = vld [vmem:[#allocation2 + $0x40] sm:$0x1] }
 0x2c8   : > { %v2809_v46 = vshll.u32 %v2722_v18, 16 }
 0x2c9   : > { %4458 = vmatmul.bf16.gmra.mxu1 %v6205_v28  ;;  %v2799_v28 = vshll.u32 %v2721_v35, 16  ;;  %v4611_v1 = vor.u32 %v4610_v48, %v4606_v2  ;;  %v4616_v35 = vrot.slane %v4614_v36, 5 }
 0x2ca   : > { %v2583_v59 = vpop.f32.mrf.mxu3 }
 0x2cb   : > { %v7931_v5 = vadd.f32 %v2583_v59, %v7437_v21  ;;  %v6167_v21 = vld [vmem:[#allocation2 + $0x188] sm:$0xff]  ;;  %v3246_v59 = vunpack.c.l.b16 %v2788_v9  ;;  %v2801_v40 = vrot.slane %v2799_v28, 5  ;;  %v4622_v28 = vshll.u32 %v4549_v42, 16  ;;  %v2724_v42 = vld [vmem:[#allocation2 + $0x54] sm:$0xf] }
 0x2cd   : > { %8688 = vst [vmem:[#allocation46_spill] sm:$0xff] %v7931_v5  ;;  %v4601_v5 = vor.u32 %v4600_v54, %v4597_v13  ;;  %v3277_v27 = vpack.c.b16 %v3246_v59, %v3245_v26  ;;  %v4612_v54 = vrot.slane %v4611_v1, 4  ;;  %v2796_v13 = vor.u32 %v2795_v51, %v2792_v0  ;;  %v7950_v0 = vpop.f32.mrf.mxu1 }
 0x2ce   : > { %v7935_v58 = vpop.f32.mrf.mxu2  ;;  %v2806_v48 = vor.u32 %v2805_v16, %v2801_v40  ;;  %v2811_v1 = vrot.slane %v2809_v46, 5  ;;  %8694 = vst [vmem:[#allocation50_spill] sm:$0xff] %v7950_v0  ;;  %v4621_v51 = vrot.slane %v4619_v10, 4  ;;  %v4624_v16 = vrot.slane %v4622_v28, 5 }
 0x2cf   : > { %8690 = vst [vmem:[#allocation3_spill] sm:$0xff] %v7935_v58  ;;  %v4602_v11 = vrot.slane %v4601_v5, 4  ;;  %v4617_v26 = vsel %vm6700_vm2, %v4612_v54, %v4616_v35  ;;  %v2797_v5 = vrot.slane %v2796_v13, 4  ;;  %v4551_v13 = vld [vmem:[#allocation2 + $0x58] sm:$0x1]  ;;  %v2823_v46 = vshll.u32 %v2724_v42, 16 }
 0x2d0   : > { %v2807_v59 = vrot.slane %v2806_v48, 4  ;;  %v2827_v10 = vshrl.u32 %v2724_v42, 16  ;;  %v4625_v28 = vor.u32 %v4624_v16, %v4621_v51  ;;  %v4552_v42 = vld [vmem:[#allocation2 + $0x68] sm:$0xf] }
 0x2d1   : > { %v2802_v35 = vsel %vm6700_vm2, %v2797_v5, %v2801_v40  ;;  %v8697_v5 = vld [vmem:[#allocation17_spill] sm:$0xff] }
 0x2d2   : > { %v2585_v58 = vpop.f32.mrf.mxu3  ;;  %v2812_v54 = vsel %vm6700_vm2, %v2807_v59, %v2811_v1  ;;  %v2829_v40 = vrot.slane %v2827_v10, 4  ;;  %v4626_v59 = vrot.slane %v4625_v28, 4  ;;  %v2725_v1 = vld [vmem:[#allocation2 + $0x58] sm:$0x1] }
 0x2d3   : > { %3520 = vmatmul.bf16.gmra.mxu2 %v6167_v21  ;;  %v7942_v55 = vadd.f32 %v2585_v58, %v7449_v45  ;;  %v4607_v21 = vsel %vm6700_vm2, %v4602_v11, %v4606_v2  ;;  %v4628_v45 = vshll.u32 %v4550_v29, 16  ;;  %v4632_v58 = vshrl.u32 %v4550_v29, 16 }
 0x2d4   : > { %v4994_v2 = vunpack.c.l.b16 %v4607_v21  ;;  %v4995_v11 = vunpack.c.l.b16 %v4617_v26  ;;  %v4638_v21 = vshll.u32 %v4551_v13, 16  ;;  %v3247_v26 = vunpack.c.l.b16 %v2802_v35  ;;  %v6207_v13 = vld [vmem:[#allocation2 + $0xe0] sm:$0xff] }
 0x2d5   : > { %8692 = vst [vmem:[#allocation48_spill] sm:$0xff] %v7942_v55  ;;  %v4630_v29 = vrot.slane %v4628_v45, 5  ;;  %v3248_v45 = vunpack.c.l.b16 %v2812_v54  ;;  %v7964_v51 = vpop.f32.mrf.mxu1  ;;  %v2833_v54 = vshll.u32 %v2725_v1, 16 }
 0x2d6   : > { %v7944_v9 = vpop.f32.mrf.mxu2  ;;  %v4640_v4 = vrot.slane %v4638_v21, 5  ;;  %8699 = vst [vmem:[#allocation53_spill] sm:$0xff] %v7964_v51 }
 0x2d7   : > { %8693 = vst [vmem:[#allocation49_spill] sm:$0xff] %v7944_v9  ;;  %3534 = vmatmul.bf16.vlgmr.msra.gmra.mxu3 %v3277_v27  ;;  %v2723_v27 = vld [vmem:[#allocation2 + $0x50] sm:$0xf]  ;;  %v3278_v16 = vpack.c.b16 %v3248_v45, %v3247_v26 }
 0x2d8   : > { %v2814_v48 = vshrl.u32 %v2723_v27, 16 }
 0x2d9   : > { %4463 = vmatmul.bf16.gmra.mxu1 %v6206_v41  ;;  %v4634_v41 = vrot.slane %v4632_v58, 4 }
 0x2da   : > { %v2588_v36 = vpop.f32.mrf.mxu3 }
 0x2db   : > { %v7953_v18 = vadd.f32 %v2588_v36, %v7461_v12  ;;  %v2817_v12 = vshll.u32 %v2723_v27, 16  ;;  %v5026_v36 = vpack.c.b16 %v4995_v11, %v4994_v2  ;;  %v4635_v0 = vor.u32 %v4634_v41, %v4630_v29  ;;  %v4553_v11 = vld [vmem:[#allocation2 + $0x6c] sm:$0xf] }
 0x2dc   : > { %v4652_v10 = vshll.u32 %v4553_v11, 16  ;;  %v4656_v28 = vshrl.u32 %v4553_v11, 16 }
 0x2dd   : > { %8695 = vst [vmem:[#allocation51_spill] sm:$0xff] %v7953_v18  ;;  %v2816_v18 = vrot.slane %v2814_v48, 4  ;;  %v2819_v55 = vrot.slane %v2817_v12, 5  ;;  %v4636_v27 = vrot.slane %v4635_v0, 4  ;;  %v4631_v48 = vsel %vm6700_vm2, %v4626_v59, %v4630_v29  ;;  %v2727_v59 = vld [vmem:[#allocation2 + $0x6c] sm:$0xf] }
 0x2de   : > { %v7955_v43 = vpop.f32.mrf.mxu2  ;;  %v4643_v12 = vshrl.u32 %v4552_v42, 16  ;;  %v4996_v26 = vunpack.c.l.b16 %v4631_v48  ;;  %v4658_v51 = vrot.slane %v4656_v28, 4  ;;  %v7981_v48 = vpop.f32.mrf.mxu1 }
 0x2df   : > { %8696 = vst [vmem:[#allocation52_spill] sm:$0xff] %v7955_v43  ;;  %v2825_v43 = vrot.slane %v2823_v46, 5  ;;  %v2820_v41 = vor.u32 %v2819_v55, %v2816_v18  ;;  %v4646_v46 = vshll.u32 %v4552_v42, 16  ;;  %v4641_v0 = vsel %vm6700_vm2, %v4636_v27, %v4640_v4  ;;  %v4554_v42 = vld [vmem:[#allocation2 + $0x70] sm:$0x1] }
 0x2e0   : > { %v2835_v18 = vrot.slane %v2833_v54, 5  ;;  %v4645_v1 = vrot.slane %v4643_v12, 4  ;;  %v2851_v54 = vshrl.u32 %v2727_v59, 16  ;;  %8704 = vst [vmem:[#allocation56_spill] sm:$0xff] %v7981_v48 }
 0x2e1   : > { %v2830_v35 = vor.u32 %v2829_v40, %v2825_v43  ;;  %v2821_v45 = vrot.slane %v2820_v41, 4  ;;  %v4648_v29 = vrot.slane %v4646_v46, 5  ;;  %v4662_v46 = vshll.u32 %v4554_v42, 16  ;;  %v4556_v42 = vld [vmem:[#allocation2 + $0x84] sm:$0xf] }
 0x2e2   : > { %v2590_v58 = vpop.f32.mrf.mxu3 }
 0x2e3   : > { %5114 = vmatmul.bf16.vlgmr.msra.gmra.mxu2 %v5026_v36  ;;  %v7962_v9 = vadd.f32 %v2590_v58, %v8697_v5  ;;  %v2726_v36 = vld [vmem:[#allocation2 + $0x68] sm:$0xf]  ;;  %v2831_v55 = vrot.slane %v2830_v35, 4  ;;  %v4997_v5 = vunpack.c.l.b16 %v4641_v0  ;;  %v2847_v35 = vshll.u32 %v2727_v59, 16 }
 0x2e4   : > { %v8701_v58 = vld [vmem:[#allocation18_spill] sm:$0xff]  ;;  %v2838_v4 = vshrl.u32 %v2726_v36, 16  ;;  %v2841_v27 = vshll.u32 %v2726_v36, 16  ;;  %v4649_v0 = vor.u32 %v4648_v29, %v4645_v1  ;;  %v4555_v29 = vld [vmem:[#allocation2 + $0x80] sm:$0xf] }
 0x2e5   : > { %8698 = vst [vmem:[#allocation17_spill] sm:$0xff] %v7962_v9  ;;  %v2836_v41 = vsel %vm6700_vm2, %v2831_v55, %v2835_v18  ;;  %v5027_v12 = vpack.c.b16 %v4997_v5, %v4996_v26  ;;  %v2849_v9 = vrot.slane %v2847_v35, 5  ;;  %v2728_v55 = vld [vmem:[#allocation2 + $0x70] sm:$0x1]  ;;  %v4667_v35 = vshrl.u32 %v4555_v29, 16 }
 0x2e6   : > { %v7966_v2 = vpop.f32.mrf.mxu2  ;;  %v2843_v28 = vrot.slane %v2841_v27, 5  ;;  %v3250_v36 = vunpack.c.l.b16 %v2836_v41  ;;  %v4650_v18 = vrot.slane %v4649_v0, 4  ;;  %v2857_v1 = vshll.u32 %v2728_v55, 16  ;;  %v7992_v41 = vpop.f32.mrf.mxu1 }
 0x2e7   : > { %8700 = vst [vmem:[#allocation54_spill] sm:$0xff] %v7966_v2  ;;  %3539 = vmatmul.bf16.gmra.mxu3 %v3278_v16  ;;  %v4654_v16 = vrot.slane %v4652_v10, 5  ;;  %v2840_v10 = vrot.slane %v2838_v4, 4  ;;  %v4664_v2 = vrot.slane %v4662_v46, 5  ;;  %v6208_v4 = vld [vmem:[#allocation2 + $0xf8] sm:$0xff]  ;;  %v4680_v46 = vshrl.u32 %v4556_v42, 16 }
 0x2e8   : > { %8708 = vst [vmem:[#allocation58_spill] sm:$0xff] %v7992_v41 }
 0x2e9   : > { %4468 = vmatmul.bf16.gmra.mxu1 %v6207_v13  ;;  %v2826_v13 = vsel %vm6700_vm2, %v2821_v45, %v2825_v43  ;;  %v8705_v43 = vld [vmem:[#allocation20_spill] sm:$0xff]  ;;  %v2844_v48 = vor.u32 %v2843_v28, %v2840_v10  ;;  %v4655_v27 = vsel %vm6700_vm2, %v4650_v18, %v4654_v16  ;;  %v2859_v10 = vrot.slane %v2857_v1, 5  ;;  %v8709_v28 = vld [vmem:[#allocation22_spill] sm:$0xff] }
 0x2ea   : > { %v2593_v21 = vpop.f32.mrf.mxu3  ;;  %v4557_v1 = vld [vmem:[#allocation2 + $0x88] sm:$0x1] }
 0x2eb   : > { %v7973_v40 = vadd.f32 %v2593_v21, %v8701_v58  ;;  %v4659_v21 = vor.u32 %v4658_v51, %v4654_v16  ;;  %v3249_v58 = vunpack.c.l.b16 %v2826_v13  ;;  %v2845_v13 = vrot.slane %v2844_v48, 4  ;;  %v2730_v16 = vld [vmem:[#allocation2 + $0x84] sm:$0xf] }
 0x2ed   : > { %8702 = vst [vmem:[#allocation18_spill] sm:$0xff] %v7973_v40  ;;  %v4660_v59 = vrot.slane %v4659_v21, 4  ;;  %v3279_v26 = vpack.c.b16 %v3250_v36, %v3249_v58  ;;  %v4998_v36 = vunpack.c.l.b16 %v4655_v27 }
 0x2ee   : > { %v7975_v11 = vpop.f32.mrf.mxu2 }
 0x2ef   : > { %8703 = vst [vmem:[#allocation55_spill] sm:$0xff] %v7975_v11  ;;  %v2853_v11 = vrot.slane %v2851_v54, 4  ;;  %v4670_v54 = vshll.u32 %v4555_v29, 16 }
 0x2f1   : > { %v2854_v51 = vor.u32 %v2853_v11, %v2849_v9  ;;  %v2729_v11 = vld [vmem:[#allocation2 + $0x80] sm:$0xf] }
 0x2f2   : > { %v2595_v40 = vpop.f32.mrf.mxu3  ;;  %v2862_v48 = vshrl.u32 %v2729_v11, 16  ;;  %v2865_v55 = vshll.u32 %v2729_v11, 16  ;;  %v4686_v11 = vshll.u32 %v4557_v1, 16 }
 0x2f3   : > { %5119 = vmatmul.bf16.gmra.mxu2 %v5027_v12  ;;  %v7984_v45 = vadd.f32 %v2595_v40, %v8705_v43  ;;  %v4665_v40 = vsel %vm6700_vm2, %v4660_v59, %v4664_v2  ;;  %v4676_v12 = vshll.u32 %v4556_v42, 16  ;;  %v2855_v21 = vrot.slane %v2854_v51, 4 }
 0x2f4   : > { %v4999_v43 = vunpack.c.l.b16 %v4665_v40  ;;  %v2850_v2 = vsel %vm6700_vm2, %v2845_v13, %v2849_v9  ;;  %v4669_v59 = vrot.slane %v4667_v35, 4  ;;  %v4682_v42 = vrot.slane %v4680_v46, 4  ;;  %v8713_v46 = vld [vmem:[#allocation24_spill] sm:$0xff] }
 0x2f5   : > { %8706 = vst [vmem:[#allocation20_spill] sm:$0xff] %v7984_v45  ;;  %v4678_v29 = vrot.slane %v4676_v12, 5  ;;  %v2860_v51 = vsel %vm6700_vm2, %v2855_v21, %v2859_v10  ;;  %v2864_v40 = vrot.slane %v2862_v48, 4  ;;  %v2867_v41 = vrot.slane %v2865_v55, 5  ;;  %v8003_v12 = vpop.f32.mrf.mxu1  ;;  %v2731_v21 = vld [vmem:[#allocation2 + $0x88] sm:$0x1] }
 0x2f6   : > { %v7986_v5 = vpop.f32.mrf.mxu2  ;;  %v5028_v27 = vpack.c.b16 %v4999_v43, %v4998_v36  ;;  %8712 = vst [vmem:[#allocation60_spill] sm:$0xff] %v8003_v12  ;;  %v4688_v55 = vrot.slane %v4686_v11, 5  ;;  %v8716_v11 = vld [vmem:[#allocation26_spill] sm:$0xff] }
 0x2f7   : > { %8707 = vst [vmem:[#allocation57_spill] sm:$0xff] %v7986_v5  ;;  %3544 = vmatmul.bf16.gmra.mxu3 %v3279_v26  ;;  %v4672_v26 = vrot.slane %v4670_v54, 5  ;;  %v4683_v13 = vor.u32 %v4682_v42, %v4678_v29  ;;  %v2868_v10 = vor.u32 %v2867_v41, %v2864_v40  ;;  %v4559_v42 = vld [vmem:[#allocation2 + $0x9c] sm:$0xf] }
 0x2f9   : > { %4473 = vmatmul.bf16.gmra.mxu1 %v6208_v4  ;;  %v2871_v4 = vshll.u32 %v2730_v16, 16  ;;  %v4673_v9 = vor.u32 %v4672_v26, %v4669_v59  ;;  %v4684_v48 = vrot.slane %v4683_v13, 4  ;;  %v2881_v26 = vshll.u32 %v2731_v21, 16  ;;  %v2732_v13 = vld [vmem:[#allocation2 + $0x98] sm:$0xf] }
 0x2fa   : > { %v2598_v0 = vpop.f32.mrf.mxu3  ;;  %v2733_v21 = vld [vmem:[#allocation2 + $0x9c] sm:$0xf] }
 0x2fb   : > { %v7995_v58 = vadd.f32 %v2598_v0, %v8709_v28  ;;  %v2875_v0 = vshrl.u32 %v2730_v16, 16  ;;  %v3251_v28 = vunpack.c.l.b16 %v2850_v2  ;;  %v2873_v35 = vrot.slane %v2871_v4, 5  ;;  %v4558_v16 = vld [vmem:[#allocation2 + $0x98] sm:$0xf] }
 0x2fc   : > { %v4674_v2 = vrot.slane %v4673_v9, 4  ;;  %v4691_v1 = vshrl.u32 %v4558_v16, 16  ;;  %v2869_v4 = vrot.slane %v2868_v10, 4  ;;  %v4689_v41 = vsel %vm6700_vm2, %v4684_v48, %v4688_v55  ;;  %v4560_v55 = vld [vmem:[#allocation2 + $0xa0] sm:$0x1] }
 0x2fd   : > { %8710 = vst [vmem:[#allocation22_spill] sm:$0xff] %v7995_v58  ;;  %v3252_v58 = vunpack.c.l.b16 %v2860_v51  ;;  %v2877_v54 = vrot.slane %v2875_v0, 4  ;;  %v6209_v51 = vld [vmem:[#allocation2 + $0x110] sm:$0xff]  ;;  %v4694_v0 = vshll.u32 %v4558_v16, 16  ;;  %v2883_v9 = vrot.slane %v2881_v26, 5 }
 0x2fe   : > { %v7999_v18 = vpop.f32.mrf.mxu2  ;;  %v5001_v16 = vunpack.c.l.b16 %v4689_v41  ;;  %v2886_v26 = vshrl.u32 %v2732_v13, 16 }
 0x2ff   : > { %8711 = vst [vmem:[#allocation59_spill] sm:$0xff] %v7999_v18  ;;  %v3280_v36 = vpack.c.b16 %v3252_v58, %v3251_v28  ;;  %v2878_v59 = vor.u32 %v2877_v54, %v2873_v35  ;;  %v4700_v58 = vshll.u32 %v4559_v42, 16 }
 0x301   : > { %v2879_v40 = vrot.slane %v2878_v59, 4 }
 0x302   : > { %v2600_v45 = vpop.f32.mrf.mxu3 }
 0x303   : > { %5124 = vmatmul.bf16.gmra.mxu2 %v5028_v27  ;;  %v8006_v18 = vadd.f32 %v2600_v45, %v8713_v46  ;;  %v4679_v45 = vsel %vm6700_vm2, %v4674_v2, %v4678_v29  ;;  %v4704_v27 = vshrl.u32 %v4559_v42, 16  ;;  %v4693_v46 = vrot.slane %v4691_v1, 4  ;;  %v8019_v2 = vpop.f32.mrf.mxu1 }
 0x304   : > { %v5000_v10 = vunpack.c.l.b16 %v4679_v45  ;;  %v4696_v29 = vrot.slane %v4694_v0, 5  ;;  %8718 = vst [vmem:[#allocation62_spill] sm:$0xff] %v8019_v2  ;;  %v4702_v42 = vrot.slane %v4700_v58, 5  ;;  %v2895_v1 = vshll.u32 %v2733_v21, 16 }
 0x305   : > { %8714 = vst [vmem:[#allocation24_spill] sm:$0xff] %v8006_v18  ;;  %v4706_v59 = vrot.slane %v4704_v27, 4  ;;  %v2888_v0 = vrot.slane %v2886_v26, 4  ;;  %v6210_v26 = vld [vmem:[#allocation2 + $0x128] sm:$0xff] }
 0x306   : > { %v8008_v43 = vpop.f32.mrf.mxu2  ;;  %v5029_v45 = vpack.c.b16 %v5001_v16, %v5000_v10  ;;  %v4697_v12 = vor.u32 %v4696_v29, %v4693_v46  ;;  %v4561_v16 = vld [vmem:[#allocation2 + $0xb0] sm:$0xf] }
 0x307   : > { %8715 = vst [vmem:[#allocation61_spill] sm:$0xff] %v8008_v43  ;;  %3549 = vmatmul.bf16.gmra.mxu3 %v3280_v36  ;;  %v2874_v36 = vsel %vm6700_vm2, %v2869_v4, %v2873_v35  ;;  %v4707_v4 = vor.u32 %v4706_v59, %v4702_v42 }
 0x308   : > { %v3253_v41 = vunpack.c.l.b16 %v2874_v36  ;;  %v4698_v43 = vrot.slane %v4697_v12, 4  ;;  %v4562_v36 = vld [vmem:[#allocation2 + $0xb4] sm:$0xf] }
 0x309   : > { %4478 = vmatmul.bf16.gmra.mxu1 %v6209_v51  ;;  %v2889_v51 = vshll.u32 %v2732_v13, 16  ;;  %v2734_v13 = vld [vmem:[#allocation2 + $0xa0] sm:$0x1]  ;;  %v4724_v12 = vshll.u32 %v4562_v36, 16 }
 0x30a   : > { %v2603_v28 = vpop.f32.mrf.mxu3 }
 0x30b   : > { %v8015_v54 = vadd.f32 %v2603_v28, %v8716_v11  ;;  %v2884_v28 = vsel %vm6700_vm2, %v2879_v40, %v2883_v9  ;;  %v2899_v11 = vshrl.u32 %v2733_v21, 16  ;;  %v2891_v2 = vrot.slane %v2889_v51, 5  ;;  %v8030_v59 = vpop.f32.mrf.mxu1 }
 0x30c   : > { %v3254_v35 = vunpack.c.l.b16 %v2884_v28  ;;  %v4708_v21 = vrot.slane %v4707_v4, 4  ;;  %8722 = vst [vmem:[#allocation66_spill] sm:$0xff] %v8030_v59  ;;  %v4718_v51 = vshll.u32 %v4561_v16, 16 }
 0x30d   : > { %8717 = vst [vmem:[#allocation26_spill] sm:$0xff] %v8015_v54  ;;  %v4710_v54 = vshll.u32 %v4560_v55, 16  ;;  %v2901_v58 = vrot.slane %v2899_v11, 4  ;;  %v2892_v46 = vor.u32 %v2891_v2, %v2888_v0  ;;  %v2905_v55 = vshll.u32 %v2734_v13, 16 }
 0x30e   : > { %v8021_v48 = vpop.f32.mrf.mxu2  ;;  %v3281_v40 = vpack.c.b16 %v3254_v35, %v3253_v41  ;;  %v4728_v2 = vshrl.u32 %v4562_v36, 16  ;;  %v2735_v41 = vld [vmem:[#allocation2 + $0xb0] sm:$0xf]  ;;  %v8723_v35 = vld [vmem:[#allocation29_spill] sm:$0xff] }
 0x30f   : > { %8719 = vst [vmem:[#allocation63_spill] sm:$0xff] %v8021_v48  ;;  %v2897_v48 = vrot.slane %v2895_v1, 5  ;;  %v4712_v10 = vrot.slane %v4710_v54, 5  ;;  %v2893_v54 = vrot.slane %v2892_v46, 4  ;;  %v2910_v36 = vshrl.u32 %v2735_v41, 16 }
 0x310   : > { %v4730_v46 = vrot.slane %v4728_v2, 4 }
 0x311   : > { %v2902_v29 = vor.u32 %v2901_v58, %v2897_v48  ;;  %v4713_v28 = vsel %vm6700_vm2, %v4708_v21, %v4712_v10  ;;  %v2736_v58 = vld [vmem:[#allocation2 + $0xb4] sm:$0xf]  ;;  %v2898_v21 = vsel %vm6700_vm2, %v2893_v54, %v2897_v48  ;;  %v4563_v10 = vld [vmem:[#allocation2 + $0xb8] sm:$0x1] }
 0x312   : > { %v2605_v18 = vpop.f32.mrf.mxu3  ;;  %v5003_v13 = vunpack.c.l.b16 %v4713_v28 }
 0x313   : > { %5129 = vmatmul.bf16.gmra.mxu2 %v5029_v45  ;;  %v8026_v27 = vadd.f32 %v2605_v18, %v7565_v37  ;;  %v4703_v37 = vsel %vm6700_vm2, %v4698_v43, %v4702_v42  ;;  %v4715_v18 = vshrl.u32 %v4561_v16, 16  ;;  %v2903_v11 = vrot.slane %v2902_v29, 4 }
 0x314   : > { %v2907_v45 = vrot.slane %v2905_v55, 5  ;;  %v5002_v0 = vunpack.c.l.b16 %v4703_v37  ;;  %v4720_v42 = vrot.slane %v4718_v51, 5  ;;  %v2913_v29 = vshll.u32 %v2735_v41, 16  ;;  %v8045_v51 = vpop.f32.mrf.mxu1  ;;  %v8726_v41 = vld [vmem:[#allocation31_spill] sm:$0xff] }
 0x315   : > { %8720 = vst [vmem:[#allocation64_spill] sm:$0xff] %v8026_v27  ;;  %v4717_v43 = vrot.slane %v4715_v18, 4  ;;  %v4734_v18 = vshll.u32 %v4563_v10, 16 }
 0x316   : > { %v8028_v9 = vpop.f32.mrf.mxu2  ;;  %v2908_v55 = vsel %vm6700_vm2, %v2903_v11, %v2907_v45  ;;  %v5030_v37 = vpack.c.b16 %v5003_v13, %v5002_v0  ;;  %v2915_v27 = vrot.slane %v2913_v29, 5  ;;  %v2737_v11 = vld [vmem:[#allocation2 + $0xb8] sm:$0x1]  ;;  %v4564_v45 = vld [vmem:[#allocation2 + $0xc8] sm:$0xf] }
 0x317   : > { %8721 = vst [vmem:[#allocation65_spill] sm:$0xff] %v8028_v9  ;;  %3554 = vmatmul.bf16.gmra.mxu3 %v3281_v40  ;;  %v4726_v40 = vrot.slane %v4724_v12, 5  ;;  %v4721_v28 = vor.u32 %v4720_v42, %v4717_v43  ;;  %v3256_v12 = vunpack.c.l.b16 %v2908_v55  ;;  %v4565_v0 = vld [vmem:[#allocation2 + $0xcc] sm:$0xf]  ;;  %v4739_v29 = vshrl.u32 %v4564_v45, 16  ;;  %v6211_v55 = vld [vmem:[#allocation2 + $0x140] sm:$0xff] }
 0x319   : > { %4483 = vmatmul.bf16.gmra.mxu1 %v6210_v26  ;;  %v2919_v26 = vshll.u32 %v2736_v58, 16  ;;  %v4731_v59 = vor.u32 %v4730_v46, %v4726_v40  ;;  %v4722_v42 = vrot.slane %v4721_v28, 4 }
 0x31a   : > { %v2608_v1 = vpop.f32.mrf.mxu3 }
 0x31b   : > { %v8037_v4 = vadd.f32 %v2608_v1, %v8723_v35  ;;  %v2923_v1 = vshrl.u32 %v2736_v58, 16  ;;  %v3255_v35 = vunpack.c.l.b16 %v2898_v21  ;;  %v2921_v54 = vrot.slane %v2919_v26, 5 }
 0x31c   : > { %v4736_v58 = vrot.slane %v4734_v18, 5  ;;  %v4732_v21 = vrot.slane %v4731_v59, 4  ;;  %v4742_v26 = vshll.u32 %v4564_v45, 16 }
 0x31d   : > { %8724 = vst [vmem:[#allocation29_spill] sm:$0xff] %v8037_v4  ;;  %v2912_v4 = vrot.slane %v2910_v36, 4  ;;  %v2925_v2 = vrot.slane %v2923_v1, 4  ;;  %v3282_v13 = vpack.c.b16 %v3256_v12, %v3255_v35  ;;  %v2929_v36 = vshll.u32 %v2737_v11, 16 }
 0x31e   : > { %v8039_v16 = vpop.f32.mrf.mxu2  ;;  %v4748_v1 = vshll.u32 %v4565_v0, 16  ;;  %v4737_v35 = vsel %vm6700_vm2, %v4732_v21, %v4736_v58  ;;  %v4744_v45 = vrot.slane %v4742_v26, 5 }
 0x31f   : > { %8725 = vst [vmem:[#allocation67_spill] sm:$0xff] %v8039_v16  ;;  %v2916_v10 = vor.u32 %v2915_v27, %v2912_v4  ;;  %v2926_v46 = vor.u32 %v2925_v2, %v2921_v54  ;;  %v2931_v59 = vrot.slane %v2929_v36, 5  ;;  %v4741_v27 = vrot.slane %v4739_v29, 4  ;;  %v2738_v4 = vld [vmem:[#allocation2 + $0xc8] sm:$0xf]  ;;  %v8056_v2 = vpop.f32.mrf.mxu1 }
 0x320   : > { %v2934_v21 = vshrl.u32 %v2738_v4, 16 }
 0x321   : > { %v2917_v18 = vrot.slane %v2916_v10, 4  ;;  %v2927_v28 = vrot.slane %v2926_v46, 4  ;;  %v2937_v46 = vshll.u32 %v2738_v4, 16  ;;  %v2740_v4 = vld [vmem:[#allocation2 + $0xd0] sm:$0x1] }
 0x322   : > { %v2610_v48 = vpop.f32.mrf.mxu3 }
 0x323   : > { %5134 = vmatmul.bf16.gmra.mxu2 %v5030_v37  ;;  %v8048_v16 = vadd.f32 %v2610_v48, %v8726_v41  ;;  %v4752_v37 = vshrl.u32 %v4565_v0, 16  ;;  %v4727_v48 = vsel %vm6700_vm2, %v4722_v42, %v4726_v40  ;;  %v8729_v41 = vld [vmem:[#allocation33_spill] sm:$0xff]  ;;  %v4750_v0 = vrot.slane %v4748_v1, 5  ;;  %v4566_v42 = vld [vmem:[#allocation2 + $0xd0] sm:$0x1] }
 0x324   : > { %v5005_v40 = vunpack.c.l.b16 %v4737_v35  ;;  %v2922_v58 = vsel %vm6700_vm2, %v2917_v18, %v2921_v54  ;;  %v2932_v10 = vsel %vm6700_vm2, %v2927_v28, %v2931_v59  ;;  %v4758_v1 = vshll.u32 %v4566_v42, 16 }
 0x325   : > { %8727 = vst [vmem:[#allocation31_spill] sm:$0xff] %v8048_v16  ;;  %v5004_v16 = vunpack.c.l.b16 %v4727_v48  ;;  %v3258_v48 = vunpack.c.l.b16 %v2932_v10 }
 0x326   : > { %v8050_v43 = vpop.f32.mrf.mxu2  ;;  %v4760_v59 = vrot.slane %v4758_v1, 5 }
 0x327   : > { %8728 = vst [vmem:[#allocation68_spill] sm:$0xff] %v8050_v43  ;;  %3559 = vmatmul.bf16.gmra.mxu3 %v3282_v13  ;;  %v4754_v13 = vrot.slane %v4752_v37, 4  ;;  %v5031_v37 = vpack.c.b16 %v5005_v40, %v5004_v16  ;;  %v4567_v16 = vld [vmem:[#allocation2 + $0xe0] sm:$0xf] }
 0x329   : > { %4488 = vmatmul.bf16.gmra.mxu1 %v6211_v55  ;;  %v2739_v55 = vld [vmem:[#allocation2 + $0xcc] sm:$0xf]  ;;  %v4755_v26 = vor.u32 %v4754_v13, %v4750_v0  ;;  %v4568_v13 = vld [vmem:[#allocation2 + $0xe4] sm:$0xf] }
 0x32a   : > { %v2613_v12 = vpop.f32.mrf.mxu3  ;;  %v2943_v36 = vshll.u32 %v2739_v55, 16  ;;  %v2947_v29 = vshrl.u32 %v2739_v55, 16  ;;  %v8070_v55 = vpop.f32.mrf.mxu1 }
 0x32b   : > { %v8059_v11 = vadd.f32 %v2613_v12, %v8729_v41  ;;  %v4745_v12 = vor.u32 %v4744_v45, %v4741_v27  ;;  %v3257_v41 = vunpack.c.l.b16 %v2922_v58  ;;  %v4756_v28 = vrot.slane %v4755_v26, 4  ;;  %v2741_v26 = vld [vmem:[#allocation2 + $0xe0] sm:$0xf] }
 0x32c   : > { %v2945_v9 = vrot.slane %v2943_v36, 5  ;;  %v2949_v5 = vrot.slane %v2947_v29, 4  ;;  %v2953_v58 = vshll.u32 %v2740_v4, 16  ;;  %v4766_v36 = vshll.u32 %v4567_v16, 16 }
 0x32d   : > { %8730 = vst [vmem:[#allocation33_spill] sm:$0xff] %v8059_v11  ;;  %v2936_v11 = vrot.slane %v2934_v21, 4  ;;  %v4746_v18 = vrot.slane %v4745_v12, 4  ;;  %v3283_v27 = vpack.c.b16 %v3258_v48, %v3257_v41  ;;  %v6212_v21 = vld [vmem:[#allocation2 + $0x158] sm:$0xff]  ;;  %v4761_v10 = vsel %vm6700_vm2, %v4756_v28, %v4760_v59 }
 0x32e   : > { %v8061_v43 = vpop.f32.mrf.mxu2  ;;  %v2950_v42 = vor.u32 %v2949_v5, %v2945_v9  ;;  %v4772_v29 = vshll.u32 %v4568_v13, 16  ;;  %v4776_v12 = vshrl.u32 %v4568_v13, 16  ;;  %v2955_v5 = vrot.slane %v2953_v58, 5  ;;  %v4569_v13 = vld [vmem:[#allocation2 + $0xe8] sm:$0x1] }
 0x32f   : > { %8731 = vst [vmem:[#allocation69_spill] sm:$0xff] %v8061_v43  ;;  %v2939_v43 = vrot.slane %v2937_v46, 5  ;;  %v4763_v46 = vshrl.u32 %v4567_v16, 16  ;;  %v5007_v48 = vunpack.c.l.b16 %v4761_v10  ;;  %v4768_v28 = vrot.slane %v4766_v36, 5 }
 0x330   : > { %v4774_v59 = vrot.slane %v4772_v29, 5  ;;  %v4782_v29 = vshll.u32 %v4569_v13, 16 }
 0x331   : > { %v2940_v40 = vor.u32 %v2939_v43, %v2936_v11  ;;  %v2951_v43 = vrot.slane %v2950_v42, 4  ;;  %v4765_v4 = vrot.slane %v4763_v46, 4 }
 0x332   : > { %v2615_v35 = vpop.f32.mrf.mxu3  ;;  %v8087_v58 = vpop.f32.mrf.mxu1 }
 0x333   : > { %5139 = vmatmul.bf16.gmra.mxu2 %v5031_v37  ;;  %v8068_v54 = vadd.f32 %v2615_v35, %v7628_v15  ;;  %v4751_v15 = vsel %vm6700_vm2, %v4746_v18, %v4750_v0  ;;  %v2941_v41 = vrot.slane %v2940_v40, 4  ;;  %v2742_v35 = vld [vmem:[#allocation2 + $0xe4] sm:$0xf]  ;;  %v2958_v0 = vshrl.u32 %v2741_v26, 16 }
 0x334   : > { %v5006_v37 = vunpack.c.l.b16 %v4751_v15  ;;  %v2961_v18 = vshll.u32 %v2741_v26, 16  ;;  %v2956_v40 = vsel %vm6700_vm2, %v2951_v43, %v2955_v5  ;;  %v2967_v42 = vshll.u32 %v2742_v35, 16 }
 0x335   : > { %8732 = vst [vmem:[#allocation70_spill] sm:$0xff] %v8068_v54  ;;  %v2960_v15 = vrot.slane %v2958_v0, 4  ;;  %v4769_v46 = vor.u32 %v4768_v28, %v4765_v4  ;;  %v4570_v4 = vld [vmem:[#allocation2 + $0xf8] sm:$0xf]  ;;  %v4571_v28 = vld [vmem:[#allocation2 + $0xfc] sm:$0xf] }
 0x336   : > { %v8072_v45 = vpop.f32.mrf.mxu2  ;;  %v2963_v10 = vrot.slane %v2961_v18, 5  ;;  %v5032_v26 = vpack.c.b16 %v5007_v48, %v5006_v37  ;;  %v2969_v54 = vrot.slane %v2967_v42, 5  ;;  %v4787_v42 = vshrl.u32 %v4570_v4, 16 }
 0x337   : > { %8733 = vst [vmem:[#allocation71_spill] sm:$0xff] %v8072_v45  ;;  %3564 = vmatmul.bf16.gmra.mxu3 %v3283_v27  ;;  %v4778_v27 = vrot.slane %v4776_v12, 4  ;;  %v4770_v5 = vrot.slane %v4769_v46, 4  ;;  %v4784_v45 = vrot.slane %v4782_v29, 5 }
 0x338   : > { %v2964_v43 = vor.u32 %v2963_v10, %v2960_v15  ;;  %v4796_v15 = vshll.u32 %v4571_v28, 16  ;;  %v2745_v10 = vld [vmem:[#allocation2 + $0xfc] sm:$0xf] }
 0x339   : > { %4493 = vmatmul.bf16.gmra.mxu1 %v6212_v21  ;;  %v2946_v21 = vsel %vm6700_vm2, %v2941_v41, %v2945_v9  ;;  %v4779_v36 = vor.u32 %v4778_v27, %v4774_v59  ;;  %v2743_v41 = vld [vmem:[#allocation2 + $0xe8] sm:$0x1]  ;;  %v6213_v27 = vld [vmem:[#allocation2 + $0x170] sm:$0xff] }
 0x33a   : > { %v2618_v1 = vpop.f32.mrf.mxu3  ;;  %v3259_v12 = vunpack.c.l.b16 %v2946_v21  ;;  %v2977_v48 = vshll.u32 %v2743_v41, 16  ;;  %v2965_v13 = vrot.slane %v2964_v43, 4  ;;  %v4775_v21 = vsel %vm6700_vm2, %v4770_v5, %v4774_v59 }
 0x33b   : > { %v8079_v11 = vadd.f32 %v2618_v1, %v7642_v25  ;;  %v2971_v25 = vshrl.u32 %v2742_v35, 16  ;;  %v3260_v1 = vunpack.c.l.b16 %v2956_v40  ;;  %v4780_v35 = vrot.slane %v4779_v36, 4  ;;  %v8098_v40 = vpop.f32.mrf.mxu1 }
 0x33c   : > { %v2979_v36 = vrot.slane %v2977_v48, 5  ;;  %v2991_v43 = vshll.u32 %v2745_v10, 16  ;;  %v2995_v5 = vshrl.u32 %v2745_v10, 16 }
 0x33d   : > { %8734 = vst [vmem:[#allocation72_spill] sm:$0xff] %v8079_v11  ;;  %v3284_v0 = vpack.c.b16 %v3260_v1, %v3259_v12  ;;  %v5008_v12 = vunpack.c.l.b16 %v4775_v21 }
 0x33e   : > { %v8081_v16 = vpop.f32.mrf.mxu2 }
 0x33f   : > { %8735 = vst [vmem:[#allocation73_spill] sm:$0xff] %v8081_v16  ;;  %v2973_v16 = vrot.slane %v2971_v25, 4  ;;  %v4790_v25 = vshll.u32 %v4570_v4, 16 }
 0x341   : > { %v2974_v37 = vor.u32 %v2973_v16, %v2969_v54  ;;  %v4800_v16 = vshrl.u32 %v4571_v28, 16  ;;  %v4792_v4 = vrot.slane %v4790_v25, 5  ;;  %v4798_v28 = vrot.slane %v4796_v15, 5  ;;  %v4573_v15 = vld [vmem:[#allocation2 + $0x110] sm:$0xf] }
 0x342   : > { %v2620_v11 = vpop.f32.mrf.mxu3 }
 0x343   : > { %5144 = vmatmul.bf16.gmra.mxu2 %v5032_v26  ;;  %v8090_v9 = vadd.f32 %v2620_v11, %v7659_v17  ;;  %v4785_v17 = vsel %vm6700_vm2, %v4780_v35, %v4784_v45  ;;  %v2744_v11 = vld [vmem:[#allocation2 + $0xf8] sm:$0xf]  ;;  %v2975_v46 = vrot.slane %v2974_v37, 4  ;;  %v2970_v45 = vsel %vm6700_vm2, %v2965_v13, %v2969_v54 }
 0x344   : > { %v5009_v59 = vunpack.c.l.b16 %v4785_v17  ;;  %v2982_v1 = vshrl.u32 %v2744_v11, 16  ;;  %v2985_v41 = vshll.u32 %v2744_v11, 16  ;;  %v3261_v21 = vunpack.c.l.b16 %v2970_v45 }
 0x345   : > { %8736 = vst [vmem:[#allocation74_spill] sm:$0xff] %v8090_v9  ;;  %v2980_v37 = vsel %vm6700_vm2, %v2975_v46, %v2979_v36  ;;  %v2997_v54 = vrot.slane %v2995_v5, 4  ;;  %v4811_v5 = vshrl.u32 %v4573_v15, 16 }
 0x346   : > { %v8092_v18 = vpop.f32.mrf.mxu2  ;;  %v5033_v48 = vpack.c.b16 %v5009_v59, %v5008_v12  ;;  %v2984_v17 = vrot.slane %v2982_v1, 4  ;;  %v3262_v13 = vunpack.c.l.b16 %v2980_v37  ;;  %v6214_v37 = vld [vmem:[#allocation2 + $0x188] sm:$0xff] }
 0x347   : > { %8737 = vst [vmem:[#allocation75_spill] sm:$0xff] %v8092_v18  ;;  %3569 = vmatmul.bf16.gmra.mxu3 %v3284_v0  ;;  %v4789_v0 = vrot.slane %v4787_v42, 4  ;;  %v2746_v18 = vld [vmem:[#allocation2 + $0x100] sm:$0x1]  ;;  %v8109_v42 = vpop.f32.mrf.mxu1 }
 0x348   : > { %v3001_v12 = vshll.u32 %v2746_v18, 16  ;;  %v3285_v59 = vpack.c.b16 %v3262_v13, %v3261_v21  ;;  %v2747_v21 = vld [vmem:[#allocation2 + $0x110] sm:$0xf] }
 0x349   : > { %4498 = vmatmul.bf16.gmra.mxu1 %v6213_v27  ;;  %v4802_v27 = vrot.slane %v4800_v16, 4  ;;  %v4793_v11 = vor.u32 %v4792_v4, %v4789_v0  ;;  %v4574_v16 = vld [vmem:[#allocation2 + $0x114] sm:$0xf]  ;;  %v4814_v0 = vshll.u32 %v4573_v15, 16 }
 0x34a   : > { %v2623_v26 = vpop.f32.mrf.mxu3  ;;  %v4820_v4 = vshll.u32 %v4574_v16, 16 }
 0x34b   : > { %v8101_v29 = vadd.f32 %v2623_v26, %v7684_v14  ;;  %v4572_v14 = vld [vmem:[#allocation2 + $0x100] sm:$0x1]  ;;  %v2987_v26 = vrot.slane %v2985_v41, 5  ;;  %v4803_v9 = vor.u32 %v4802_v27, %v4798_v28  ;;  %v4794_v1 = vrot.slane %v4793_v11, 4  ;;  %v2748_v11 = vld [vmem:[#allocation2 + $0x114] sm:$0xf] }
 0x34c   : > { %v4806_v10 = vshll.u32 %v4572_v14, 16  ;;  %v4824_v27 = vshrl.u32 %v4574_v16, 16 }
 0x34d   : > { %8738 = vst [vmem:[#allocation76_spill] sm:$0xff] %v8101_v29  ;;  %v2993_v29 = vrot.slane %v2991_v43, 5  ;;  %v2988_v46 = vor.u32 %v2987_v26, %v2984_v17  ;;  %v4804_v41 = vrot.slane %v4803_v9, 4  ;;  %v4813_v9 = vrot.slane %v4811_v5, 4  ;;  %v8128_v5 = vpop.f32.mrf.mxu0 }
 0x34e   : > { %v8105_v35 = vpop.f32.mrf.mxu2  ;;  %v4808_v43 = vrot.slane %v4806_v10, 5  ;;  %v4816_v26 = vrot.slane %v4814_v0, 5  ;;  %v4826_v13 = vrot.slane %v4824_v27, 4  ;;  %v4575_v10 = vld [vmem:[#allocation2 + $0x118] sm:$0x1] }
 0x34f   : > { %8739 = vst [vmem:[#allocation77_spill] sm:$0xff] %v8105_v35  ;;  %v2998_v36 = vor.u32 %v2997_v54, %v2993_v29  ;;  %v2989_v14 = vrot.slane %v2988_v46, 4  ;;  %v4822_v54 = vrot.slane %v4820_v4, 5  ;;  %v4830_v27 = vshll.u32 %v4575_v10, 16  ;;  %v4576_v10 = vld [vmem:[#allocation2 + $0x128] sm:$0xf] }
 0x350   : > { %v4809_v18 = vsel %vm6700_vm2, %v4804_v41, %v4808_v43  ;;  %v3015_v41 = vshll.u32 %v2748_v11, 16  ;;  %v3019_v43 = vshrl.u32 %v2748_v11, 16  ;;  %v4817_v0 = vor.u32 %v4816_v26, %v4813_v9 }
 0x351   : > { %v5011_v16 = vunpack.c.l.b16 %v4809_v18  ;;  %v2994_v46 = vsel %vm6700_vm2, %v2989_v14, %v2993_v29  ;;  %v4827_v4 = vor.u32 %v4826_v13, %v4822_v54  ;;  %v2749_v18 = vld [vmem:[#allocation2 + $0x118] sm:$0x1]  ;;  %v4832_v26 = vrot.slane %v4830_v27, 5 }
 0x352   : > { %v2625_v35 = vpop.f32.mrf.mxu3  ;;  %v3263_v29 = vunpack.c.l.b16 %v2994_v46  ;;  %v4818_v6 = vrot.slane %v4817_v0, 4  ;;  %v4835_v0 = vshrl.u32 %v4576_v10, 16 }
 0x353   : > { %5149 = vmatmul.bf16.gmra.mxu2 %v5033_v48  ;;  %v8112_v25 = vadd.f32 %v2625_v35, %v7706_v52  ;;  %v2999_v52 = vrot.slane %v2998_v36, 4  ;;  %v3003_v35 = vrot.slane %v3001_v12, 5  ;;  %v4799_v48 = vsel %vm6700_vm2, %v4794_v1, %v4798_v28  ;;  %v8124_v28 = vpop.f32.mrf.mxu1 }
 0x354   : > { %v5010_v15 = vunpack.c.l.b16 %v4799_v48  ;;  %v3009_v1 = vshll.u32 %v2747_v21, 16  ;;  %v4828_v9 = vrot.slane %v4827_v4, 4  ;;  %v4838_v4 = vshll.u32 %v4576_v10, 16 }
 0x355   : > { %8740 = vst [vmem:[#allocation78_spill] sm:$0xff] %v8112_v25  ;;  %v3004_v36 = vsel %vm6700_vm2, %v2999_v52, %v3003_v35  ;;  %v8131_v25 = vrot.slane %v3015_v41, 5 }
 0x356   : > { %v8114_v45 = vpop.f32.mrf.mxu2  ;;  %v5034_v48 = vpack.c.b16 %v5011_v16, %v5010_v15  ;;  %v3264_v14 = vunpack.c.l.b16 %v3004_v36  ;;  %v3011_v35 = vrot.slane %v3009_v1, 5  ;;  %v4577_v15 = vld [vmem:[#allocation2 + $0x12c] sm:$0xf]  ;;  %v8744_v1 = vld [vmem:[#allocation21_spill] sm:$0xff] }
 0x357   : > { %8741 = vst [vmem:[#allocation79_spill] sm:$0xff] %v8114_v45  ;;  %3574 = vmatmul.bf16.gmra.mxu3 %v3285_v59  ;;  %v3006_v59 = vshrl.u32 %v2747_v21, 16  ;;  %v8743_v21 = vld [vmem:[#allocation19_spill] sm:$0xff]  ;;  %v2640_v41 = vadd.f32 %v8744_v1, %v7720_v7  ;;  %v4844_v27 = vshll.u32 %v4577_v15, 16 }
 0x358   : > { %v2638_v45 = vadd.f32 %v8743_v21, %v7702_v33  ;;  %v3286_v16 = vpack.c.b16 %v3264_v14, %v3263_v29  ;;  %v4435_v33 = vadd.f32 %v8045_v51, %v7728_v34  ;;  %v8154_v21 = vld [vmem:[%s8469_s4] ss:$0 sm:$0xff] }
 0x359   : > { %4503 = vmatmul.bf16.gmra.mxu1 %v6214_v37  ;;  %v3008_v52 = vrot.slane %v3006_v59, 4 }
 0x35a   : > { %v3535_v17 = vpop.f32.mrf.mxu3 }
 0x35b   : > { %v3536_v37 = vadd.f32 %v3535_v17, %v7722_v49  ;;  %v3025_v17 = vshll.u32 %v2749_v18, 16  ;;  %v3012_v36 = vor.u32 %v3011_v35, %v3008_v52  ;;  %v4437_v52 = vadd.f32 %v8056_v2, %v7755_v47 }
 0x35d   : > { %v3615_v13 = vadd.f32 %v3536_v37, %v2638_v45  ;;  %v8145_v45 = vpop.f32.mrf.mxu1  ;;  %v4848_v37 = vshrl.u32 %v4577_v15, 16  ;;  %v3027_v14 = vrot.slane %v3025_v17, 5  ;;  %v3013_v18 = vrot.slane %v3012_v36, 4 }
 0x35e   : > { %v8126_v12 = vpop.f32.mrf.mxu2  ;;  %v8156_v17 = vrot.slane %v4844_v27, 5  ;;  %v2752_v27 = vld [vmem:[#allocation2 + $0x130] sm:$0x1] }
 0x35f   : > { %8742 = vst [vmem:[#allocation80_spill] sm:$0xff] %v8126_v12  ;;  %v3021_v12 = vrot.slane %v3019_v43, 4  ;;  %v4823_v43 = vsel %vm6700_vm2, %v4818_v6, %v4822_v54  ;;  %v4514_v29 = vadd.f32 %v4435_v33, %v3615_v13  ;;  %v2751_v54 = vld [vmem:[#allocation2 + $0x12c] sm:$0xf]  ;;  %v4840_v13 = vrot.slane %v4838_v4, 5 }
 0x360   : > { %v5012_v34 = vunpack.c.l.b16 %v4823_v43  ;;  %v4850_v10 = vrot.slane %v4848_v37, 4  ;;  %v3039_v36 = vshll.u32 %v2751_v54, 16 }
 0x361   : > { %v3022_v59 = vor.u32 %v3021_v12, %v8131_v25  ;;  %v2750_v12 = vld [vmem:[#allocation2 + $0x128] sm:$0xf] }
 0x362   : > { %v3537_v11 = vpop.f32.mrf.mxu3 }
 0x363   : > { %5154 = vmatmul.bf16.gmra.mxu2 %v5034_v48  ;;  %v3538_v49 = vadd.f32 %v3537_v11, %v7740_v32  ;;  %v4833_v32 = vsel %vm6700_vm2, %v4828_v9, %v4832_v26  ;;  %v8147_v48 = vpop.f32.mrf.mxu0  ;;  %v3023_v6 = vrot.slane %v3022_v59, 4  ;;  %v3030_v9 = vshrl.u32 %v2750_v12, 16 }
 0x364   : > { %v5013_v51 = vunpack.c.l.b16 %v4833_v32  ;;  %v3033_v26 = vshll.u32 %v2750_v12, 16  ;;  %v3043_v59 = vshrl.u32 %v2751_v54, 16 }
 0x365   : > { %v3616_v7 = vadd.f32 %v3538_v49, %v2640_v41  ;;  %v4837_v49 = vrot.slane %v4835_v0, 4  ;;  %v3028_v33 = vsel %vm6700_vm2, %v3023_v6, %v3027_v14  ;;  %v3032_v43 = vrot.slane %v3030_v9, 4  ;;  %v8745_v14 = vld [vmem:[#allocation23_spill] sm:$0xff] }
 0x366   : > { %v5115_v46 = vpop.f32.mrf.mxu2  ;;  %v5035_v2 = vpack.c.b16 %v5013_v51, %v5012_v34  ;;  %v4851_v0 = vor.u32 %v4850_v10, %v8156_v17  ;;  %v3035_v37 = vrot.slane %v3033_v26, 5  ;;  %v8170_v34 = vpop.f32.mrf.mxu1  ;;  %v2643_v6 = vadd.f32 %v8745_v14, %v7736_v20 }
 0x367   : > { %3579 = vmatmul.bf16.gmra.mxu3 %v3286_v16  ;;  %v5195_v35 = vadd.f32 %v5115_v46, %v4514_v29  ;;  %v4515_v15 = vadd.f32 %v4437_v52, %v3616_v7  ;;  %v4578_v16 = vld [vmem:[#allocation2 + $0x130] sm:$0x1]  ;;  %v3018_v46 = vsel %vm6700_vm2, %v3013_v18, %v8131_v25  ;;  %v4841_v32 = vor.u32 %v4840_v13, %v4837_v49 }
 0x368   : > { %v4854_v4 = vshll.u32 %v4578_v16, 16  ;;  %v8168_v29 = vrot.slane %v3039_v36, 5  ;;  %v3045_v25 = vrot.slane %v3043_v59, 4  ;;  %v3265_v51 = vunpack.c.l.b16 %v3018_v46 }
 0x369   : > { %v5231_v1 = vadd.f32 %v8154_v21, %v5195_v35  ;;  %v3266_v18 = vunpack.c.l.b16 %v3028_v33  ;;  %v4842_v26 = vrot.slane %v4841_v32, 4  ;;  %v4852_v49 = vrot.slane %v4851_v0, 4 }
 0x36a   : > { %v3540_v11 = vpop.f32.mrf.mxu3  ;;  %v4856_v13 = vrot.slane %v4854_v4, 5  ;;  %v3036_v10 = vor.u32 %v3035_v37, %v3032_v43  ;;  %v3046_v59 = vor.u32 %v3045_v25, %v8168_v29  ;;  %v4440_v32 = vadd.f32 %v8070_v55, %v7776_v8 }
 0x36b   : > { %v3541_v12 = vadd.f32 %v3540_v11, %v7759_v22  ;;  %v8174_v54 = vpop.f32.mrf.mxu0  ;;  %v5263_v52 = vmax.f32 %v5231_v1, 0.0  ;;  %v3049_v22 = vshll.u32 %v2752_v27, 16  ;;  %v4579_v11 = vld [vmem:[#allocation2 + $0x140] sm:$0xf]  ;;  %v4442_v8 = vadd.f32 %v8087_v58, %v7796_v56 }
 0x36c   : > { %v4859_v46 = vshrl.u32 %v4579_v11, 16  ;;  %v4862_v1 = vshll.u32 %v4579_v11, 16  ;;  %v3037_v4 = vrot.slane %v3036_v10, 4  ;;  %v3047_v25 = vrot.slane %v3046_v59, 4  ;;  %v4581_v11 = vld [vmem:[#allocation2 + $0x148] sm:$0x1] }
 0x36d   : > { %v3617_v20 = vadd.f32 %v3541_v12, %v2643_v6  ;;  %v3051_v27 = vrot.slane %v3049_v22, 5 }
 0x36e   : > { %v5117_v47 = vpop.f32.mrf.mxu2 }
 0x36f   : > { %v5196_v41 = vadd.f32 %v5117_v47, %v4515_v15  ;;  %v4580_v15 = vld [vmem:[#allocation2 + $0x144] sm:$0xf]  ;;  %v3287_v47 = vpack.c.b16 %v3266_v18, %v3265_v51  ;;  %v4516_v12 = vadd.f32 %v4440_v32, %v3617_v20  ;;  %v4864_v51 = vrot.slane %v4862_v1, 5  ;;  %v2753_v18 = vld [vmem:[#allocation2 + $0x140] sm:$0xf]  ;;  %v8747_v1 = vld [vmem:[#allocation7_spill] sm:$0xff] }
 0x370   : > { %v4868_v0 = vshll.u32 %v4580_v15, 16  ;;  %v4872_v43 = vshrl.u32 %v4580_v15, 16  ;;  %v3052_v56 = vsel %vm6700_vm2, %v3047_v25, %v3051_v27  ;;  %v3054_v58 = vshrl.u32 %v2753_v18, 16 }
 0x371   : > { %v5232_v7 = vadd.f32 %v8154_v21, %v5196_v41  ;;  %v8746_v41 = vld [vmem:[#allocation25_spill] sm:$0xff]  ;;  %v3057_v20 = vshll.u32 %v2753_v18, 16 }
 0x372   : > { %v3542_v9 = vpop.f32.mrf.mxu3  ;;  %v2645_v33 = vadd.f32 %v8746_v41, %v7757_v57  ;;  %v4861_v57 = vrot.slane %v4859_v46, 4  ;;  %v8195_v6 = vrot.slane %v4868_v0, 5  ;;  %v4878_v46 = vshll.u32 %v4581_v11, 16  ;;  %v8748_v41 = vld [vmem:[#allocation27_spill] sm:$0xff]  ;;  %v4582_v11 = vld [vmem:[#allocation2 + $0x158] sm:$0xf] }
 0x373   : > { %v5264_v35 = vmax.f32 %v5232_v7, 0.0  ;;  %5159 = vmatmul.bf16.gmra.mxu2 %v5035_v2  ;;  %v3543_v36 = vadd.f32 %v3542_v9, %v7780_v44  ;;  %v4847_v44 = vsel %vm6700_vm2, %v4842_v26, %v8156_v17  ;;  %v4857_v7 = vsel %vm6700_vm2, %v4852_v49, %v4856_v13  ;;  %v2754_v17 = vld [vmem:[#allocation2 + $0x144] sm:$0xf]  ;;  %v8199_v26 = vpop.f32.mrf.mxu0  ;;  %v8749_v0 = vld [vmem:[#allocation43_spill] sm:$0xff] }
 0x374   : > { %v5014_v9 = vunpack.c.l.b16 %v4847_v44  ;;  %v5015_v22 = vunpack.c.l.b16 %v4857_v7  ;;  %v3042_v13 = vsel %vm6700_vm2, %v3037_v4, %v8168_v29  ;;  %v4865_v15 = vor.u32 %v4864_v51, %v4861_v57 }
 0x375   : > { %v6333_v16 = vpack.c.bf16 %v5264_v35, %v5263_v52  ;;  %v3618_v37 = vadd.f32 %v3543_v36, %v2645_v33  ;;  %v4874_v52 = vrot.slane %v4872_v43, 4  ;;  %v8197_v35 = vpop.f32.mrf.mxu1  ;;  %v3067_v36 = vshrl.u32 %v2754_v17, 16 }
 0x376   : > { %v5120_v2 = vpop.f32.mrf.mxu2  ;;  %v2648_v33 = vadd.f32 %v8748_v41, %v8747_v1  ;;  %v5036_v32 = vpack.c.b16 %v5015_v22, %v5014_v9  ;;  %v3267_v29 = vunpack.c.l.b16 %v3042_v13  ;;  %v3268_v4 = vunpack.c.l.b16 %v3052_v56 }
 0x377   : > { %6334 = vst [vmem:[%s8179_s27] sm:$0xff] %v6333_v16   ;;  %3584 = vmatmul.bf16.gmra.mxu3 %v3287_v47  ;;  %v5197_v55 = vadd.f32 %v5120_v2, %v4516_v12  ;;  %v4517_v49 = vadd.f32 %v4442_v8, %v3618_v37  ;;  %v3063_v16 = vshll.u32 %v2754_v17, 16  ;;  %v4875_v2 = vor.u32 %v4874_v52, %v8195_v6  ;;  %v2755_v12 = vld [vmem:[#allocation2 + $0x148] sm:$0x1] }
 0x378   : > { %v3056_v27 = vrot.slane %v3054_v58, 4  ;;  %v4866_v37 = vrot.slane %v4865_v15, 4  ;;  %v3059_v7 = vrot.slane %v3057_v20, 5  ;;  %v3069_v57 = vrot.slane %v3067_v36, 4  ;;  %v8750_v20 = vld [vmem:[#allocation42_spill] sm:$0xff] }
 0x379   : > { %v5233_v59 = vadd.f32 %v8154_v21, %v5197_v55  ;;  %v8212_v25 = vrot.slane %v3063_v16, 5  ;;  %v4876_v55 = vrot.slane %v4875_v2, 4  ;;  %v4880_v52 = vrot.slane %v4878_v46, 5  ;;  %v8751_v16 = vld [vmem:[#allocation28_spill] sm:$0xff] }
 0x37a   : > { %v3545_v14 = vpop.f32.mrf.mxu3  ;;  %v3073_v22 = vshll.u32 %v2755_v12, 16  ;;  %v3288_v56 = vpack.c.b16 %v3268_v4, %v3267_v29  ;;  %v2650_v36 = vadd.f32 %v8751_v16, %v8750_v20  ;;  %v4883_v46 = vshrl.u32 %v4582_v11, 16 }
 0x37b   : > { %v3546_v43 = vadd.f32 %v3545_v14, %v8749_v0  ;;  %v5265_v51 = vmax.f32 %v5233_v59, 0.0  ;;  %v3070_v15 = vor.u32 %v3069_v57, %v8212_v25  ;;  %v8220_v59 = vpop.f32.mrf.mxu0  ;;  %v4881_v2 = vsel %vm6700_vm2, %v4876_v55, %v4880_v52 }
 0x37c   : > { %v4886_v1 = vshll.u32 %v4582_v11, 16  ;;  %v5017_v4 = vunpack.c.l.b16 %v4881_v2 }
 0x37d   : > { %v3619_v17 = vadd.f32 %v3546_v43, %v2648_v33  ;;  %v8215_v13 = vpop.f32.mrf.mxu1  ;;  %v3075_v43 = vrot.slane %v3073_v22, 5 }
 0x37e   : > { %v5122_v10 = vpop.f32.mrf.mxu2 }
 0x37f   : > { %v5198_v47 = vadd.f32 %v5122_v10, %v4517_v49  ;;  %v4583_v49 = vld [vmem:[#allocation2 + $0x15c] sm:$0xf]  ;;  %v3060_v10 = vor.u32 %v3059_v7, %v3056_v27 }
 0x380   : > { %v4892_v41 = vshll.u32 %v4583_v49, 16  ;;  %v4896_v33 = vshrl.u32 %v4583_v49, 16  ;;  %v2757_v27 = vld [vmem:[#allocation2 + $0x15c] sm:$0xf] }
 0x381   : > { %v5234_v44 = vadd.f32 %v8154_v21, %v5198_v47  ;;  %v4445_v47 = vadd.f32 %v8098_v40, %v7823_v24  ;;  %v3061_v24 = vrot.slane %v3060_v10, 4  ;;  %v3071_v40 = vrot.slane %v3070_v15, 4 }
 0x382   : > { %v3547_v8 = vpop.f32.mrf.mxu3  ;;  %v4898_v55 = vrot.slane %v4896_v33, 4 }
 0x383   : > { %v5266_v18 = vmax.f32 %v5234_v44, 0.0  ;;  %5164 = vmatmul.bf16.gmra.mxu2 %v5036_v32  ;;  %v3548_v14 = vadd.f32 %v3547_v8, %v7814_v50  ;;  %v4871_v50 = vsel %vm6700_vm2, %v4866_v37, %v8195_v6  ;;  %v2756_v32 = vld [vmem:[#allocation2 + $0x158] sm:$0xf]  ;;  %v4518_v0 = vadd.f32 %v4445_v47, %v3619_v17  ;;  %v4584_v17 = vld [vmem:[#allocation2 + $0x160] sm:$0x1] }
 0x384   : > { %v5016_v44 = vunpack.c.l.b16 %v4871_v50  ;;  %v4447_v6 = vadd.f32 %v8109_v42, %v7846_v60  ;;  %v3078_v7 = vshrl.u32 %v2756_v32, 16  ;;  %v3081_v57 = vshll.u32 %v2756_v32, 16  ;;  %v8243_v50 = vpop.f32.mrf.mxu0  ;;  %v8752_v32 = vld [vmem:[#allocation30_spill] sm:$0xff] }
 0x385   : > { %v6338_v9 = vpack.c.bf16 %v5266_v18, %v5265_v51  ;;  %v3620_v29 = vadd.f32 %v3548_v14, %v2650_v36  ;;  %v4885_v51 = vrot.slane %v4883_v46, 4  ;;  %v4888_v18 = vrot.slane %v4886_v1, 5  ;;  %v8240_v10 = vpop.f32.mrf.mxu1  ;;  %v2758_v36 = vld [vmem:[#allocation2 + $0x160] sm:$0x1] }
 0x386   : > { %v5125_v58 = vpop.f32.mrf.mxu2  ;;  %v8232_v8 = vrot.slane %v4892_v41, 5  ;;  %v3091_v14 = vshrl.u32 %v2757_v27, 16  ;;  %v5037_v11 = vpack.c.b16 %v5017_v4, %v5016_v44  ;;  %v3066_v49 = vsel %vm6700_vm2, %v3061_v24, %v8212_v25  ;;  %v4585_v24 = vld [vmem:[#allocation2 + $0x170] sm:$0xf] }
 0x387   : > { %6428 = vst [vmem:[%s8179_s27 + $0x8] sm:$0xff] %v6338_v9   ;;  %3589 = vmatmul.bf16.gmra.mxu3 %v3288_v56  ;;  %v5199_v37 = vadd.f32 %v5125_v58, %v4518_v0  ;;  %v4519_v52 = vadd.f32 %v4447_v6, %v3620_v29  ;;  %v3087_v9 = vshll.u32 %v2757_v27, 16  ;;  %v3076_v56 = vsel %vm6700_vm2, %v3071_v40, %v3075_v43 }
 0x388   : > { %v3080_v58 = vrot.slane %v3078_v7, 4  ;;  %v4889_v15 = vor.u32 %v4888_v18, %v4885_v51  ;;  %v4899_v20 = vor.u32 %v4898_v55, %v8232_v8  ;;  %v4902_v16 = vshll.u32 %v4584_v17, 16  ;;  %v8753_v17 = vld [vmem:[#allocation32_spill] sm:$0xff] }
 0x389   : > { %v5235_v60 = vadd.f32 %v8154_v21, %v5199_v37  ;;  %v3083_v47 = vrot.slane %v3081_v57, 5  ;;  %v8247_v46 = vrot.slane %v3087_v9, 5  ;;  %v3093_v1 = vrot.slane %v3091_v14, 4  ;;  %v4586_v37 = vld [vmem:[#allocation2 + $0x174] sm:$0xf] }
 0x38a   : > { %v3550_v12 = vpop.f32.mrf.mxu3  ;;  %v3269_v41 = vunpack.c.l.b16 %v3066_v49  ;;  %v3270_v33 = vunpack.c.l.b16 %v3076_v56  ;;  %v2653_v29 = vadd.f32 %v8752_v32, %v7812_v31  ;;  %v3097_v4 = vshll.u32 %v2758_v36, 16  ;;  %v4587_v32 = vld [vmem:[#allocation2 + $0x178] sm:$0x1] }
 0x38b   : > { %v3551_v2 = vadd.f32 %v3550_v12, %v7835_v63  ;;  %v5267_v0 = vmax.f32 %v5235_v60, 0.0  ;;  %v4890_v40 = vrot.slane %v4889_v15, 4  ;;  %v4900_v27 = vrot.slane %v4899_v20, 4 }
 0x38c   : > { %v4904_v63 = vrot.slane %v4902_v16, 5  ;;  %v3084_v6 = vor.u32 %v3083_v47, %v3080_v58  ;;  %v3094_v51 = vor.u32 %v3093_v1, %v8247_v46  ;;  %v3289_v18 = vpack.c.b16 %v3270_v33, %v3269_v41  ;;  %v8265_v16 = vpop.f32.mrf.mxu0  ;;  %v2760_v1 = vld [vmem:[#allocation2 + $0x174] sm:$0xf] }
 0x38d   : > { %v3621_v12 = vadd.f32 %v3551_v2, %v2653_v29  ;;  %v4907_v55 = vshrl.u32 %v4585_v24, 16  ;;  %v2655_v9 = vadd.f32 %v8753_v17, %v7831_v39  ;;  %v4450_v14 = vadd.f32 %v8124_v28, %v8128_v5  ;;  %v8263_v39 = vpop.f32.mrf.mxu1  ;;  %v2759_v5 = vld [vmem:[#allocation2 + $0x170] sm:$0xf] }
 0x38e   : > { %v5127_v22 = vpop.f32.mrf.mxu2  ;;  %v3085_v49 = vrot.slane %v3084_v6, 4  ;;  %v3099_v60 = vrot.slane %v3097_v4, 5  ;;  %v4905_v58 = vsel %vm6700_vm2, %v4900_v27, %v4904_v63  ;;  %v3095_v15 = vrot.slane %v3094_v51, 4 }
 0x38f   : > { %v5200_v42 = vadd.f32 %v5127_v22, %v4519_v52  ;;  %v4910_v52 = vshll.u32 %v4585_v24, 16  ;;  %v4916_v22 = vshll.u32 %v4586_v37, 16  ;;  %v4520_v56 = vadd.f32 %v4450_v14, %v3621_v12  ;;  %v8754_v12 = vld [vmem:[#allocation34_spill] sm:$0xff] }
 0x390   : > { %v4909_v20 = vrot.slane %v4907_v55, 4  ;;  %v4452_v36 = vadd.f32 %v8145_v45, %v8147_v48  ;;  %v5019_v33 = vunpack.c.l.b16 %v4905_v58  ;;  %v3105_v48 = vshll.u32 %v2759_v5, 16  ;;  %v8755_v58 = vld [vmem:[#allocation35_spill] sm:$0xff] }
 0x391   : > { %v5236_v25 = vadd.f32 %v8154_v21, %v5200_v42  ;;  %v4912_v28 = vrot.slane %v4910_v52, 5  ;;  %v8269_v2 = vrot.slane %v4916_v22, 5  ;;  %v3111_v24 = vshll.u32 %v2760_v1, 16 }
 0x392   : > { %v3552_v44 = vpop.f32.mrf.mxu3  ;;  %v3107_v17 = vrot.slane %v3105_v48, 5 }
 0x393   : > { %v5268_v43 = vmax.f32 %v5236_v25, 0.0  ;;  %5169 = vmatmul.bf16.gmra.mxu2 %v5037_v11  ;;  %v3553_v57 = vadd.f32 %v3552_v44, %v7854_v53  ;;  %v4920_v11 = vshrl.u32 %v4586_v37, 16  ;;  %v4895_v53 = vsel %vm6700_vm2, %v4890_v40, %v8232_v8 }
 0x394   : > { %v5018_v41 = vunpack.c.l.b16 %v4895_v53  ;;  %v3102_v44 = vshrl.u32 %v2759_v5, 16  ;;  %v4913_v45 = vor.u32 %v4912_v28, %v4909_v20  ;;  %v3115_v40 = vshrl.u32 %v2760_v1, 16  ;;  %v8288_v20 = vpop.f32.mrf.mxu0 }
 0x395   : > { %v6343_v7 = vpack.c.bf16 %v5268_v43, %v5267_v0  ;;  %v3622_v42 = vadd.f32 %v3553_v57, %v2655_v9  ;;  %v4922_v25 = vrot.slane %v4920_v11, 4  ;;  %v3090_v0 = vsel %vm6700_vm2, %v3085_v49, %v8247_v46 }
 0x396   : > { %v5130_v31 = vpop.f32.mrf.mxu2  ;;  %v3100_v43 = vsel %vm6700_vm2, %v3095_v15, %v3099_v60  ;;  %v4926_v37 = vshll.u32 %v4587_v32, 16  ;;  %v3271_v57 = vunpack.c.l.b16 %v3090_v0  ;;  %v3104_v55 = vrot.slane %v3102_v44, 4 }
 0x397   : > { %6429 = vst [vmem:[%s8179_s27 + $0x10] sm:$0xff] %v6343_v7   ;;  %3594 = vmatmul.bf16.gmra.mxu3 %v3289_v18  ;;  %v5201_v47 = vadd.f32 %v5130_v31, %v4520_v56  ;;  %v4521_v29 = vadd.f32 %v4452_v36, %v3622_v42  ;;  %v4923_v6 = vor.u32 %v4922_v25, %v8269_v2  ;;  %v3272_v46 = vunpack.c.l.b16 %v3100_v43  ;;  %v8284_v42 = vpop.f32.mrf.mxu1 }
 0x398   : > { %v2658_v7 = vadd.f32 %v8754_v12, %v7852_v23  ;;  %v5038_v31 = vpack.c.b16 %v5019_v33, %v5018_v41  ;;  %v4914_v52 = vrot.slane %v4913_v45, 4  ;;  %v8282_v9 = vrot.slane %v3111_v24, 5  ;;  %v2761_v23 = vld [vmem:[#allocation2 + $0x178] sm:$0x1] }
 0x399   : > { %v5237_v27 = vadd.f32 %v8154_v21, %v5201_v47  ;;  %v3117_v14 = vrot.slane %v3115_v40, 4  ;;  %v4924_v49 = vrot.slane %v4923_v6, 4  ;;  %v4928_v60 = vrot.slane %v4926_v37, 5  ;;  %v4589_v47 = vld [vmem:[#allocation2 + $0x18c] sm:$0xf] }
 0x39a   : > { %v3555_v8 = vpop.f32.mrf.mxu3  ;;  %v3290_v56 = vpack.c.b16 %v3272_v46, %v3271_v57  ;;  %v2660_v15 = vadd.f32 %v8755_v58, %v7864_v19  ;;  %v4919_v1 = vsel %vm6700_vm2, %v4914_v52, %v8269_v2  ;;  %v3108_v41 = vor.u32 %v3107_v17, %v3104_v55 }
 0x39b   : > { %v3556_v51 = vadd.f32 %v3555_v8, %v7866_v62  ;;  %v5269_v22 = vmax.f32 %v5237_v27, 0.0  ;;  %v4588_v62 = vld [vmem:[#allocation2 + $0x188] sm:$0xf]  ;;  %v3118_v33 = vor.u32 %v3117_v14, %v8282_v9  ;;  %v3121_v32 = vshll.u32 %v2761_v23, 16  ;;  %v2764_v14 = vld [vmem:[#allocation2 + $0x190] sm:$0x1] }
 0x39c   : > { %v2762_v8 = vld [vmem:[#allocation2 + $0x188] sm:$0xf]  ;;  %v4455_v19 = vadd.f32 %v8170_v34, %v8174_v54  ;;  %v4929_v0 = vsel %vm6700_vm2, %v4924_v49, %v4928_v60  ;;  %v4934_v43 = vshll.u32 %v4588_v62, 16  ;;  %v4940_v44 = vshll.u32 %v4589_v47, 16 }
 0x39d   : > { %v3623_v28 = vadd.f32 %v3556_v51, %v2658_v7  ;;  %v3126_v45 = vshrl.u32 %v2762_v8, 16  ;;  %v3129_v48 = vshll.u32 %v2762_v8, 16  ;;  %v3109_v6 = vrot.slane %v3108_v41, 4 }
 0x39e   : > { %v5132_v4 = vpop.f32.mrf.mxu2  ;;  %v3119_v37 = vrot.slane %v3118_v33, 4  ;;  %v3123_v12 = vrot.slane %v3121_v32, 5  ;;  %v4457_v34 = vadd.f32 %v8197_v35, %v8199_v26  ;;  %v4936_v46 = vrot.slane %v4934_v43, 5  ;;  %v8307_v26 = vpop.f32.mrf.mxu0 }
 0x39f   : > { %v5202_v63 = vadd.f32 %v5132_v4, %v4521_v29  ;;  %v2763_v29 = vld [vmem:[#allocation2 + $0x18c] sm:$0xf]  ;;  %v4944_v4 = vshrl.u32 %v4589_v47, 16  ;;  %v4522_v24 = vadd.f32 %v4455_v19, %v3623_v28  ;;  %v5021_v51 = vunpack.c.l.b16 %v4929_v0  ;;  %v8302_v49 = vpop.f32.mrf.mxu1 }
 0x3a0   : > { %v3135_v40 = vshll.u32 %v2763_v29, 16  ;;  %v3139_v27 = vshrl.u32 %v2763_v29, 16  ;;  %v3128_v52 = vrot.slane %v3126_v45, 4  ;;  %v3114_v35 = vsel %vm6700_vm2, %v3109_v6, %v8282_v9  ;;  %v8756_v9 = vld [vmem:[#allocation36_spill] sm:$0xff]  ;;  %v8758_v6 = vld [vmem:[#allocation10_spill] sm:$0xff] }
 0x3a1   : > { %v5238_v18 = vadd.f32 %v8154_v21, %v5202_v63  ;;  %v5020_v63 = vunpack.c.l.b16 %v4919_v1  ;;  %v4946_v55 = vrot.slane %v4944_v4, 4  ;;  %v2663_v41 = vadd.f32 %v8756_v9, %v7880_v3  ;;  %v6215_v9 = vld [vmem:[#allocation2 + $0x1a0] sm:$0xff] }
 0x3a2   : > { %v3557_v53 = vpop.f32.mrf.mxu3  ;;  %v3273_v33 = vunpack.c.l.b16 %v3114_v35  ;;  %v4460_v3 = vadd.f32 %v8215_v13, %v8220_v59  ;;  %v8760_v35 = vld [vmem:[#allocation44_spill] sm:$0xff]  ;;  %4508 = vmatmul.bf16.gmra.mxu1 %v6215_v9 }
 0x3a3   : > { %v5270_v11 = vmax.f32 %v5238_v18, 0.0  ;;  %5174 = vmatmul.bf16.gmra.mxu2 %v5038_v31  ;;  %v3558_v36 = vadd.f32 %v3557_v53, %v7882_v38  ;;  %v4931_v38 = vshrl.u32 %v4588_v62, 16  ;;  %v4590_v18 = vld [vmem:[#allocation2 + $0x190] sm:$0x1]  ;;  %v4942_v31 = vrot.slane %v4940_v44, 5 }
 0x3a4   : > { %v3141_v53 = vrot.slane %v3139_v27, 4  ;;  %v3124_v62 = vsel %vm6700_vm2, %v3119_v37, %v3123_v12  ;;  %v5039_v8 = vpack.c.b16 %v5021_v51, %v5020_v63  ;;  %v8759_v37 = vld [vmem:[#allocation37_spill] sm:$0xff] }
 0x3a5   : > { %v6348_v5 = vpack.c.bf16 %v5270_v11, %v5269_v22  ;;  %v3624_v2 = vadd.f32 %v3558_v36, %v2660_v15  ;;  %v4933_v57 = vrot.slane %v4931_v38, 4  ;;  %v3131_v22 = vrot.slane %v3129_v48, 5  ;;  %v8757_v48 = vld [vmem:[#allocation15_spill] sm:$0xff] }
 0x3a6   : > { %v5135_v25 = vpop.f32.mrf.mxu2  ;;  %v3137_v11 = vrot.slane %v3135_v40, 5  ;;  %v4947_v28 = vor.u32 %v4946_v55, %v4942_v31  ;;  %v3145_v36 = vshll.u32 %v2764_v14, 16  ;;  %v3274_v32 = vunpack.c.l.b16 %v3124_v62 }
 0x3a7   : > { %6430 = vst [vmem:[%s8179_s27 + $0x18] sm:$0xff] %v6348_v5   ;;  %3599 = vmatmul.bf16.gmra.mxu3 %v3290_v56  ;;  %v5203_v54 = vadd.f32 %v5135_v25, %v4522_v24  ;;  %v4523_v17 = vadd.f32 %v4457_v34, %v3624_v2  ;;  %v4937_v58 = vor.u32 %v4936_v46, %v4933_v57  ;;  %v4950_v5 = vshll.u32 %v4590_v18, 16  ;;  %v8322_v34 = vpop.f32.mrf.mxu1  ;;  %v8326_v57 = vpop.f32.mrf.mxu0 }
 0x3a8   : > { %v3132_v25 = vor.u32 %v3131_v22, %v3128_v52  ;;  %v3142_v1 = vor.u32 %v3141_v53, %v3137_v11  ;;  %v4948_v43 = vrot.slane %v4947_v28, 4  ;;  %v3147_v4 = vrot.slane %v3145_v36, 5  ;;  %v3693_v36 = vld [vmem:[#allocation2 + $0x19c] sm:$0x8] }
 0x3a9   : > { %v5239_v23 = vadd.f32 %v8154_v21, %v5203_v54  ;;  %v4938_v38 = vrot.slane %v4937_v58, 4  ;;  %v4952_v44 = vrot.slane %v4950_v5, 5  ;;  %v3291_v27 = vpack.c.b16 %v3274_v32, %v3273_v33  ;;  %v8762_v58 = vld [vmem:[#allocation38_spill] sm:$0xff] }
 0x3aa   : > { %v3560_v7 = vpop.f32.mrf.mxu3  ;;  %v3133_v24 = vrot.slane %v3132_v25, 4  ;;  %v3143_v40 = vrot.slane %v3142_v1, 4  ;;  %v2665_v12 = vadd.f32 %v8759_v37, %v8758_v6  ;;  %v4462_v55 = vadd.f32 %v8240_v10, %v8243_v50  ;;  %v3695_v10 = vld [vmem:[#allocation2 + $0x1a4] sm:$0xf] }
 0x3ab   : > { %v3561_v15 = vadd.f32 %v3560_v7, %v7897_v61  ;;  %v5271_v29 = vmax.f32 %v5239_v23, 0.0  ;;  %v4943_v7 = vsel %vm6700_vm2, %v4938_v38, %v4942_v31  ;;  %v4953_v51 = vsel %vm6700_vm2, %v4948_v43, %v4952_v44  ;;  %v4592_v38 = vld [vmem:[#allocation2 + $0x1a4] sm:$0xf] }
 0x3ac   : > { %v3138_v13 = vsel %vm6700_vm2, %v3133_v24, %v3137_v11  ;;  %v3148_v59 = vsel %vm6700_vm2, %v3143_v40, %v3147_v4  ;;  %v5023_v14 = vunpack.c.l.b16 %v4953_v51  ;;  %v8761_v11 = vld [vmem:[#allocation13_spill] sm:$0xff] }
 0x3ad   : > { %v3625_v61 = vadd.f32 %v3561_v15, %v2663_v41  ;;  %v3275_v31 = vunpack.c.l.b16 %v3138_v13  ;;  %v3276_v22 = vunpack.c.l.b16 %v3148_v59  ;;  %v2668_v15 = vadd.f32 %v8762_v58, %v8761_v11  ;;  %v4591_v41 = vld [vmem:[#allocation2 + $0x1a0] sm:$0xf] }
 0x3ae   : > { %v5137_v60 = vpop.f32.mrf.mxu2  ;;  %v4465_v13 = vadd.f32 %v8263_v39, %v8265_v16  ;;  %v4467_v16 = vadd.f32 %v8284_v42, %v8288_v20 }
 0x3af   : > { %v5204_v56 = vadd.f32 %v5137_v60, %v4523_v17  ;;  %v4524_v54 = vadd.f32 %v4460_v3, %v3625_v61  ;;  %v5022_v17 = vunpack.c.l.b16 %v4943_v7  ;;  %v3292_v5 = vpack.c.b16 %v3276_v22, %v3275_v31  ;;  %v8341_v33 = vpop.f32.mrf.mxu1  ;;  %v8343_v61 = vpop.f32.mrf.mxu0  ;;  %v4593_v3 = vld [vmem:[#allocation2 + $0x1a8] sm:$0x1]  ;;  %v8764_v7 = vld [vmem:[#allocation16_spill] sm:$0xff] }
 0x3b0   : > { %v4968_v31 = vshrl.u32 %v4592_v38, 16  ;;  %v4974_v22 = vshll.u32 %v4593_v3, 16  ;;  %v8770_v3 = vld [vmem:[#allocation52_spill] sm:$0xff] }
 0x3b1   : > { %v5240_v47 = vadd.f32 %v8154_v21, %v5204_v56  ;;  %v5040_v28 = vpack.c.b16 %v5023_v14, %v5022_v17 }
 0x3b2   : > { %v3562_v0 = vpop.f32.mrf.mxu3  ;;  %v4970_v39 = vrot.slane %v4968_v31, 4 }
 0x3b3   : > { %v5272_v19 = vmax.f32 %v5240_v47, 0.0  ;;  %5179 = vmatmul.bf16.gmra.mxu2 %v5039_v8  ;;  %v3563_v2 = vadd.f32 %v3562_v0, %v8757_v48  ;;  %v3694_v47 = vld [vmem:[#allocation2 + $0x1a0] sm:$0xf]  ;;  %v4027_v8 = vshrl.u32 %v3693_v36, 16  ;;  %v4044_v0 = vshll.u32 %v3695_v10, 16 }
 0x3b4   : > { %v4032_v25 = vshrl.u32 %v3694_v47, 16  ;;  %v4035_v1 = vshll.u32 %v3694_v47, 16  ;;  %v4955_v48 = vshrl.u32 %v4591_v41, 16  ;;  %v4976_v47 = vrot.slane %v4974_v22, 5 }
 0x3b5   : > { %v6353_v45 = vpack.c.bf16 %v5272_v19, %v5271_v29  ;;  %v3626_v46 = vadd.f32 %v3563_v2, %v2665_v12  ;;  %v4041_v19 = vshrl.u32 %v3695_v10, 16  ;;  %v5930_v4 = vrot.slane %v4027_v8, 11  ;;  %v8763_v2 = vld [vmem:[#allocation3_spill] sm:$0xff] }
 0x3b6   : > { %v5140_v63 = vpop.f32.mrf.mxu2 }
 0x3b7   : > { %6431 = vst [vmem:[%s8179_s27 + $0x20] sm:$0xff] %v6353_v45   ;;  %3604 = vmatmul.bf16.gmra.mxu3 %v3291_v27  ;;  %v5205_v18 = vadd.f32 %v5140_v63, %v4524_v54  ;;  %v4525_v53 = vadd.f32 %v4462_v55, %v3626_v46  ;;  %v4034_v45 = vrot.slane %v4032_v25, 7  ;;  %v4043_v40 = vrot.slane %v4041_v19, 7  ;;  %v8765_v46 = vld [vmem:[#allocation39_spill] sm:$0xff]  ;;  %v4476_v10 = vpop.f32.mrf.mxu1 }
 0x3b8   : > { %v4958_v27 = vshll.u32 %v4591_v41, 16  ;;  %v4964_v63 = vshll.u32 %v4592_v38, 16  ;;  %v4957_v54 = vrot.slane %v4955_v48, 4  ;;  %v2670_v51 = vadd.f32 %v8765_v46, %v8764_v7 }
 0x3b9   : > { %v5241_v60 = vadd.f32 %v8154_v21, %v5205_v18  ;;  %v4037_v37 = vor.u32 %v4035_v1, %v4034_v45  ;;  %v4039_v12 = vrot.slane %v4034_v45, 4  ;;  %v4046_v18 = vor.u32 %v4044_v0, %v4043_v40 }
 0x3ba   : > { %v3565_v52 = vpop.f32.mrf.mxu3  ;;  %v4960_v55 = vrot.slane %v4958_v27, 5  ;;  %v4966_v14 = vrot.slane %v4964_v63, 5  ;;  %v4470_v7 = vadd.f32 %v8302_v49, %v8307_v26  ;;  %v8774_v26 = vld [vmem:[#allocation51_spill] sm:$0xff] }
 0x3bb   : > { %v3566_v23 = vadd.f32 %v3565_v52, %v8760_v35  ;;  %v5273_v32 = vmax.f32 %v5241_v60, 0.0  ;;  %v4038_v17 = vsel %vm6862_vm5, %v5930_v4, %v4037_v37  ;;  %v4047_v60 = vsel %vm6862_vm5, %v4039_v12, %v4046_v18  ;;  %v8772_v37 = vld [vmem:[#allocation41_spill] sm:$0xff] }
 0x3bc   : > { %v4078_v35 = vunpack.c.l.b16 %v4038_v17  ;;  %v4971_v36 = vor.u32 %v4970_v39, %v4966_v14 }
 0x3bd   : > { %v3627_v29 = vadd.f32 %v3566_v23, %v2668_v15 }
 0x3be   : > { %v5142_v56 = vpop.f32.mrf.mxu2  ;;  %v4972_v25 = vrot.slane %v4971_v36, 4 }
 0x3bf   : > { %v5206_v62 = vadd.f32 %v5142_v56, %v4525_v53  ;;  %v4526_v53 = vadd.f32 %v4465_v13, %v3627_v29  ;;  %v4079_v56 = vunpack.c.l.b16 %v4047_v60  ;;  %v8767_v29 = vld [vmem:[#allocation49_spill] sm:$0xff]  ;;  %v4479_v30 = vpop.f32.mrf.mxu1  ;;  %v4472_v13 = vadd.f32 %v8322_v34, %v8326_v57 }
 0x3c0   : > { %v4977_v42 = vsel %vm6700_vm2, %v4972_v25, %v4976_v47  ;;  %v4475_v47 = vadd.f32 %v8341_v33, %v8343_v61  ;;  %v8781_v33 = vld [vmem:[#allocation6_spill] sm:$0xff] }
 0x3c1   : > { %v5242_v50 = vadd.f32 %v8154_v21, %v5206_v62  ;;  %v4961_v62 = vor.u32 %v4960_v55, %v4957_v54  ;;  %v4095_v15 = vpack.c.b16 %v4079_v56, %v4078_v35  ;;  %v5025_v20 = vunpack.c.l.b16 %v4977_v42  ;;  %v8775_v35 = vld [vmem:[#allocation8_spill] sm:$0xff] }
 0x3c2   : > { %v3567_v44 = vpop.f32.mrf.mxu3 }
 0x3c3   : > { %v5274_v43 = vmax.f32 %v5242_v50, 0.0  ;;  %5184 = vmatmul.bf16.gmra.mxu2 %v5040_v28  ;;  %v3568_v24 = vadd.f32 %v3567_v44, %v8763_v2  ;;  %v4962_v28 = vrot.slane %v4961_v62, 4  ;;  %4419 = vmatmul.bf16.gmra.mxu0 %v4095_v15  ;;  %v8769_v44 = vld [vmem:[#allocation40_spill] sm:$0xff]  ;;  %v8777_v15 = vld [vmem:[#allocation17_spill] sm:$0xff] }
 0x3c5   : > { %v6358_v6 = vpack.c.bf16 %v5274_v43, %v5273_v32  ;;  %v3628_v23 = vadd.f32 %v3568_v24, %v2670_v51  ;;  %v4967_v8 = vsel %vm6700_vm2, %v4962_v28, %v4966_v14  ;;  %v8768_v43 = vld [vmem:[#allocation46_spill] sm:$0xff]  ;;  %v8778_v28 = vld [vmem:[#allocation5_spill] sm:$0xff] }
 0x3c6   : > { %v5145_v59 = vpop.f32.mrf.mxu2  ;;  %v5024_v9 = vunpack.c.l.b16 %v4967_v8  ;;  %v2673_v4 = vadd.f32 %v8769_v44, %v8768_v43  ;;  %v2680_v36 = vadd.f32 %v8778_v28, %v8777_v15  ;;  %v8780_v44 = vld [vmem:[#allocation18_spill] sm:$0xff] }
 0x3c7   : > { %6432 = vst [vmem:[%s8179_s27 + $0x28] sm:$0xff] %v6358_v6   ;;  %3609 = vmatmul.bf16.gmra.mxu3 %v3292_v5  ;;  %v5207_v11 = vadd.f32 %v5145_v59, %v4526_v53  ;;  %v4387_v5 = vpop.f32.mrf.mxu0  ;;  %v4527_v50 = vadd.f32 %v4467_v16, %v3628_v23  ;;  %v8771_v6 = vld [vmem:[#allocation48_spill] sm:$0xff]  ;;  %v4481_v31 = vpop.f32.mrf.mxu1  ;;  %v8773_v53 = vld [vmem:[#allocation54_spill] sm:$0xff]  ;;  %v2678_v23 = vadd.f32 %v8775_v35, %v8774_v26  ;;  %v8776_v16 = vld [vmem:[#allocation55_spill] sm:$0xff] }
 0x3c8   : > { %v5041_v38 = vpack.c.b16 %v5025_v20, %v5024_v9  ;;  %v2675_v12 = vadd.f32 %v8772_v37, %v8771_v6  ;;  %v4477_v9 = vadd.f32 %v4476_v10, %v4387_v5  ;;  %v2683_v61 = vadd.f32 %v8781_v33, %v8780_v44  ;;  %v8784_v6 = vld [vmem:[#allocation11_spill] sm:$0xff]  ;;  %v8793_v44 = vld [vmem:[#allocation14_spill] sm:$0xff] }
 0x3c9   : > { %v5243_v41 = vadd.f32 %v8154_v21, %v5207_v11 }
 0x3ca   : > { %v3570_v58 = vpop.f32.mrf.mxu3 }
 0x3cb   : > { %v3571_v19 = vadd.f32 %v3570_v58, %v8767_v29  ;;  %v5275_v45 = vmax.f32 %v5243_v41, 0.0 }
 0x3cd   : > { %v3629_v24 = vadd.f32 %v3571_v19, %v2673_v4 }
 0x3ce   : > { %v5147_v1 = vpop.f32.mrf.mxu2 }
 0x3cf   : > { %v5208_v32 = vadd.f32 %v5147_v1, %v4527_v50  ;;  %v4390_v54 = vpop.f32.mrf.mxu0  ;;  %v4528_v51 = vadd.f32 %v4470_v7, %v3629_v24  ;;  %v4484_v25 = vpop.f32.mrf.mxu1 }
 0x3d1   : > { %v5244_v0 = vadd.f32 %v8154_v21, %v5208_v32 }
 0x3d2   : > { %v3572_v2 = vpop.f32.mrf.mxu3 }
 0x3d3   : > { %v5276_v48 = vmax.f32 %v5244_v0, 0.0  ;;  %5189 = vmatmul.bf16.gmra.mxu2 %v5041_v38  ;;  %v3573_v27 = vadd.f32 %v3572_v2, %v8770_v3  ;;  %v8779_v0 = vld [vmem:[#allocation57_spill] sm:$0xff] }
 0x3d5   : > { %v6363_v40 = vpack.c.bf16 %v5276_v48, %v5275_v45  ;;  %v3630_v46 = vadd.f32 %v3573_v27, %v2675_v12  ;;  %v4480_v12 = vadd.f32 %v4479_v30, %v4390_v54  ;;  %v8399_v30 = vld [vmem:[%s8469_s4] ss:$0 sm:$0xff] }
 0x3d6   : > { %v5150_v63 = vpop.f32.mrf.mxu2 }
 0x3d7   : > { %6433 = vst [vmem:[%s8179_s27 + $0x30] sm:$0xff] %v6363_v40   ;;  %v5209_v59 = vadd.f32 %v5150_v63, %v4528_v51  ;;  %v4529_v55 = vadd.f32 %v4472_v13, %v3630_v46  ;;  %v4392_v22 = vpop.f32.mrf.mxu0  ;;  %v4486_v2 = vpop.f32.mrf.mxu1  ;;  %v8782_v40 = vld [vmem:[#allocation59_spill] sm:$0xff]  ;;  %v8783_v63 = vld [vmem:[#allocation20_spill] sm:$0xff] }
 0x3d8   : > { %v2685_v37 = vadd.f32 %v8784_v6, %v8783_v63  ;;  %v4482_v51 = vadd.f32 %v4481_v31, %v4392_v22  ;;  %v8786_v31 = vld [vmem:[#allocation22_spill] sm:$0xff]  ;;  %v8787_v22 = vld [vmem:[#allocation12_spill] sm:$0xff] }
 0x3d9   : > { %v5245_v17 = vadd.f32 %v8154_v21, %v5209_v59  ;;  %v2688_v26 = vadd.f32 %v8787_v22, %v8786_v31 }
 0x3da   : > { %v3575_v18 = vpop.f32.mrf.mxu3 }
 0x3db   : > { %v3576_v60 = vadd.f32 %v3575_v18, %v8773_v53  ;;  %v5277_v56 = vmax.f32 %v5245_v17, 0.0 }
 0x3dd   : > { %v3631_v57 = vadd.f32 %v3576_v60, %v2678_v23  ;;  %v8785_v60 = vld [vmem:[#allocation61_spill] sm:$0xff] }
 0x3de   : > { %v5152_v52 = vpop.f32.mrf.mxu2 }
 0x3df   : > { %v5210_v14 = vadd.f32 %v5152_v52, %v4529_v55  ;;  %v4530_v8 = vadd.f32 %v4475_v47, %v3631_v57  ;;  %v4395_v1 = vpop.f32.mrf.mxu0  ;;  %v4489_v55 = vpop.f32.mrf.mxu1  ;;  %v8788_v57 = vld [vmem:[#allocation63_spill] sm:$0xff] }
 0x3e0   : > { %v4485_v15 = vadd.f32 %v4484_v25, %v4395_v1  ;;  %v8792_v1 = vld [vmem:[#allocation26_spill] sm:$0xff] }
 0x3e1   : > { %v5246_v49 = vadd.f32 %v8154_v21, %v5210_v14  ;;  %v2693_v33 = vadd.f32 %v8793_v44, %v8792_v1 }
 0x3e2   : > { %v3577_v34 = vpop.f32.mrf.mxu3 }
 0x3e3   : > { %v5278_v62 = vmax.f32 %v5246_v49, 0.0  ;;  %v3578_v11 = vadd.f32 %v3577_v34, %v8776_v16  ;;  %v8789_v16 = vld [vmem:[#allocation24_spill] sm:$0xff] }
 0x3e5   : > { %v6368_v39 = vpack.c.bf16 %v5278_v62, %v5277_v56  ;;  %v3632_v50 = vadd.f32 %v3578_v11, %v2680_v36  ;;  %v8790_v11 = vld [vmem:[#allocation9_spill] sm:$0xff] }
 0x3e6   : > { %v5155_v58 = vpop.f32.mrf.mxu2 }
 0x3e7   : > { %6434 = vst [vmem:[%s8179_s27 + $0x38] sm:$0xff] %v6368_v39   ;;  %v5211_v41 = vadd.f32 %v5155_v58, %v4530_v8  ;;  %v4531_v42 = vadd.f32 %v4477_v9, %v3632_v50  ;;  %v4397_v10 = vpop.f32.mrf.mxu0  ;;  %v2690_v58 = vadd.f32 %v8790_v11, %v8789_v16  ;;  %v4491_v28 = vpop.f32.mrf.mxu1  ;;  %v8802_v16 = vld [vmem:[#allocation50_spill] sm:$0xff] }
 0x3e8   : > { %v4487_v8 = vadd.f32 %v4486_v2, %v4397_v10  ;;  %v8794_v10 = vld [vmem:[#allocation67_spill] sm:$0xff] }
 0x3e9   : > { %v5247_v29 = vadd.f32 %v8154_v21, %v5211_v41 }
 0x3ea   : > { %v3580_v32 = vpop.f32.mrf.mxu3 }
 0x3eb   : > { %v3581_v38 = vadd.f32 %v3580_v32, %v8779_v0  ;;  %v5279_v4 = vmax.f32 %v5247_v29, 0.0 }
 0x3ed   : > { %v3633_v5 = vadd.f32 %v3581_v38, %v2683_v61 }
 0x3ee   : > { %v5157_v20 = vpop.f32.mrf.mxu2 }
 0x3ef   : > { %v5212_v19 = vadd.f32 %v5157_v20, %v4531_v42  ;;  %v4532_v46 = vadd.f32 %v4480_v12, %v3633_v5  ;;  %v4400_v17 = vpop.f32.mrf.mxu0 }
 0x3f0   : > { %v4490_v63 = vadd.f32 %v4489_v55, %v4400_v17  ;;  %v8799_v55 = vld [vmem:[#allocation47_spill] sm:$0xff] }
 0x3f1   : > { %v5248_v43 = vadd.f32 %v8154_v21, %v5212_v19  ;;  %v8791_v19 = vld [vmem:[#allocation65_spill] sm:$0xff] }
 0x3f2   : > { %v3582_v48 = vpop.f32.mrf.mxu3 }
 0x3f3   : > { %v5280_v45 = vmax.f32 %v5248_v43, 0.0  ;;  %v3583_v3 = vadd.f32 %v3582_v48, %v8782_v40  ;;  %v4494_v43 = vpop.f32.mrf.mxu1  ;;  %v8795_v40 = vld [vmem:[#allocation64_spill] sm:$0xff] }
 0x3f5   : > { %v6373_v24 = vpack.c.bf16 %v5280_v45, %v5279_v4  ;;  %v3634_v7 = vadd.f32 %v3583_v3, %v2685_v37  ;;  %v8796_v3 = vld [vmem:[#allocation45_spill] sm:$0xff] }
 0x3f6   : > { %v5160_v27 = vpop.f32.mrf.mxu2 }
 0x3f7   : > { %6435 = vst [vmem:[%s8179_s27 + $0x40] sm:$0xff] %v6373_v24   ;;  %v5213_v13 = vadd.f32 %v5160_v27, %v4532_v46  ;;  %v4533_v18 = vadd.f32 %v4482_v51, %v3634_v7  ;;  %v4402_v36 = vpop.f32.mrf.mxu0  ;;  %v2695_v27 = vadd.f32 %v8796_v3, %v8795_v40 }
 0x3f8   : > { %v4492_v12 = vadd.f32 %v4491_v28, %v4402_v36 }
 0x3f9   : > { %v5249_v14 = vadd.f32 %v8154_v21, %v5213_v13 }
 0x3fa   : > { %v3585_v59 = vpop.f32.mrf.mxu3 }
 0x3fb   : > { %v3586_v49 = vadd.f32 %v3585_v59, %v8785_v60  ;;  %v5281_v35 = vmax.f32 %v5249_v14, 0.0  ;;  %v4496_v51 = vpop.f32.mrf.mxu1 }
 0x3fd   : > { %v3635_v62 = vadd.f32 %v3586_v49, %v2688_v26 }
 0x3fe   : > { %v5162_v52 = vpop.f32.mrf.mxu2 }
 0x3ff   : > { %v5214_v53 = vadd.f32 %v5162_v52, %v4533_v18  ;;  %v4534_v50 = vadd.f32 %v4485_v15, %v3635_v62  ;;  %v4405_v25 = vpop.f32.mrf.mxu0 }
 0x401   : > { %v5250_v54 = vadd.f32 %v8399_v30, %v5214_v53  ;;  %v8797_v53 = vld [vmem:[#allocation68_spill] sm:$0xff] }
 0x402   : > { %v3587_v56 = vpop.f32.mrf.mxu3 }
 0x403   : > { %v5282_v23 = vmax.f32 %v5250_v54, 0.0  ;;  %v3588_v21 = vadd.f32 %v3587_v56, %v8788_v57  ;;  %v8798_v54 = vld [vmem:[#allocation29_spill] sm:$0xff] }
 0x404   : > { %v2698_v17 = vadd.f32 %v8799_v55, %v8798_v54  ;;  %v8800_v56 = vld [vmem:[#allocation69_spill] sm:$0xff] }
 0x405   : > { %v6378_v34 = vpack.c.bf16 %v5282_v23, %v5281_v35  ;;  %v3636_v47 = vadd.f32 %v3588_v21, %v2690_v58  ;;  %v4495_v58 = vadd.f32 %v4494_v43, %v4405_v25  ;;  %v8805_v43 = vld [vmem:[#allocation53_spill] sm:$0xff] }
 0x406   : > { %v5165_v39 = vpop.f32.mrf.mxu2 }
 0x407   : > { %6436 = vst [vmem:[%s8179_s27 + $0x48] sm:$0xff] %v6378_v34   ;;  %v5215_v9 = vadd.f32 %v5165_v39, %v4534_v50  ;;  %v4535_v32 = vadd.f32 %v4487_v8, %v3636_v47  ;;  %v4407_v13 = vpop.f32.mrf.mxu0  ;;  %v4499_v34 = vpop.f32.mrf.mxu1  ;;  %v8801_v39 = vld [vmem:[#allocation31_spill] sm:$0xff] }
 0x408   : > { %v2700_v11 = vadd.f32 %v8802_v16, %v8801_v39  ;;  %v4497_v36 = vadd.f32 %v4496_v51, %v4407_v13 }
 0x409   : > { %v5251_v20 = vadd.f32 %v8399_v30, %v5215_v9 }
 0x40a   : > { %v3590_v41 = vpop.f32.mrf.mxu3 }
 0x40b   : > { %v3591_v0 = vadd.f32 %v3590_v41, %v8791_v19  ;;  %v5283_v61 = vmax.f32 %v5251_v20, 0.0 }
 0x40d   : > { %v3637_v48 = vadd.f32 %v3591_v0, %v2693_v33 }
 0x40e   : > { %v5167_v42 = vpop.f32.mrf.mxu2 }
 0x40f   : > { %v5216_v29 = vadd.f32 %v5167_v42, %v4535_v32  ;;  %v4536_v37 = vadd.f32 %v4490_v63, %v3637_v48  ;;  %v4410_v21 = vpop.f32.mrf.mxu0  ;;  %v4501_v42 = vpop.f32.mrf.mxu1 }
 0x410   : > { %v4500_v40 = vadd.f32 %v4499_v34, %v4410_v21  ;;  %v8813_v34 = vld [vmem:[#allocation74_spill] sm:$0xff] }
 0x411   : > { %v5252_v38 = vadd.f32 %v8399_v30, %v5216_v29  ;;  %v8803_v29 = vld [vmem:[#allocation71_spill] sm:$0xff] }
 0x412   : > { %v3592_v45 = vpop.f32.mrf.mxu3 }
 0x413   : > { %v5284_v4 = vmax.f32 %v5252_v38, 0.0  ;;  %v3593_v5 = vadd.f32 %v3592_v45, %v8794_v10  ;;  %v8804_v38 = vld [vmem:[#allocation33_spill] sm:$0xff]  ;;  %v8807_v10 = vld [vmem:[#allocation70_spill] sm:$0xff] }
 0x414   : > { %v2703_v25 = vadd.f32 %v8805_v43, %v8804_v38  ;;  %v8806_v45 = vld [vmem:[#allocation73_spill] sm:$0xff]  ;;  %v8816_v38 = vld [vmem:[#allocation76_spill] sm:$0xff]  ;;  %v8817_v43 = vld [vmem:[#allocation62_spill] sm:$0xff] }
 0x415   : > { %v6383_v2 = vpack.c.bf16 %v5284_v4, %v5283_v61  ;;  %v3638_v6 = vadd.f32 %v3593_v5, %v2695_v27  ;;  %v8808_v5 = vld [vmem:[#allocation56_spill] sm:$0xff] }
 0x416   : > { %v5170_v24 = vpop.f32.mrf.mxu2 }
 0x417   : > { %6437 = vst [vmem:[%s8179_s27 + $0x50] sm:$0xff] %v6383_v2   ;;  %v5217_v7 = vadd.f32 %v5170_v24, %v4536_v37  ;;  %v4537_v59 = vadd.f32 %v4492_v12, %v3638_v6  ;;  %v4412_v20 = vpop.f32.mrf.mxu0  ;;  %v2705_v24 = vadd.f32 %v8808_v5, %v8807_v10  ;;  %v4504_v63 = vpop.f32.mrf.mxu1  ;;  %v8819_v10 = vld [vmem:[#allocation78_spill] sm:$0xff] }
 0x418   : > { %v4502_v37 = vadd.f32 %v4501_v42, %v4412_v20  ;;  %v8815_v42 = vld [vmem:[#allocation79_spill] sm:$0xff]  ;;  %v8820_v5 = vld [vmem:[#allocation66_spill] sm:$0xff] }
 0x419   : > { %v5253_v52 = vadd.f32 %v8399_v30, %v5217_v7 }
 0x41a   : > { %v3595_v46 = vpop.f32.mrf.mxu3 }
 0x41b   : > { %v3596_v60 = vadd.f32 %v3595_v46, %v8797_v53  ;;  %v5285_v31 = vmax.f32 %v5253_v52, 0.0  ;;  %v8810_v53 = vld [vmem:[#allocation72_spill] sm:$0xff] }
 0x41d   : > { %v3639_v35 = vadd.f32 %v3596_v60, %v2698_v17  ;;  %v8811_v60 = vld [vmem:[#allocation58_spill] sm:$0xff] }
 0x41e   : > { %v5172_v18 = vpop.f32.mrf.mxu2 }
 0x41f   : > { %v5218_v14 = vadd.f32 %v5172_v18, %v4537_v59  ;;  %v4538_v28 = vadd.f32 %v4495_v58, %v3639_v35  ;;  %v4415_v6 = vpop.f32.mrf.mxu0  ;;  %v8809_v18 = vld [vmem:[#allocation75_spill] sm:$0xff] }
 0x420   : > { %v4505_v39 = vadd.f32 %v4504_v63, %v4415_v6 }
 0x421   : > { %v5254_v49 = vadd.f32 %v8399_v30, %v5218_v14 }
 0x422   : > { %v3597_v26 = vpop.f32.mrf.mxu3 }
 0x423   : > { %v5286_v22 = vmax.f32 %v5254_v49, 0.0  ;;  %v3598_v62 = vadd.f32 %v3597_v26, %v8800_v56  ;;  %v2708_v49 = vadd.f32 %v8811_v60, %v8810_v53 }
 0x425   : > { %v6388_v23 = vpack.c.bf16 %v5286_v22, %v5285_v31  ;;  %v3640_v15 = vadd.f32 %v3598_v62, %v2700_v11  ;;  %v4506_v31 = vpop.f32.mrf.mxu1 }
 0x426   : > { %v5175_v57 = vpop.f32.mrf.mxu2 }
 0x427   : > { %6438 = vst [vmem:[%s8179_s27 + $0x58] sm:$0xff] %v6388_v23   ;;  %v5219_v47 = vadd.f32 %v5175_v57, %v4538_v28  ;;  %v4539_v8 = vadd.f32 %v4497_v36, %v3640_v15  ;;  %v4417_v22 = vpop.f32.mrf.mxu0  ;;  %v8812_v23 = vld [vmem:[#allocation77_spill] sm:$0xff]  ;;  %v8814_v57 = vld [vmem:[#allocation60_spill] sm:$0xff] }
 0x428   : > { %v2710_v21 = vadd.f32 %v8814_v57, %v8813_v34  ;;  %v4507_v58 = vadd.f32 %v4506_v31, %v4417_v22 }
 0x429   : > { %v5255_v41 = vadd.f32 %v8399_v30, %v5219_v47 }
 0x42a   : > { %v3600_v50 = vpop.f32.mrf.mxu3 }
 0x42b   : > { %v3601_v19 = vadd.f32 %v3600_v50, %v8803_v29  ;;  %v5287_v1 = vmax.f32 %v5255_v41, 0.0 }
 0x42d   : > { %v3641_v61 = vadd.f32 %v3601_v19, %v2703_v25  ;;  %v4509_v36 = vpop.f32.mrf.mxu1  ;;  %v2713_v25 = vadd.f32 %v8817_v43, %v8816_v38 }
 0x42e   : > { %v5177_v9 = vpop.f32.mrf.mxu2 }
 0x42f   : > { %v5220_v32 = vadd.f32 %v5177_v9, %v4539_v8  ;;  %v4540_v27 = vadd.f32 %v4500_v40, %v3641_v61  ;;  %v8818_v61 = vld [vmem:[#allocation80_spill] sm:$0xff] }
 0x431   : > { %v5256_v0 = vadd.f32 %v8399_v30, %v5220_v32 }
 0x432   : > { %v3602_v33 = vpop.f32.mrf.mxu3 }
 0x433   : > { %v5288_v44 = vmax.f32 %v5256_v0, 0.0  ;;  %v3603_v48 = vadd.f32 %v3602_v33, %v8806_v45 }
 0x435   : > { %v6393_v4 = vpack.c.bf16 %v5288_v44, %v5287_v1  ;;  %v3642_v3 = vadd.f32 %v3603_v48, %v2705_v24  ;;  %v4511_v45 = vpop.f32.mrf.mxu1  ;;  %v2715_v24 = vadd.f32 %v8820_v5, %v8819_v10 }
 0x436   : > { %v5180_v2 = vpop.f32.mrf.mxu2 }
 0x437   : > { %6439 = vst [vmem:[%s8179_s27 + $0x60] sm:$0xff] %v6393_v4   ;;  %v5221_v12 = vadd.f32 %v5180_v2, %v4540_v27  ;;  %v4541_v46 = vadd.f32 %v4502_v37, %v3642_v3 }
 0x439   : > { %v5257_v13 = vadd.f32 %v8399_v30, %v5221_v12 }
 0x43a   : > { %v3605_v7 = vpop.f32.mrf.mxu3 }
 0x43b   : > { %v3606_v52 = vadd.f32 %v3605_v7, %v8809_v18  ;;  %v5289_v54 = vmax.f32 %v5257_v13, 0.0 }
 0x43d   : > { %v3643_v26 = vadd.f32 %v3606_v52, %v2708_v49 }
 0x43e   : > { %v5182_v51 = vpop.f32.mrf.mxu2 }
 0x43f   : > { %v5222_v59 = vadd.f32 %v5182_v51, %v4541_v46  ;;  %v4542_v11 = vadd.f32 %v4505_v39, %v3643_v26 }
 0x440   : > { %v4420_v47 = vpop.f32.mrf.mxu0 }
 0x441   : > { %v5258_v14 = vadd.f32 %v8399_v30, %v5222_v59  ;;  %v4510_v33 = vadd.f32 %v4509_v36, %v4420_v47 }
 0x442   : > { %v3607_v17 = vpop.f32.mrf.mxu3 }
 0x443   : > { %v5290_v55 = vmax.f32 %v5258_v14, 0.0  ;;  %v3608_v56 = vadd.f32 %v3607_v17, %v8812_v23 }
 0x445   : > { %v6398_v35 = vpack.c.bf16 %v5290_v55, %v5289_v54  ;;  %v3644_v16 = vadd.f32 %v3608_v56, %v2710_v21 }
 0x446   : > { %v5185_v62 = vpop.f32.mrf.mxu2 }
 0x447   : > { %6440 = vst [vmem:[%s8179_s27 + $0x68] sm:$0xff] %v6398_v35   ;;  %v5223_v15 = vadd.f32 %v5185_v62, %v4542_v11  ;;  %v4543_v50 = vadd.f32 %v4507_v58, %v3644_v16 }
 0x448   : > { %v4422_v48 = vpop.f32.mrf.mxu0 }
 0x449   : > { %v5259_v9 = vadd.f32 %v8399_v30, %v5223_v15  ;;  %v4512_v3 = vadd.f32 %v4511_v45, %v4422_v48 }
 0x44a   : > { %v3610_v28 = vpop.f32.mrf.mxu3 }
 0x44b   : > { %v3611_v20 = vadd.f32 %v3610_v28, %v8815_v42  ;;  %v5291_v29 = vmax.f32 %v5259_v9, 0.0 }
 0x44d   : > { %v3645_v44 = vadd.f32 %v3611_v20, %v2713_v25 }
 0x44e   : > { %v5187_v8 = vpop.f32.mrf.mxu2 }
 0x44f   : > { %v5224_v41 = vadd.f32 %v5187_v8, %v4543_v50  ;;  %v4544_v27 = vadd.f32 %v4510_v33, %v3645_v44 }
 0x451   : > { %v5260_v32 = vadd.f32 %v8399_v30, %v5224_v41 }
 0x452   : > { %v3612_v0 = vpop.f32.mrf.mxu3 }
 0x453   : > { %v5292_v19 = vmax.f32 %v5260_v32, 0.0  ;;  %v3613_v4 = vadd.f32 %v3612_v0, %v8818_v61 }
 0x455   : > { %v6403_v1 = vpack.c.bf16 %v5292_v19, %v5291_v29  ;;  %v3646_v40 = vadd.f32 %v3613_v4, %v2715_v24 }
 0x456   : > { %v5190_v2 = vpop.f32.mrf.mxu2 }
 0x457   : > { %6441 = vst [vmem:[%s8179_s27 + $0x70] sm:$0xff] %v6403_v1   ;;  %v5225_v63 = vadd.f32 %v5190_v2, %v4544_v27  ;;  %v4545_v6 = vadd.f32 %v4512_v3, %v3646_v40 }
 0x459   : > { %v5261_v12 = vadd.f32 %v8399_v30, %v5225_v63 }
 0x45b   : > { %v5293_v51 = vmax.f32 %v5261_v12, 0.0 }
 0x45e   : > { %v5192_v37 = vpop.f32.mrf.mxu2 }
 0x45f   : > { %v5226_v7 = vadd.f32 %v5192_v37, %v4545_v6 }
 0x461   : > { %v5262_v46 = vadd.f32 %v8399_v30, %v5226_v7 }
 0x463   : > { %v5294_v13 = vmax.f32 %v5262_v46, 0.0 }
 0x465   : > { %v6408_v59 = vpack.c.bf16 %v5294_v13, %v5293_v51 }
 0x467   : > { %6442 = vst [vmem:[%s8179_s27 + $0x78] sm:$0xff] %v6408_v59  }
 0x468 PF: > { %s15_s20 = sadd.s32 1, %s6511_s20   ;;  %s8821_s18 = smov %s6507_s19 }
 0x469   : > { %p12_p5 = scmp.ge.s32.totalorder %s15_s20, 4   ;;  %s8822_s19 = smov %s8824_s21 }
 0x46b   :  { %14 = sbr.rel (!%p12_p5) target bundleno = 2 (0x2), region = 77 }

</bundles_post_ra>
